<compile_context>
chip_gen: v6e
topology: v6e:2x2x1
jax: 0.10.0
libtpu: 0.0.40
codegen_flags: <defaults>
</compile_context>

<pallas_src>
import math

import jax
import jax.numpy as jnp
from jax.experimental import pallas as pl
from jax.experimental.pallas import tpu as pltpu


_N_MAMBA_PARAMS = 12  # per direction


# ----------------------------------------------------------------------------
# Fused kernel factory
# ----------------------------------------------------------------------------
def _make_block_kernel(L, Lp, T, K):
    n_chunks = Lp // T

    def mamba_dir(h, params, conv_sc, dt_sc, dtxc_sc, b_sc, c_sc, y_sc):
        (w_inx, w_inz, conv_w, conv_b, w_dt, w_B, w_C,
         dtproj_w, dtproj_b, a_log_t, d_skip, w_out) = params
        N, E = a_log_t.shape                                    # lane-dense: E last

        xi = jnp.dot(h, w_inx, preferred_element_type=jnp.float32)   # (L, E)
        z = jnp.dot(h, w_inz, preferred_element_type=jnp.float32)    # (L, E)

        # Causal depthwise conv1d via a zero-padded staging buffer (no concatenates).
        conv_sc[0:K - 1, :] = jnp.zeros((K - 1, E), jnp.float32)
        conv_sc[K - 1:K - 1 + L, :] = xi
        xc = jnp.zeros((L, E), jnp.float32)
        for k in range(K):                                       # static, K=4 taps
            xc = xc + conv_sc[k:k + L, :] * conv_w[k:k + 1, :]
        xc = xc + conv_b
        xc = xc * jax.nn.sigmoid(xc)                             # SiLU

        # Input-dependent projections (MXU, full sequence at once).
        dt_low = jnp.dot(xc, w_dt, preferred_element_type=jnp.float32)   # (L, R)
        Bmat = jnp.dot(xc, w_B, preferred_element_type=jnp.float32)      # (L, N)
        Cmat = jnp.dot(xc, w_C, preferred_element_type=jnp.float32)      # (L, N)
        dt = jnp.dot(dt_low, dtproj_w, preferred_element_type=jnp.float32) + dtproj_b
        # softplus with threshold 20 (matches F.softplus)
        dt = jnp.where(dt > 20.0, dt, jnp.log1p(jnp.exp(jnp.minimum(dt, 20.0))))

        # Stage only the small per-step coefficients (O(L*E)), not (L,E,N) tensors.
        dt_sc[0:L, :] = dt
        dtxc_sc[0:L, :] = dt * xc
        b_sc[0:L, :] = Bmat
        c_sc[0:L, :] = Cmat
        if Lp > L:  # zero the padded tail -> padded steps are exact no-ops
            dt_sc[L:Lp, :] = jnp.zeros((Lp - L, E), jnp.float32)
            dtxc_sc[L:Lp, :] = jnp.zeros((Lp - L, E), jnp.float32)
            b_sc[L:Lp, :] = jnp.zeros((Lp - L, N), jnp.float32)
            c_sc[L:Lp, :] = jnp.zeros((Lp - L, N), jnp.float32)

        a_t = -jnp.exp(a_log_t)                                   # (N, E)

        def chunk_body(c, h_state):                               # h_state: (N, E) in vregs
            t0 = pl.multiple_of(c * T, T)
            dt_c = dt_sc[pl.ds(t0, T), :]                         # (T, E)
            dtxc_c = dtxc_sc[pl.ds(t0, T), :]                     # (T, E)
            B_c = b_sc[pl.ds(t0, T), :]                           # (T, N)
            C_c = c_sc[pl.ds(t0, T), :]                           # (T, N)
            dA_c = jnp.exp(dt_c[:, None, :] * a_t[None, :, :])    # (T, N, E)  per-chunk only
            dBx_c = dtxc_c[:, None, :] * B_c[:, :, None]          # (T, N, E)
            C_bc = C_c[:, :, None]                                # (T, N, 1)
            ys = []
            for t in range(T):                                    # static, unrolled
                h_state = dA_c[t] * h_state + dBx_c[t]            # (N, E)
                ys.append(jnp.sum(h_state * C_bc[t], axis=0, keepdims=True))  # (1, E)
            y_sc[pl.ds(t0, T), :] = jnp.concatenate(ys, axis=0)   # one (T, E) slab store
            return h_state

        jax.lax.fori_loop(0, n_chunks, chunk_body,
                          jnp.zeros((N, E), jnp.float32))

        y = y_sc[0:L, :] + xc * d_skip                            # D skip
        y = y * (z * jax.nn.sigmoid(z))                           # gate with SiLU(z)
        return jnp.dot(y, w_out, preferred_element_type=jnp.float32)  # (L, D)

    def kernel(*refs):
        x_ref, lng_ref, lnb_ref = refs[0], refs[1], refs[2]
        p1 = tuple(r[...] for r in refs[3:3 + _N_MAMBA_PARAMS])
        p2 = tuple(r[...] for r in refs[3 + _N_MAMBA_PARAMS:3 + 2 * _N_MAMBA_PARAMS])
        o_ref = refs[3 + 2 * _N_MAMBA_PARAMS]
        conv_sc, dt_sc, dtxc_sc, b_sc, c_sc, y_sc = refs[4 + 2 * _N_MAMBA_PARAMS:]

        x = x_ref[0]                                              # (L, D)

        # --- LayerNorm (eps = 1e-5) ---
        mean = jnp.mean(x, axis=-1, keepdims=True)
        xm = x - mean
        var = jnp.mean(xm * xm, axis=-1, keepdims=True)
        h = xm * jax.lax.rsqrt(var + 1e-5) * lng_ref[...] + lnb_ref[...]

        # --- sequence flip in VMEM (anti-identity matmul; no HBM round trip) ---
        row = jax.lax.broadcasted_iota(jnp.int32, (L, L), 0)
        col = jax.lax.broadcasted_iota(jnp.int32, (L, L), 1)
        flip_mat = (row + col == L - 1).astype(jnp.float32)
        h_rev = jnp.dot(flip_mat, h, preferred_element_type=jnp.float32)

        scr = (conv_sc, dt_sc, dtxc_sc, b_sc, c_sc, y_sc)
        y_fwd = mamba_dir(h, p1, *scr)           # mamba1
        y_bwd = mamba_dir(h_rev, p2, *scr)       # mamba2 (output NOT re-flipped, as in torch)

        out = y_fwd + y_bwd + x                  # drop_path / dropout are identity (p=0)
        # exact (erf) GELU like nn.GELU()
        o_ref[0] = (0.5 * out * (1.0 + jax.lax.erf(out * 0.7071067811865476))
                    ).astype(o_ref.dtype)

    return kernel


def _full_spec(shape):
    n = len(shape)
    return pl.BlockSpec(shape, lambda b, n=n: (0,) * n)


def _pack_params(p):
    # A_log is passed pre-transposed to (N, E) so the in-kernel state is lane-dense.
    return (p["w_inx"], p["w_inz"], p["conv_w"], p["conv_b"], p["w_dt"],
            p["w_B"], p["w_C"], p["dtproj_w"], p["dtproj_b"],
            jnp.transpose(p["A_log"]), p["D"], p["w_out"])


# ----------------------------------------------------------------------------
# Full block forward — one fused pallas_call, grid over batch
# ----------------------------------------------------------------------------
def bidirectional_add_block(x, ln_gamma, ln_beta, p1, p2, *,
                            scan_chunk=8, vmem_limit_bytes=None):
    B, L, D = x.shape
    E, N = p1["A_log"].shape
    K = p1["conv_w"].shape[0]
    T = int(scan_chunk)
    Lp = T * ((L + T - 1) // T)                  # padded scan length (multiple of T)

    kernel = _make_block_kernel(L=L, Lp=Lp, T=T, K=K)

    cp_kwargs = dict(dimension_semantics=("parallel",))   # megacore on v7x
    if vmem_limit_bytes is not None:                       # e.g. 48 << 20 at Vim sizes on v7x
        cp_kwargs["vmem_limit_bytes"] = int(vmem_limit_bytes)

    args = (x, ln_gamma, ln_beta) + _pack_params(p1) + _pack_params(p2)
    in_specs = [pl.BlockSpec((1, L, D), lambda b: (b, 0, 0))]
    in_specs += [_full_spec(a.shape) for a in args[1:]]

    grid_spec = pltpu.PrefetchScalarGridSpec(
        num_scalar_prefetch=0,
        grid=(B,),
        in_specs=in_specs,
        out_specs=pl.BlockSpec((1, L, D), lambda b: (b, 0, 0)),
        scratch_shapes=[
            pltpu.VMEM((L + K - 1, E), jnp.float32),   # padded conv staging
            pltpu.VMEM((Lp, E), jnp.float32),          # dt
            pltpu.VMEM((Lp, E), jnp.float32),          # dt * x
            pltpu.VMEM((Lp, N), jnp.float32),          # B
            pltpu.VMEM((Lp, N), jnp.float32),          # C
            pltpu.VMEM((Lp, E), jnp.float32),          # scan outputs y
        ],
    )

    return pl.pallas_call(
        kernel,
        out_shape=jax.ShapeDtypeStruct((B, L, D), jnp.float32),
        grid_spec=grid_spec,
        compiler_params=pltpu.CompilerParams(**cp_kwargs),
    )(*args)


# ----------------------------------------------------------------------------
# Deterministic parameter init (synthetic; mirrors Mamba(d_model) shapes)
# ----------------------------------------------------------------------------
def init_mamba_params(key, d_model, d_state=16, d_conv=4, expand=2):
    d_inner = expand * d_model
    dt_rank = math.ceil(d_model / 16)
    ks = jax.random.split(key, 9)
    f32 = jnp.float32
    return dict(
        w_inx=jax.random.normal(ks[0], (d_model, d_inner), f32) / math.sqrt(d_model),
        w_inz=jax.random.normal(ks[1], (d_model, d_inner), f32) / math.sqrt(d_model),
        conv_w=jax.random.normal(ks[2], (d_conv, d_inner), f32) * 0.2,
        conv_b=jax.random.normal(ks[3], (1, d_inner), f32) * 0.1,
        w_dt=jax.random.normal(ks[4], (d_inner, dt_rank), f32) / math.sqrt(d_inner),
        w_B=jax.random.normal(ks[5], (d_inner, d_state), f32) / math.sqrt(d_inner),
        w_C=jax.random.normal(ks[6], (d_inner, d_state), f32) / math.sqrt(d_inner),
        dtproj_w=jax.random.normal(ks[7], (dt_rank, d_inner), f32) / math.sqrt(dt_rank),
        dtproj_b=jnp.full((1, d_inner), -2.0, f32),
        A_log=jnp.log(jnp.broadcast_to(
            jnp.arange(1, d_state + 1, dtype=f32), (d_inner, d_state))),
        D=jnp.ones((1, d_inner), f32),
        w_out=jax.random.normal(ks[8], (d_inner, d_model), f32) / math.sqrt(d_inner),
    )


# ----------------------------------------------------------------------------
# Pure-JAX reference (for verification only)
# ----------------------------------------------------------------------------
def _ref_mamba(h, p):
    Bsz, L, _ = h.shape
    E, N = p["A_log"].shape
    K = p["conv_w"].shape[0]
    xi = jnp.einsum("bld,de->ble", h, p["w_inx"])
    z = jnp.einsum("bld,de->ble", h, p["w_inz"])
    xp = jnp.pad(xi, ((0, 0), (K - 1, 0), (0, 0)))
    xc = sum(xp[:, k:k + L, :] * p["conv_w"][k][None, None, :] for k in range(K))
    xc = xc + p["conv_b"]
    xc = xc * jax.nn.sigmoid(xc)
    dt = jnp.einsum("ble,er->blr", xc, p["w_dt"])
    Bm = jnp.einsum("ble,en->bln", xc, p["w_B"])
    Cm = jnp.einsum("ble,en->bln", xc, p["w_C"])
    dt = jax.nn.softplus(jnp.einsum("blr,re->ble", dt, p["dtproj_w"]) + p["dtproj_b"])
    A = -jnp.exp(p["A_log"])
    dA = jnp.exp(dt[..., None] * A[None, None])
    dBx = (dt * xc)[..., None] * Bm[:, :, None, :]

    def step(hst, inp):
        dA_t, dBx_t, C_t = inp
        hst = dA_t * hst + dBx_t
        return hst, jnp.sum(hst * C_t[:, None, :], axis=-1)

    h0 = jnp.zeros((Bsz, E, N), jnp.float32)
    _, ys = jax.lax.scan(step, h0, (dA.transpose(1, 0, 2, 3),
                                    dBx.transpose(1, 0, 2, 3),
                                    Cm.transpose(1, 0, 2)))
    y = ys.transpose(1, 0, 2) + xc * p["D"]
    y = y * (z * jax.nn.sigmoid(z))
    return jnp.einsum("ble,ed->bld", y, p["w_out"])


def _ref_forward(x, ln_g, ln_b, p1, p2):
    mean = jnp.mean(x, axis=-1, keepdims=True)
    var = jnp.mean((x - mean) ** 2, axis=-1, keepdims=True)
    h = (x - mean) / jnp.sqrt(var + 1e-5) * ln_g + ln_b
    out = _ref_mamba(h, p1) + _ref_mamba(jnp.flip(h, axis=1), p2) + x
    return jax.nn.gelu(out, approximate=False)


# ----------------------------------------------------------------------------
if __name__ == "__main__":
    B, L, D = 2, 8, 32
    key = jax.random.PRNGKey(0)
    kx, k1, k2 = jax.random.split(key, 3)
    x = jax.random.normal(kx, (B, L, D), jnp.float32)
    p1 = init_mamba_params(k1, D)
    p2 = init_mamba_params(k2, D)
    ln_g = jnp.ones((1, D), jnp.float32)   # torch LayerNorm default init
    ln_b = jnp.zeros((1, D), jnp.float32)

    out = bidirectional_add_block(x, ln_g, ln_b, p1, p2)
    out = jax.block_until_ready(out)

    ref = _ref_forward(x, ln_g, ln_b, p1, p2)
    assert out.shape == (B, L, D)
    err = float(jnp.max(jnp.abs(out - ref)))
    assert jnp.allclose(out, ref, rtol=2e-2, atol=2e-2), err
    print("KERNEL_OK")
</pallas_src>

<mosaic_0001>
module attributes {stable_mosaic.version = 11 : i64} {
  func.func @kernel(%arg0: i32, %arg1: memref<1x8x32xf32, #tpu.memory_space<vmem>>, %arg2: memref<1x32xf32, #tpu.memory_space<vmem>>, %arg3: memref<1x32xf32, #tpu.memory_space<vmem>>, %arg4: memref<32x64xf32, #tpu.memory_space<vmem>>, %arg5: memref<32x64xf32, #tpu.memory_space<vmem>>, %arg6: memref<4x64xf32, #tpu.memory_space<vmem>>, %arg7: memref<1x64xf32, #tpu.memory_space<vmem>>, %arg8: memref<64x2xf32, #tpu.memory_space<vmem>>, %arg9: memref<64x16xf32, #tpu.memory_space<vmem>>, %arg10: memref<64x16xf32, #tpu.memory_space<vmem>>, %arg11: memref<2x64xf32, #tpu.memory_space<vmem>>, %arg12: memref<1x64xf32, #tpu.memory_space<vmem>>, %arg13: memref<16x64xf32, #tpu.memory_space<vmem>>, %arg14: memref<1x64xf32, #tpu.memory_space<vmem>>, %arg15: memref<64x32xf32, #tpu.memory_space<vmem>>, %arg16: memref<32x64xf32, #tpu.memory_space<vmem>>, %arg17: memref<32x64xf32, #tpu.memory_space<vmem>>, %arg18: memref<4x64xf32, #tpu.memory_space<vmem>>, %arg19: memref<1x64xf32, #tpu.memory_space<vmem>>, %arg20: memref<64x2xf32, #tpu.memory_space<vmem>>, %arg21: memref<64x16xf32, #tpu.memory_space<vmem>>, %arg22: memref<64x16xf32, #tpu.memory_space<vmem>>, %arg23: memref<2x64xf32, #tpu.memory_space<vmem>>, %arg24: memref<1x64xf32, #tpu.memory_space<vmem>>, %arg25: memref<16x64xf32, #tpu.memory_space<vmem>>, %arg26: memref<1x64xf32, #tpu.memory_space<vmem>>, %arg27: memref<64x32xf32, #tpu.memory_space<vmem>>, %arg28: memref<1x8x32xf32, #tpu.memory_space<vmem>>, %arg29: memref<11x64xf32, #tpu.memory_space<vmem>>, %arg30: memref<8x64xf32, #tpu.memory_space<vmem>>, %arg31: memref<8x64xf32, #tpu.memory_space<vmem>>, %arg32: memref<8x16xf32, #tpu.memory_space<vmem>>, %arg33: memref<8x16xf32, #tpu.memory_space<vmem>>, %arg34: memref<8x64xf32, #tpu.memory_space<vmem>>) attributes {dimension_semantics = [#tpu.dimension_semantics<parallel>], iteration_bounds = array<i64: 2>, scalar_prefetch = 0 : i64, scratch_operands = 6 : i64, tpu.core_type = #tpu.core_type<tc>, window_params = [{transform_indices = @transform_0, window_bounds = array<i64: 1, 8, 32>}, {pipeline_mode = #tpu.pipeline_mode<synchronous>, transform_indices = @transform_1, window_bounds = array<i64: 1, 32>}, {pipeline_mode = #tpu.pipeline_mode<synchronous>, transform_indices = @transform_2, window_bounds = array<i64: 1, 32>}, {pipeline_mode = #tpu.pipeline_mode<synchronous>, transform_indices = @transform_3, window_bounds = array<i64: 32, 64>}, {pipeline_mode = #tpu.pipeline_mode<synchronous>, transform_indices = @transform_4, window_bounds = array<i64: 32, 64>}, {pipeline_mode = #tpu.pipeline_mode<synchronous>, transform_indices = @transform_5, window_bounds = array<i64: 4, 64>}, {pipeline_mode = #tpu.pipeline_mode<synchronous>, transform_indices = @transform_6, window_bounds = array<i64: 1, 64>}, {pipeline_mode = #tpu.pipeline_mode<synchronous>, transform_indices = @transform_7, window_bounds = array<i64: 64, 2>}, {pipeline_mode = #tpu.pipeline_mode<synchronous>, transform_indices = @transform_8, window_bounds = array<i64: 64, 16>}, {pipeline_mode = #tpu.pipeline_mode<synchronous>, transform_indices = @transform_9, window_bounds = array<i64: 64, 16>}, {pipeline_mode = #tpu.pipeline_mode<synchronous>, transform_indices = @transform_10, window_bounds = array<i64: 2, 64>}, {pipeline_mode = #tpu.pipeline_mode<synchronous>, transform_indices = @transform_11, window_bounds = array<i64: 1, 64>}, {pipeline_mode = #tpu.pipeline_mode<synchronous>, transform_indices = @transform_12, window_bounds = array<i64: 16, 64>}, {pipeline_mode = #tpu.pipeline_mode<synchronous>, transform_indices = @transform_13, window_bounds = array<i64: 1, 64>}, {pipeline_mode = #tpu.pipeline_mode<synchronous>, transform_indices = @transform_14, window_bounds = array<i64: 64, 32>}, {pipeline_mode = #tpu.pipeline_mode<synchronous>, transform_indices = @transform_15, window_bounds = array<i64: 32, 64>}, {pipeline_mode = #tpu.pipeline_mode<synchronous>, transform_indices = @transform_16, window_bounds = array<i64: 32, 64>}, {pipeline_mode = #tpu.pipeline_mode<synchronous>, transform_indices = @transform_17, window_bounds = array<i64: 4, 64>}, {pipeline_mode = #tpu.pipeline_mode<synchronous>, transform_indices = @transform_18, window_bounds = array<i64: 1, 64>}, {pipeline_mode = #tpu.pipeline_mode<synchronous>, transform_indices = @transform_19, window_bounds = array<i64: 64, 2>}, {pipeline_mode = #tpu.pipeline_mode<synchronous>, transform_indices = @transform_20, window_bounds = array<i64: 64, 16>}, {pipeline_mode = #tpu.pipeline_mode<synchronous>, transform_indices = @transform_21, window_bounds = array<i64: 64, 16>}, {pipeline_mode = #tpu.pipeline_mode<synchronous>, transform_indices = @transform_22, window_bounds = array<i64: 2, 64>}, {pipeline_mode = #tpu.pipeline_mode<synchronous>, transform_indices = @transform_23, window_bounds = array<i64: 1, 64>}, {pipeline_mode = #tpu.pipeline_mode<synchronous>, transform_indices = @transform_24, window_bounds = array<i64: 16, 64>}, {pipeline_mode = #tpu.pipeline_mode<synchronous>, transform_indices = @transform_25, window_bounds = array<i64: 1, 64>}, {pipeline_mode = #tpu.pipeline_mode<synchronous>, transform_indices = @transform_26, window_bounds = array<i64: 64, 32>}, {transform_indices = @transform_27, window_bounds = array<i64: 1, 8, 32>}]} {
    %c0 = arith.constant 0 : index
    %c0_0 = arith.constant 0 : index
    %0 = vector.load %arg4[%c0, %c0_0] : memref<32x64xf32, #tpu.memory_space<vmem>>, vector<32x64xf32>
    %c0_1 = arith.constant 0 : index
    %c0_2 = arith.constant 0 : index
    %1 = vector.load %arg5[%c0_1, %c0_2] : memref<32x64xf32, #tpu.memory_space<vmem>>, vector<32x64xf32>
    %c0_3 = arith.constant 0 : index
    %c0_4 = arith.constant 0 : index
    %2 = vector.load %arg6[%c0_3, %c0_4] : memref<4x64xf32, #tpu.memory_space<vmem>>, vector<4x64xf32>
    %c0_5 = arith.constant 0 : index
    %c0_6 = arith.constant 0 : index
    %3 = vector.load %arg7[%c0_5, %c0_6] : memref<1x64xf32, #tpu.memory_space<vmem>>, vector<1x64xf32>
    %c0_7 = arith.constant 0 : index
    %c0_8 = arith.constant 0 : index
    %4 = vector.load %arg8[%c0_7, %c0_8] : memref<64x2xf32, #tpu.memory_space<vmem>>, vector<64x2xf32>
    %c0_9 = arith.constant 0 : index
    %c0_10 = arith.constant 0 : index
    %5 = vector.load %arg9[%c0_9, %c0_10] : memref<64x16xf32, #tpu.memory_space<vmem>>, vector<64x16xf32>
    %c0_11 = arith.constant 0 : index
    %c0_12 = arith.constant 0 : index
    %6 = vector.load %arg10[%c0_11, %c0_12] : memref<64x16xf32, #tpu.memory_space<vmem>>, vector<64x16xf32>
    %c0_13 = arith.constant 0 : index
    %c0_14 = arith.constant 0 : index
    %7 = vector.load %arg11[%c0_13, %c0_14] : memref<2x64xf32, #tpu.memory_space<vmem>>, vector<2x64xf32>
    %c0_15 = arith.constant 0 : index
    %c0_16 = arith.constant 0 : index
    %8 = vector.load %arg12[%c0_15, %c0_16] : memref<1x64xf32, #tpu.memory_space<vmem>>, vector<1x64xf32>
    %c0_17 = arith.constant 0 : index
    %c0_18 = arith.constant 0 : index
    %9 = vector.load %arg13[%c0_17, %c0_18] : memref<16x64xf32, #tpu.memory_space<vmem>>, vector<16x64xf32>
    %c0_19 = arith.constant 0 : index
    %c0_20 = arith.constant 0 : index
    %10 = vector.load %arg14[%c0_19, %c0_20] : memref<1x64xf32, #tpu.memory_space<vmem>>, vector<1x64xf32>
    %c0_21 = arith.constant 0 : index
    %c0_22 = arith.constant 0 : index
    %11 = vector.load %arg15[%c0_21, %c0_22] : memref<64x32xf32, #tpu.memory_space<vmem>>, vector<64x32xf32>
    %c0_23 = arith.constant 0 : index
    %c0_24 = arith.constant 0 : index
    %12 = vector.load %arg16[%c0_23, %c0_24] : memref<32x64xf32, #tpu.memory_space<vmem>>, vector<32x64xf32>
    %c0_25 = arith.constant 0 : index
    %c0_26 = arith.constant 0 : index
    %13 = vector.load %arg17[%c0_25, %c0_26] : memref<32x64xf32, #tpu.memory_space<vmem>>, vector<32x64xf32>
    %c0_27 = arith.constant 0 : index
    %c0_28 = arith.constant 0 : index
    %14 = vector.load %arg18[%c0_27, %c0_28] : memref<4x64xf32, #tpu.memory_space<vmem>>, vector<4x64xf32>
    %c0_29 = arith.constant 0 : index
    %c0_30 = arith.constant 0 : index
    %15 = vector.load %arg19[%c0_29, %c0_30] : memref<1x64xf32, #tpu.memory_space<vmem>>, vector<1x64xf32>
    %c0_31 = arith.constant 0 : index
    %c0_32 = arith.constant 0 : index
    %16 = vector.load %arg20[%c0_31, %c0_32] : memref<64x2xf32, #tpu.memory_space<vmem>>, vector<64x2xf32>
    %c0_33 = arith.constant 0 : index
    %c0_34 = arith.constant 0 : index
    %17 = vector.load %arg21[%c0_33, %c0_34] : memref<64x16xf32, #tpu.memory_space<vmem>>, vector<64x16xf32>
    %c0_35 = arith.constant 0 : index
    %c0_36 = arith.constant 0 : index
    %18 = vector.load %arg22[%c0_35, %c0_36] : memref<64x16xf32, #tpu.memory_space<vmem>>, vector<64x16xf32>
    %c0_37 = arith.constant 0 : index
    %c0_38 = arith.constant 0 : index
    %19 = vector.load %arg23[%c0_37, %c0_38] : memref<2x64xf32, #tpu.memory_space<vmem>>, vector<2x64xf32>
    %c0_39 = arith.constant 0 : index
    %c0_40 = arith.constant 0 : index
    %20 = vector.load %arg24[%c0_39, %c0_40] : memref<1x64xf32, #tpu.memory_space<vmem>>, vector<1x64xf32>
    %c0_41 = arith.constant 0 : index
    %c0_42 = arith.constant 0 : index
    %21 = vector.load %arg25[%c0_41, %c0_42] : memref<16x64xf32, #tpu.memory_space<vmem>>, vector<16x64xf32>
    %c0_43 = arith.constant 0 : index
    %c0_44 = arith.constant 0 : index
    %22 = vector.load %arg26[%c0_43, %c0_44] : memref<1x64xf32, #tpu.memory_space<vmem>>, vector<1x64xf32>
    %c0_45 = arith.constant 0 : index
    %c0_46 = arith.constant 0 : index
    %23 = vector.load %arg27[%c0_45, %c0_46] : memref<64x32xf32, #tpu.memory_space<vmem>>, vector<64x32xf32>
    %c0_47 = arith.constant 0 : index
    %c0_48 = arith.constant 0 : index
    %c0_49 = arith.constant 0 : index
    %24 = vector.load %arg1[%c0_47, %c0_48, %c0_49] : memref<1x8x32xf32, #tpu.memory_space<vmem>>, vector<1x8x32xf32>
    %25 = vector.shape_cast %24 : vector<1x8x32xf32> to vector<8x32xf32>
    %cst = arith.constant dense<0.000000e+00> : vector<8xf32>
    %26 = vector.multi_reduction <add>, %25, %cst [1] : vector<8x32xf32> to vector<8xf32>
    %27 = vector.shape_cast %26 : vector<8xf32> to vector<8x1xf32>
    %cst_50 = arith.constant 3.200000e+01 : f32
    %28 = vector.broadcast %cst_50 : f32 to vector<8x1xf32>
    %29 = arith.divf %27, %28 : vector<8x1xf32>
    %30 = vector.broadcast %29 : vector<8x1xf32> to vector<8x32xf32>
    %31 = arith.subf %25, %30 : vector<8x32xf32>
    %32 = arith.mulf %31, %31 : vector<8x32xf32>
    %cst_51 = arith.constant dense<0.000000e+00> : vector<8xf32>
    %33 = vector.multi_reduction <add>, %32, %cst_51 [1] : vector<8x32xf32> to vector<8xf32>
    %34 = vector.shape_cast %33 : vector<8xf32> to vector<8x1xf32>
    %cst_52 = arith.constant 3.200000e+01 : f32
    %35 = vector.broadcast %cst_52 : f32 to vector<8x1xf32>
    %36 = arith.divf %34, %35 : vector<8x1xf32>
    %cst_53 = arith.constant 9.99999974E-6 : f32
    %37 = vector.broadcast %cst_53 : f32 to vector<8x1xf32>
    %38 = arith.addf %36, %37 : vector<8x1xf32>
    %39 = math.rsqrt %38 : vector<8x1xf32>
    %40 = vector.broadcast %39 : vector<8x1xf32> to vector<8x32xf32>
    %41 = arith.mulf %31, %40 : vector<8x32xf32>
    %c0_54 = arith.constant 0 : index
    %c0_55 = arith.constant 0 : index
    %42 = vector.load %arg2[%c0_54, %c0_55] : memref<1x32xf32, #tpu.memory_space<vmem>>, vector<1x32xf32>
    %43 = vector.broadcast %42 : vector<1x32xf32> to vector<8x32xf32>
    %44 = arith.mulf %41, %43 : vector<8x32xf32>
    %c0_56 = arith.constant 0 : index
    %c0_57 = arith.constant 0 : index
    %45 = vector.load %arg3[%c0_56, %c0_57] : memref<1x32xf32, #tpu.memory_space<vmem>>, vector<1x32xf32>
    %46 = vector.broadcast %45 : vector<1x32xf32> to vector<8x32xf32>
    %47 = arith.addf %44, %46 : vector<8x32xf32>
    %48 = tpu.iota {dimensions = array<i32: 0>} : vector<8x8xi32>
    %49 = tpu.iota {dimensions = array<i32: 1>} : vector<8x8xi32>
    %50 = arith.addi %48, %49 : vector<8x8xi32>
    %c7_i32 = arith.constant 7 : i32
    %51 = vector.broadcast %c7_i32 : i32 to vector<8x8xi32>
    %52 = arith.cmpi eq, %50, %51 : vector<8x8xi32>
    %53 = arith.extui %52 : vector<8x8xi1> to vector<8x8xi32>
    %54 = arith.sitofp %53 : vector<8x8xi32> to vector<8x8xf32>
    %cst_58 = arith.constant dense<0.000000e+00> : vector<8x32xf32>
    %55 = tpu.matmul %54, %47, %cst_58 {dimension_numbers = #tpu.dot_dimension_numbers<[1], [0], [0], [1], [0, 0, 1, 1], [], []>} : vector<8x8xf32>, vector<8x32xf32>, vector<8x32xf32> -> vector<8x32xf32>
    %cst_59 = arith.constant dense<0.000000e+00> : vector<8x64xf32>
    %56 = tpu.matmul %47, %0, %cst_59 {dimension_numbers = #tpu.dot_dimension_numbers<[1], [0], [0], [1], [0, 0, 1, 1], [], []>} : vector<8x32xf32>, vector<32x64xf32>, vector<8x64xf32> -> vector<8x64xf32>
    %cst_60 = arith.constant dense<0.000000e+00> : vector<8x64xf32>
    %57 = tpu.matmul %47, %1, %cst_60 {dimension_numbers = #tpu.dot_dimension_numbers<[1], [0], [0], [1], [0, 0, 1, 1], [], []>} : vector<8x32xf32>, vector<32x64xf32>, vector<8x64xf32> -> vector<8x64xf32>
    %cst_61 = arith.constant 0.000000e+00 : f32
    %58 = vector.broadcast %cst_61 : f32 to vector<3x64xf32>
    %c0_62 = arith.constant 0 : index
    %c0_63 = arith.constant 0 : index
    %59 = vector.load %arg29[%c0_62, %c0_63] : memref<11x64xf32, #tpu.memory_space<vmem>>, vector<3x64xf32>
    tpu.vector_store %arg29[%c0_62, %c0_63], %58 {strides = array<i32>} : memref<11x64xf32, #tpu.memory_space<vmem>>, vector<3x64xf32>,
    %c3 = arith.constant 3 : index
    %c0_64 = arith.constant 0 : index
    %60 = vector.load %arg29[%c3, %c0_64] : memref<11x64xf32, #tpu.memory_space<vmem>>, vector<8x64xf32>
    tpu.vector_store %arg29[%c3, %c0_64], %56 {strides = array<i32>} : memref<11x64xf32, #tpu.memory_space<vmem>>, vector<8x64xf32>,
    %cst_65 = arith.constant 0.000000e+00 : f32
    %61 = vector.broadcast %cst_65 : f32 to vector<8x64xf32>
    %c0_66 = arith.constant 0 : index
    %c0_67 = arith.constant 0 : index
    %62 = vector.load %arg29[%c0_66, %c0_67] : memref<11x64xf32, #tpu.memory_space<vmem>>, vector<8x64xf32>
    %63 = vector.extract_strided_slice %2 {offsets = [0, 0], sizes = [1, 64], strides = [1, 1]} : vector<4x64xf32> to vector<1x64xf32>
    %64 = vector.broadcast %63 : vector<1x64xf32> to vector<8x64xf32>
    %65 = arith.mulf %62, %64 : vector<8x64xf32>
    %66 = arith.addf %61, %65 : vector<8x64xf32>
    %c1 = arith.constant 1 : index
    %c0_68 = arith.constant 0 : index
    %67 = vector.load %arg29[%c1, %c0_68] : memref<11x64xf32, #tpu.memory_space<vmem>>, vector<8x64xf32>
    %68 = vector.extract_strided_slice %2 {offsets = [1, 0], sizes = [1, 64], strides = [1, 1]} : vector<4x64xf32> to vector<1x64xf32>
    %69 = vector.broadcast %68 : vector<1x64xf32> to vector<8x64xf32>
    %70 = arith.mulf %67, %69 : vector<8x64xf32>
    %71 = arith.addf %66, %70 : vector<8x64xf32>
    %c2 = arith.constant 2 : index
    %c0_69 = arith.constant 0 : index
    %72 = vector.load %arg29[%c2, %c0_69] : memref<11x64xf32, #tpu.memory_space<vmem>>, vector<8x64xf32>
    %73 = vector.extract_strided_slice %2 {offsets = [2, 0], sizes = [1, 64], strides = [1, 1]} : vector<4x64xf32> to vector<1x64xf32>
    %74 = vector.broadcast %73 : vector<1x64xf32> to vector<8x64xf32>
    %75 = arith.mulf %72, %74 : vector<8x64xf32>
    %76 = arith.addf %71, %75 : vector<8x64xf32>
    %c3_70 = arith.constant 3 : index
    %c0_71 = arith.constant 0 : index
    %77 = vector.load %arg29[%c3_70, %c0_71] : memref<11x64xf32, #tpu.memory_space<vmem>>, vector<8x64xf32>
    %78 = vector.extract_strided_slice %2 {offsets = [3, 0], sizes = [1, 64], strides = [1, 1]} : vector<4x64xf32> to vector<1x64xf32>
    %79 = vector.broadcast %78 : vector<1x64xf32> to vector<8x64xf32>
    %80 = arith.mulf %77, %79 : vector<8x64xf32>
    %81 = arith.addf %76, %80 : vector<8x64xf32>
    %82 = vector.broadcast %3 : vector<1x64xf32> to vector<8x64xf32>
    %83 = arith.addf %81, %82 : vector<8x64xf32>
    %84 = arith.negf %83 : vector<8x64xf32>
    %85 = math.exp %84 : vector<8x64xf32>
    %cst_72 = arith.constant 1.000000e+00 : f32
    %86 = vector.broadcast %cst_72 : f32 to vector<8x64xf32>
    %87 = arith.addf %86, %85 : vector<8x64xf32>
    %88 = arith.divf %86, %87 : vector<8x64xf32>
    %89 = arith.mulf %83, %88 : vector<8x64xf32>
    %cst_73 = arith.constant dense<0.000000e+00> : vector<8x2xf32>
    %90 = tpu.matmul %89, %4, %cst_73 {dimension_numbers = #tpu.dot_dimension_numbers<[1], [0], [0], [1], [0, 0, 1, 1], [], []>} : vector<8x64xf32>, vector<64x2xf32>, vector<8x2xf32> -> vector<8x2xf32>
    %cst_74 = arith.constant dense<0.000000e+00> : vector<8x16xf32>
    %91 = tpu.matmul %89, %5, %cst_74 {dimension_numbers = #tpu.dot_dimension_numbers<[1], [0], [0], [1], [0, 0, 1, 1], [], []>} : vector<8x64xf32>, vector<64x16xf32>, vector<8x16xf32> -> vector<8x16xf32>
    %cst_75 = arith.constant dense<0.000000e+00> : vector<8x16xf32>
    %92 = tpu.matmul %89, %6, %cst_75 {dimension_numbers = #tpu.dot_dimension_numbers<[1], [0], [0], [1], [0, 0, 1, 1], [], []>} : vector<8x64xf32>, vector<64x16xf32>, vector<8x16xf32> -> vector<8x16xf32>
    %cst_76 = arith.constant dense<0.000000e+00> : vector<8x64xf32>
    %93 = tpu.matmul %90, %7, %cst_76 {dimension_numbers = #tpu.dot_dimension_numbers<[1], [0], [0], [1], [0, 0, 1, 1], [], []>} : vector<8x2xf32>, vector<2x64xf32>, vector<8x64xf32> -> vector<8x64xf32>
    %94 = vector.broadcast %8 : vector<1x64xf32> to vector<8x64xf32>
    %95 = arith.addf %93, %94 : vector<8x64xf32>
    %cst_77 = arith.constant 2.000000e+01 : f32
    %96 = vector.broadcast %cst_77 : f32 to vector<8x64xf32>
    %97 = arith.cmpf ogt, %95, %96 : vector<8x64xf32>
    %cst_78 = arith.constant 2.000000e+01 : f32
    %98 = vector.broadcast %cst_78 : f32 to vector<8x64xf32>
    %99 = arith.minimumf %95, %98 : vector<8x64xf32>
    %100 = math.exp %99 : vector<8x64xf32>
    %101 = math.log1p %100 : vector<8x64xf32>
    %102 = arith.select %97, %95, %101 : vector<8x64xi1>, vector<8x64xf32>
    %c0_79 = arith.constant 0 : index
    %c0_80 = arith.constant 0 : index
    %103 = vector.load %arg30[%c0_79, %c0_80] : memref<8x64xf32, #tpu.memory_space<vmem>>, vector<8x64xf32>
    tpu.vector_store %arg30[%c0_79, %c0_80], %102 {strides = array<i32>} : memref<8x64xf32, #tpu.memory_space<vmem>>, vector<8x64xf32>,
    %104 = arith.mulf %102, %89 : vector<8x64xf32>
    %c0_81 = arith.constant 0 : index
    %c0_82 = arith.constant 0 : index
    %105 = vector.load %arg31[%c0_81, %c0_82] : memref<8x64xf32, #tpu.memory_space<vmem>>, vector<8x64xf32>
    tpu.vector_store %arg31[%c0_81, %c0_82], %104 {strides = array<i32>} : memref<8x64xf32, #tpu.memory_space<vmem>>, vector<8x64xf32>,
    %c0_83 = arith.constant 0 : index
    %c0_84 = arith.constant 0 : index
    %106 = vector.load %arg32[%c0_83, %c0_84] : memref<8x16xf32, #tpu.memory_space<vmem>>, vector<8x16xf32>
    tpu.vector_store %arg32[%c0_83, %c0_84], %91 {strides = array<i32>} : memref<8x16xf32, #tpu.memory_space<vmem>>, vector<8x16xf32>,
    %c0_85 = arith.constant 0 : index
    %c0_86 = arith.constant 0 : index
    %107 = vector.load %arg33[%c0_85, %c0_86] : memref<8x16xf32, #tpu.memory_space<vmem>>, vector<8x16xf32>
    tpu.vector_store %arg33[%c0_85, %c0_86], %92 {strides = array<i32>} : memref<8x16xf32, #tpu.memory_space<vmem>>, vector<8x16xf32>,
    %108 = math.exp %9 : vector<16x64xf32>
    %cst_87 = arith.constant 0.000000e+00 : f32
    %109 = vector.broadcast %cst_87 : f32 to vector<16x64xf32>
    %110 = arith.subf %109, %108 : vector<16x64xf32>
    %cst_88 = arith.constant 0.000000e+00 : f32
    %111 = vector.broadcast %cst_88 : f32 to vector<16x64xf32>
    %c0_i32 = arith.constant 0 : i32
    %c8_i32 = arith.constant 8 : i32
    %112 = arith.muli %c0_i32, %c8_i32 : i32
    %113 = tpu.assume_multiple %112, 8 : i32
    %114 = arith.index_cast %113 : i32 to index
    %c0_89 = arith.constant 0 : index
    %115 = vector.load %arg30[%114, %c0_89] : memref<8x64xf32, #tpu.memory_space<vmem>>, vector<8x64xf32>
    %116 = arith.index_cast %113 : i32 to index
    %c0_90 = arith.constant 0 : index
    %117 = vector.load %arg31[%116, %c0_90] : memref<8x64xf32, #tpu.memory_space<vmem>>, vector<8x64xf32>
    %118 = arith.index_cast %113 : i32 to index
    %c0_91 = arith.constant 0 : index
    %119 = vector.load %arg32[%118, %c0_91] : memref<8x16xf32, #tpu.memory_space<vmem>>, vector<8x16xf32>
    %120 = arith.index_cast %113 : i32 to index
    %c0_92 = arith.constant 0 : index
    %121 = vector.load %arg33[%120, %c0_92] : memref<8x16xf32, #tpu.memory_space<vmem>>, vector<8x16xf32>
    %122 = vector.shape_cast %115 : vector<8x64xf32> to vector<8x1x64xf32>
    %123 = vector.shape_cast %110 : vector<16x64xf32> to vector<1x16x64xf32>
    %124 = vector.broadcast %122 : vector<8x1x64xf32> to vector<8x16x64xf32>
    %125 = vector.broadcast %123 : vector<1x16x64xf32> to vector<8x16x64xf32>
    %126 = arith.mulf %124, %125 : vector<8x16x64xf32>
    %127 = math.exp %126 : vector<8x16x64xf32>
    %128 = vector.shape_cast %117 : vector<8x64xf32> to vector<8x1x64xf32>
    %129 = vector.shape_cast %119 : vector<8x16xf32> to vector<8x16x1xf32>
    %130 = vector.broadcast %128 : vector<8x1x64xf32> to vector<8x16x64xf32>
    %131 = vector.broadcast %129 : vector<8x16x1xf32> to vector<8x16x64xf32>
    %132 = arith.mulf %130, %131 : vector<8x16x64xf32>
    %133 = vector.shape_cast %121 : vector<8x16xf32> to vector<8x16x1xf32>
    %134 = vector.extract_strided_slice %127 {offsets = [0, 0, 0], sizes = [1, 16, 64], strides = [1, 1, 1]} : vector<8x16x64xf32> to vector<1x16x64xf32>
    %135 = vector.shape_cast %134 : vector<1x16x64xf32> to vector<16x64xf32>
    %136 = arith.mulf %135, %111 : vector<16x64xf32>
    %137 = vector.extract_strided_slice %132 {offsets = [0, 0, 0], sizes = [1, 16, 64], strides = [1, 1, 1]} : vector<8x16x64xf32> to vector<1x16x64xf32>
    %138 = vector.shape_cast %137 : vector<1x16x64xf32> to vector<16x64xf32>
    %139 = arith.addf %136, %138 : vector<16x64xf32>
    %140 = vector.extract_strided_slice %133 {offsets = [0, 0, 0], sizes = [1, 16, 1], strides = [1, 1, 1]} : vector<8x16x1xf32> to vector<1x16x1xf32>
    %141 = vector.shape_cast %140 : vector<1x16x1xf32> to vector<16x1xf32>
    %142 = vector.broadcast %141 : vector<16x1xf32> to vector<16x64xf32>
    %143 = arith.mulf %139, %142 : vector<16x64xf32>
    %cst_93 = arith.constant dense<0.000000e+00> : vector<64xf32>
    %144 = vector.multi_reduction <add>, %143, %cst_93 [0] : vector<16x64xf32> to vector<64xf32>
    %145 = vector.shape_cast %144 : vector<64xf32> to vector<1x64xf32>
    %146 = vector.extract_strided_slice %127 {offsets = [1, 0, 0], sizes = [1, 16, 64], strides = [1, 1, 1]} : vector<8x16x64xf32> to vector<1x16x64xf32>
    %147 = vector.shape_cast %146 : vector<1x16x64xf32> to vector<16x64xf32>
    %148 = arith.mulf %147, %139 : vector<16x64xf32>
    %149 = vector.extract_strided_slice %132 {offsets = [1, 0, 0], sizes = [1, 16, 64], strides = [1, 1, 1]} : vector<8x16x64xf32> to vector<1x16x64xf32>
    %150 = vector.shape_cast %149 : vector<1x16x64xf32> to vector<16x64xf32>
    %151 = arith.addf %148, %150 : vector<16x64xf32>
    %152 = vector.extract_strided_slice %133 {offsets = [1, 0, 0], sizes = [1, 16, 1], strides = [1, 1, 1]} : vector<8x16x1xf32> to vector<1x16x1xf32>
    %153 = vector.shape_cast %152 : vector<1x16x1xf32> to vector<16x1xf32>
    %154 = vector.broadcast %153 : vector<16x1xf32> to vector<16x64xf32>
    %155 = arith.mulf %151, %154 : vector<16x64xf32>
    %cst_94 = arith.constant dense<0.000000e+00> : vector<64xf32>
    %156 = vector.multi_reduction <add>, %155, %cst_94 [0] : vector<16x64xf32> to vector<64xf32>
    %157 = vector.shape_cast %156 : vector<64xf32> to vector<1x64xf32>
    %158 = vector.extract_strided_slice %127 {offsets = [2, 0, 0], sizes = [1, 16, 64], strides = [1, 1, 1]} : vector<8x16x64xf32> to vector<1x16x64xf32>
    %159 = vector.shape_cast %158 : vector<1x16x64xf32> to vector<16x64xf32>
    %160 = arith.mulf %159, %151 : vector<16x64xf32>
    %161 = vector.extract_strided_slice %132 {offsets = [2, 0, 0], sizes = [1, 16, 64], strides = [1, 1, 1]} : vector<8x16x64xf32> to vector<1x16x64xf32>
    %162 = vector.shape_cast %161 : vector<1x16x64xf32> to vector<16x64xf32>
    %163 = arith.addf %160, %162 : vector<16x64xf32>
    %164 = vector.extract_strided_slice %133 {offsets = [2, 0, 0], sizes = [1, 16, 1], strides = [1, 1, 1]} : vector<8x16x1xf32> to vector<1x16x1xf32>
    %165 = vector.shape_cast %164 : vector<1x16x1xf32> to vector<16x1xf32>
    %166 = vector.broadcast %165 : vector<16x1xf32> to vector<16x64xf32>
    %167 = arith.mulf %163, %166 : vector<16x64xf32>
    %cst_95 = arith.constant dense<0.000000e+00> : vector<64xf32>
    %168 = vector.multi_reduction <add>, %167, %cst_95 [0] : vector<16x64xf32> to vector<64xf32>
    %169 = vector.shape_cast %168 : vector<64xf32> to vector<1x64xf32>
    %170 = vector.extract_strided_slice %127 {offsets = [3, 0, 0], sizes = [1, 16, 64], strides = [1, 1, 1]} : vector<8x16x64xf32> to vector<1x16x64xf32>
    %171 = vector.shape_cast %170 : vector<1x16x64xf32> to vector<16x64xf32>
    %172 = arith.mulf %171, %163 : vector<16x64xf32>
    %173 = vector.extract_strided_slice %132 {offsets = [3, 0, 0], sizes = [1, 16, 64], strides = [1, 1, 1]} : vector<8x16x64xf32> to vector<1x16x64xf32>
    %174 = vector.shape_cast %173 : vector<1x16x64xf32> to vector<16x64xf32>
    %175 = arith.addf %172, %174 : vector<16x64xf32>
    %176 = vector.extract_strided_slice %133 {offsets = [3, 0, 0], sizes = [1, 16, 1], strides = [1, 1, 1]} : vector<8x16x1xf32> to vector<1x16x1xf32>
    %177 = vector.shape_cast %176 : vector<1x16x1xf32> to vector<16x1xf32>
    %178 = vector.broadcast %177 : vector<16x1xf32> to vector<16x64xf32>
    %179 = arith.mulf %175, %178 : vector<16x64xf32>
    %cst_96 = arith.constant dense<0.000000e+00> : vector<64xf32>
    %180 = vector.multi_reduction <add>, %179, %cst_96 [0] : vector<16x64xf32> to vector<64xf32>
    %181 = vector.shape_cast %180 : vector<64xf32> to vector<1x64xf32>
    %182 = vector.extract_strided_slice %127 {offsets = [4, 0, 0], sizes = [1, 16, 64], strides = [1, 1, 1]} : vector<8x16x64xf32> to vector<1x16x64xf32>
    %183 = vector.shape_cast %182 : vector<1x16x64xf32> to vector<16x64xf32>
    %184 = arith.mulf %183, %175 : vector<16x64xf32>
    %185 = vector.extract_strided_slice %132 {offsets = [4, 0, 0], sizes = [1, 16, 64], strides = [1, 1, 1]} : vector<8x16x64xf32> to vector<1x16x64xf32>
    %186 = vector.shape_cast %185 : vector<1x16x64xf32> to vector<16x64xf32>
    %187 = arith.addf %184, %186 : vector<16x64xf32>
    %188 = vector.extract_strided_slice %133 {offsets = [4, 0, 0], sizes = [1, 16, 1], strides = [1, 1, 1]} : vector<8x16x1xf32> to vector<1x16x1xf32>
    %189 = vector.shape_cast %188 : vector<1x16x1xf32> to vector<16x1xf32>
    %190 = vector.broadcast %189 : vector<16x1xf32> to vector<16x64xf32>
    %191 = arith.mulf %187, %190 : vector<16x64xf32>
    %cst_97 = arith.constant dense<0.000000e+00> : vector<64xf32>
    %192 = vector.multi_reduction <add>, %191, %cst_97 [0] : vector<16x64xf32> to vector<64xf32>
    %193 = vector.shape_cast %192 : vector<64xf32> to vector<1x64xf32>
    %194 = vector.extract_strided_slice %127 {offsets = [5, 0, 0], sizes = [1, 16, 64], strides = [1, 1, 1]} : vector<8x16x64xf32> to vector<1x16x64xf32>
    %195 = vector.shape_cast %194 : vector<1x16x64xf32> to vector<16x64xf32>
    %196 = arith.mulf %195, %187 : vector<16x64xf32>
    %197 = vector.extract_strided_slice %132 {offsets = [5, 0, 0], sizes = [1, 16, 64], strides = [1, 1, 1]} : vector<8x16x64xf32> to vector<1x16x64xf32>
    %198 = vector.shape_cast %197 : vector<1x16x64xf32> to vector<16x64xf32>
    %199 = arith.addf %196, %198 : vector<16x64xf32>
    %200 = vector.extract_strided_slice %133 {offsets = [5, 0, 0], sizes = [1, 16, 1], strides = [1, 1, 1]} : vector<8x16x1xf32> to vector<1x16x1xf32>
    %201 = vector.shape_cast %200 : vector<1x16x1xf32> to vector<16x1xf32>
    %202 = vector.broadcast %201 : vector<16x1xf32> to vector<16x64xf32>
    %203 = arith.mulf %199, %202 : vector<16x64xf32>
    %cst_98 = arith.constant dense<0.000000e+00> : vector<64xf32>
    %204 = vector.multi_reduction <add>, %203, %cst_98 [0] : vector<16x64xf32> to vector<64xf32>
    %205 = vector.shape_cast %204 : vector<64xf32> to vector<1x64xf32>
    %206 = vector.extract_strided_slice %127 {offsets = [6, 0, 0], sizes = [1, 16, 64], strides = [1, 1, 1]} : vector<8x16x64xf32> to vector<1x16x64xf32>
    %207 = vector.shape_cast %206 : vector<1x16x64xf32> to vector<16x64xf32>
    %208 = arith.mulf %207, %199 : vector<16x64xf32>
    %209 = vector.extract_strided_slice %132 {offsets = [6, 0, 0], sizes = [1, 16, 64], strides = [1, 1, 1]} : vector<8x16x64xf32> to vector<1x16x64xf32>
    %210 = vector.shape_cast %209 : vector<1x16x64xf32> to vector<16x64xf32>
    %211 = arith.addf %208, %210 : vector<16x64xf32>
    %212 = vector.extract_strided_slice %133 {offsets = [6, 0, 0], sizes = [1, 16, 1], strides = [1, 1, 1]} : vector<8x16x1xf32> to vector<1x16x1xf32>
    %213 = vector.shape_cast %212 : vector<1x16x1xf32> to vector<16x1xf32>
    %214 = vector.broadcast %213 : vector<16x1xf32> to vector<16x64xf32>
    %215 = arith.mulf %211, %214 : vector<16x64xf32>
    %cst_99 = arith.constant dense<0.000000e+00> : vector<64xf32>
    %216 = vector.multi_reduction <add>, %215, %cst_99 [0] : vector<16x64xf32> to vector<64xf32>
    %217 = vector.shape_cast %216 : vector<64xf32> to vector<1x64xf32>
    %218 = vector.extract_strided_slice %127 {offsets = [7, 0, 0], sizes = [1, 16, 64], strides = [1, 1, 1]} : vector<8x16x64xf32> to vector<1x16x64xf32>
    %219 = vector.shape_cast %218 : vector<1x16x64xf32> to vector<16x64xf32>
    %220 = arith.mulf %219, %211 : vector<16x64xf32>
    %221 = vector.extract_strided_slice %132 {offsets = [7, 0, 0], sizes = [1, 16, 64], strides = [1, 1, 1]} : vector<8x16x64xf32> to vector<1x16x64xf32>
    %222 = vector.shape_cast %221 : vector<1x16x64xf32> to vector<16x64xf32>
    %223 = arith.addf %220, %222 : vector<16x64xf32>
    %224 = vector.extract_strided_slice %133 {offsets = [7, 0, 0], sizes = [1, 16, 1], strides = [1, 1, 1]} : vector<8x16x1xf32> to vector<1x16x1xf32>
    %225 = vector.shape_cast %224 : vector<1x16x1xf32> to vector<16x1xf32>
    %226 = vector.broadcast %225 : vector<16x1xf32> to vector<16x64xf32>
    %227 = arith.mulf %223, %226 : vector<16x64xf32>
    %cst_100 = arith.constant dense<0.000000e+00> : vector<64xf32>
    %228 = vector.multi_reduction <add>, %227, %cst_100 [0] : vector<16x64xf32> to vector<64xf32>
    %229 = vector.shape_cast %228 : vector<64xf32> to vector<1x64xf32>
    %230 = tpu.concatenate %145, %157, %169, %181, %193, %205, %217, %229 in 0 : vector<1x64xf32>, vector<1x64xf32>, vector<1x64xf32>, vector<1x64xf32>, vector<1x64xf32>, vector<1x64xf32>, vector<1x64xf32>, vector<1x64xf32> -> vector<8x64xf32>
    %231 = arith.index_cast %113 : i32 to index
    %c0_101 = arith.constant 0 : index
    %232 = vector.load %arg34[%231, %c0_101] : memref<8x64xf32, #tpu.memory_space<vmem>>, vector<8x64xf32>
    tpu.vector_store %arg34[%231, %c0_101], %230 {strides = array<i32>} : memref<8x64xf32, #tpu.memory_space<vmem>>, vector<8x64xf32>,
    %c1_i32 = arith.constant 1 : i32
    %c0_102 = arith.constant 0 : index
    %c0_103 = arith.constant 0 : index
    %233 = vector.load %arg34[%c0_102, %c0_103] : memref<8x64xf32, #tpu.memory_space<vmem>>, vector<8x64xf32>
    %234 = vector.broadcast %10 : vector<1x64xf32> to vector<8x64xf32>
    %235 = arith.mulf %89, %234 : vector<8x64xf32>
    %236 = arith.addf %233, %235 : vector<8x64xf32>
    %237 = arith.negf %57 : vector<8x64xf32>
    %238 = math.exp %237 : vector<8x64xf32>
    %cst_104 = arith.constant 1.000000e+00 : f32
    %239 = vector.broadcast %cst_104 : f32 to vector<8x64xf32>
    %240 = arith.addf %239, %238 : vector<8x64xf32>
    %241 = arith.divf %239, %240 : vector<8x64xf32>
    %242 = arith.mulf %57, %241 : vector<8x64xf32>
    %243 = arith.mulf %236, %242 : vector<8x64xf32>
    %cst_105 = arith.constant dense<0.000000e+00> : vector<8x32xf32>
    %244 = tpu.matmul %243, %11, %cst_105 {dimension_numbers = #tpu.dot_dimension_numbers<[1], [0], [0], [1], [0, 0, 1, 1], [], []>} : vector<8x64xf32>, vector<64x32xf32>, vector<8x32xf32> -> vector<8x32xf32>
    %cst_106 = arith.constant dense<0.000000e+00> : vector<8x64xf32>
    %245 = tpu.matmul %55, %12, %cst_106 {dimension_numbers = #tpu.dot_dimension_numbers<[1], [0], [0], [1], [0, 0, 1, 1], [], []>} : vector<8x32xf32>, vector<32x64xf32>, vector<8x64xf32> -> vector<8x64xf32>
    %cst_107 = arith.constant dense<0.000000e+00> : vector<8x64xf32>
    %246 = tpu.matmul %55, %13, %cst_107 {dimension_numbers = #tpu.dot_dimension_numbers<[1], [0], [0], [1], [0, 0, 1, 1], [], []>} : vector<8x32xf32>, vector<32x64xf32>, vector<8x64xf32> -> vector<8x64xf32>
    %cst_108 = arith.constant 0.000000e+00 : f32
    %247 = vector.broadcast %cst_108 : f32 to vector<3x64xf32>
    %c0_109 = arith.constant 0 : index
    %c0_110 = arith.constant 0 : index
    %248 = vector.load %arg29[%c0_109, %c0_110] : memref<11x64xf32, #tpu.memory_space<vmem>>, vector<3x64xf32>
    tpu.vector_store %arg29[%c0_109, %c0_110], %247 {strides = array<i32>} : memref<11x64xf32, #tpu.memory_space<vmem>>, vector<3x64xf32>,
    %c3_111 = arith.constant 3 : index
    %c0_112 = arith.constant 0 : index
    %249 = vector.load %arg29[%c3_111, %c0_112] : memref<11x64xf32, #tpu.memory_space<vmem>>, vector<8x64xf32>
    tpu.vector_store %arg29[%c3_111, %c0_112], %245 {strides = array<i32>} : memref<11x64xf32, #tpu.memory_space<vmem>>, vector<8x64xf32>,
    %cst_113 = arith.constant 0.000000e+00 : f32
    %250 = vector.broadcast %cst_113 : f32 to vector<8x64xf32>
    %c0_114 = arith.constant 0 : index
    %c0_115 = arith.constant 0 : index
    %251 = vector.load %arg29[%c0_114, %c0_115] : memref<11x64xf32, #tpu.memory_space<vmem>>, vector<8x64xf32>
    %252 = vector.extract_strided_slice %14 {offsets = [0, 0], sizes = [1, 64], strides = [1, 1]} : vector<4x64xf32> to vector<1x64xf32>
    %253 = vector.broadcast %252 : vector<1x64xf32> to vector<8x64xf32>
    %254 = arith.mulf %251, %253 : vector<8x64xf32>
    %255 = arith.addf %250, %254 : vector<8x64xf32>
    %c1_116 = arith.constant 1 : index
    %c0_117 = arith.constant 0 : index
    %256 = vector.load %arg29[%c1_116, %c0_117] : memref<11x64xf32, #tpu.memory_space<vmem>>, vector<8x64xf32>
    %257 = vector.extract_strided_slice %14 {offsets = [1, 0], sizes = [1, 64], strides = [1, 1]} : vector<4x64xf32> to vector<1x64xf32>
    %258 = vector.broadcast %257 : vector<1x64xf32> to vector<8x64xf32>
    %259 = arith.mulf %256, %258 : vector<8x64xf32>
    %260 = arith.addf %255, %259 : vector<8x64xf32>
    %c2_118 = arith.constant 2 : index
    %c0_119 = arith.constant 0 : index
    %261 = vector.load %arg29[%c2_118, %c0_119] : memref<11x64xf32, #tpu.memory_space<vmem>>, vector<8x64xf32>
    %262 = vector.extract_strided_slice %14 {offsets = [2, 0], sizes = [1, 64], strides = [1, 1]} : vector<4x64xf32> to vector<1x64xf32>
    %263 = vector.broadcast %262 : vector<1x64xf32> to vector<8x64xf32>
    %264 = arith.mulf %261, %263 : vector<8x64xf32>
    %265 = arith.addf %260, %264 : vector<8x64xf32>
    %c3_120 = arith.constant 3 : index
    %c0_121 = arith.constant 0 : index
    %266 = vector.load %arg29[%c3_120, %c0_121] : memref<11x64xf32, #tpu.memory_space<vmem>>, vector<8x64xf32>
    %267 = vector.extract_strided_slice %14 {offsets = [3, 0], sizes = [1, 64], strides = [1, 1]} : vector<4x64xf32> to vector<1x64xf32>
    %268 = vector.broadcast %267 : vector<1x64xf32> to vector<8x64xf32>
    %269 = arith.mulf %266, %268 : vector<8x64xf32>
    %270 = arith.addf %265, %269 : vector<8x64xf32>
    %271 = vector.broadcast %15 : vector<1x64xf32> to vector<8x64xf32>
    %272 = arith.addf %270, %271 : vector<8x64xf32>
    %273 = arith.negf %272 : vector<8x64xf32>
    %274 = math.exp %273 : vector<8x64xf32>
    %cst_122 = arith.constant 1.000000e+00 : f32
    %275 = vector.broadcast %cst_122 : f32 to vector<8x64xf32>
    %276 = arith.addf %275, %274 : vector<8x64xf32>
    %277 = arith.divf %275, %276 : vector<8x64xf32>
    %278 = arith.mulf %272, %277 : vector<8x64xf32>
    %cst_123 = arith.constant dense<0.000000e+00> : vector<8x2xf32>
    %279 = tpu.matmul %278, %16, %cst_123 {dimension_numbers = #tpu.dot_dimension_numbers<[1], [0], [0], [1], [0, 0, 1, 1], [], []>} : vector<8x64xf32>, vector<64x2xf32>, vector<8x2xf32> -> vector<8x2xf32>
    %cst_124 = arith.constant dense<0.000000e+00> : vector<8x16xf32>
    %280 = tpu.matmul %278, %17, %cst_124 {dimension_numbers = #tpu.dot_dimension_numbers<[1], [0], [0], [1], [0, 0, 1, 1], [], []>} : vector<8x64xf32>, vector<64x16xf32>, vector<8x16xf32> -> vector<8x16xf32>
    %cst_125 = arith.constant dense<0.000000e+00> : vector<8x16xf32>
    %281 = tpu.matmul %278, %18, %cst_125 {dimension_numbers = #tpu.dot_dimension_numbers<[1], [0], [0], [1], [0, 0, 1, 1], [], []>} : vector<8x64xf32>, vector<64x16xf32>, vector<8x16xf32> -> vector<8x16xf32>
    %cst_126 = arith.constant dense<0.000000e+00> : vector<8x64xf32>
    %282 = tpu.matmul %279, %19, %cst_126 {dimension_numbers = #tpu.dot_dimension_numbers<[1], [0], [0], [1], [0, 0, 1, 1], [], []>} : vector<8x2xf32>, vector<2x64xf32>, vector<8x64xf32> -> vector<8x64xf32>
    %283 = vector.broadcast %20 : vector<1x64xf32> to vector<8x64xf32>
    %284 = arith.addf %282, %283 : vector<8x64xf32>
    %cst_127 = arith.constant 2.000000e+01 : f32
    %285 = vector.broadcast %cst_127 : f32 to vector<8x64xf32>
    %286 = arith.cmpf ogt, %284, %285 : vector<8x64xf32>
    %cst_128 = arith.constant 2.000000e+01 : f32
    %287 = vector.broadcast %cst_128 : f32 to vector<8x64xf32>
    %288 = arith.minimumf %284, %287 : vector<8x64xf32>
    %289 = math.exp %288 : vector<8x64xf32>
    %290 = math.log1p %289 : vector<8x64xf32>
    %291 = arith.select %286, %284, %290 : vector<8x64xi1>, vector<8x64xf32>
    %c0_129 = arith.constant 0 : index
    %c0_130 = arith.constant 0 : index
    %292 = vector.load %arg30[%c0_129, %c0_130] : memref<8x64xf32, #tpu.memory_space<vmem>>, vector<8x64xf32>
    tpu.vector_store %arg30[%c0_129, %c0_130], %291 {strides = array<i32>} : memref<8x64xf32, #tpu.memory_space<vmem>>, vector<8x64xf32>,
    %293 = arith.mulf %291, %278 : vector<8x64xf32>
    %c0_131 = arith.constant 0 : index
    %c0_132 = arith.constant 0 : index
    %294 = vector.load %arg31[%c0_131, %c0_132] : memref<8x64xf32, #tpu.memory_space<vmem>>, vector<8x64xf32>
    tpu.vector_store %arg31[%c0_131, %c0_132], %293 {strides = array<i32>} : memref<8x64xf32, #tpu.memory_space<vmem>>, vector<8x64xf32>,
    %c0_133 = arith.constant 0 : index
    %c0_134 = arith.constant 0 : index
    %295 = vector.load %arg32[%c0_133, %c0_134] : memref<8x16xf32, #tpu.memory_space<vmem>>, vector<8x16xf32>
    tpu.vector_store %arg32[%c0_133, %c0_134], %280 {strides = array<i32>} : memref<8x16xf32, #tpu.memory_space<vmem>>, vector<8x16xf32>,
    %c0_135 = arith.constant 0 : index
    %c0_136 = arith.constant 0 : index
    %296 = vector.load %arg33[%c0_135, %c0_136] : memref<8x16xf32, #tpu.memory_space<vmem>>, vector<8x16xf32>
    tpu.vector_store %arg33[%c0_135, %c0_136], %281 {strides = array<i32>} : memref<8x16xf32, #tpu.memory_space<vmem>>, vector<8x16xf32>,
    %297 = math.exp %21 : vector<16x64xf32>
    %cst_137 = arith.constant 0.000000e+00 : f32
    %298 = vector.broadcast %cst_137 : f32 to vector<16x64xf32>
    %299 = arith.subf %298, %297 : vector<16x64xf32>
    %cst_138 = arith.constant 0.000000e+00 : f32
    %300 = vector.broadcast %cst_138 : f32 to vector<16x64xf32>
    %c0_i32_139 = arith.constant 0 : i32
    %c8_i32_140 = arith.constant 8 : i32
    %301 = arith.muli %c0_i32_139, %c8_i32_140 : i32
    %302 = tpu.assume_multiple %301, 8 : i32
    %303 = arith.index_cast %302 : i32 to index
    %c0_141 = arith.constant 0 : index
    %304 = vector.load %arg30[%303, %c0_141] : memref<8x64xf32, #tpu.memory_space<vmem>>, vector<8x64xf32>
    %305 = arith.index_cast %302 : i32 to index
    %c0_142 = arith.constant 0 : index
    %306 = vector.load %arg31[%305, %c0_142] : memref<8x64xf32, #tpu.memory_space<vmem>>, vector<8x64xf32>
    %307 = arith.index_cast %302 : i32 to index
    %c0_143 = arith.constant 0 : index
    %308 = vector.load %arg32[%307, %c0_143] : memref<8x16xf32, #tpu.memory_space<vmem>>, vector<8x16xf32>
    %309 = arith.index_cast %302 : i32 to index
    %c0_144 = arith.constant 0 : index
    %310 = vector.load %arg33[%309, %c0_144] : memref<8x16xf32, #tpu.memory_space<vmem>>, vector<8x16xf32>
    %311 = vector.shape_cast %304 : vector<8x64xf32> to vector<8x1x64xf32>
    %312 = vector.shape_cast %299 : vector<16x64xf32> to vector<1x16x64xf32>
    %313 = vector.broadcast %311 : vector<8x1x64xf32> to vector<8x16x64xf32>
    %314 = vector.broadcast %312 : vector<1x16x64xf32> to vector<8x16x64xf32>
    %315 = arith.mulf %313, %314 : vector<8x16x64xf32>
    %316 = math.exp %315 : vector<8x16x64xf32>
    %317 = vector.shape_cast %306 : vector<8x64xf32> to vector<8x1x64xf32>
    %318 = vector.shape_cast %308 : vector<8x16xf32> to vector<8x16x1xf32>
    %319 = vector.broadcast %317 : vector<8x1x64xf32> to vector<8x16x64xf32>
    %320 = vector.broadcast %318 : vector<8x16x1xf32> to vector<8x16x64xf32>
    %321 = arith.mulf %319, %320 : vector<8x16x64xf32>
    %322 = vector.shape_cast %310 : vector<8x16xf32> to vector<8x16x1xf32>
    %323 = vector.extract_strided_slice %316 {offsets = [0, 0, 0], sizes = [1, 16, 64], strides = [1, 1, 1]} : vector<8x16x64xf32> to vector<1x16x64xf32>
    %324 = vector.shape_cast %323 : vector<1x16x64xf32> to vector<16x64xf32>
    %325 = arith.mulf %324, %300 : vector<16x64xf32>
    %326 = vector.extract_strided_slice %321 {offsets = [0, 0, 0], sizes = [1, 16, 64], strides = [1, 1, 1]} : vector<8x16x64xf32> to vector<1x16x64xf32>
    %327 = vector.shape_cast %326 : vector<1x16x64xf32> to vector<16x64xf32>
    %328 = arith.addf %325, %327 : vector<16x64xf32>
    %329 = vector.extract_strided_slice %322 {offsets = [0, 0, 0], sizes = [1, 16, 1], strides = [1, 1, 1]} : vector<8x16x1xf32> to vector<1x16x1xf32>
    %330 = vector.shape_cast %329 : vector<1x16x1xf32> to vector<16x1xf32>
    %331 = vector.broadcast %330 : vector<16x1xf32> to vector<16x64xf32>
    %332 = arith.mulf %328, %331 : vector<16x64xf32>
    %cst_145 = arith.constant dense<0.000000e+00> : vector<64xf32>
    %333 = vector.multi_reduction <add>, %332, %cst_145 [0] : vector<16x64xf32> to vector<64xf32>
    %334 = vector.shape_cast %333 : vector<64xf32> to vector<1x64xf32>
    %335 = vector.extract_strided_slice %316 {offsets = [1, 0, 0], sizes = [1, 16, 64], strides = [1, 1, 1]} : vector<8x16x64xf32> to vector<1x16x64xf32>
    %336 = vector.shape_cast %335 : vector<1x16x64xf32> to vector<16x64xf32>
    %337 = arith.mulf %336, %328 : vector<16x64xf32>
    %338 = vector.extract_strided_slice %321 {offsets = [1, 0, 0], sizes = [1, 16, 64], strides = [1, 1, 1]} : vector<8x16x64xf32> to vector<1x16x64xf32>
    %339 = vector.shape_cast %338 : vector<1x16x64xf32> to vector<16x64xf32>
    %340 = arith.addf %337, %339 : vector<16x64xf32>
    %341 = vector.extract_strided_slice %322 {offsets = [1, 0, 0], sizes = [1, 16, 1], strides = [1, 1, 1]} : vector<8x16x1xf32> to vector<1x16x1xf32>
    %342 = vector.shape_cast %341 : vector<1x16x1xf32> to vector<16x1xf32>
    %343 = vector.broadcast %342 : vector<16x1xf32> to vector<16x64xf32>
    %344 = arith.mulf %340, %343 : vector<16x64xf32>
    %cst_146 = arith.constant dense<0.000000e+00> : vector<64xf32>
    %345 = vector.multi_reduction <add>, %344, %cst_146 [0] : vector<16x64xf32> to vector<64xf32>
    %346 = vector.shape_cast %345 : vector<64xf32> to vector<1x64xf32>
    %347 = vector.extract_strided_slice %316 {offsets = [2, 0, 0], sizes = [1, 16, 64], strides = [1, 1, 1]} : vector<8x16x64xf32> to vector<1x16x64xf32>
    %348 = vector.shape_cast %347 : vector<1x16x64xf32> to vector<16x64xf32>
    %349 = arith.mulf %348, %340 : vector<16x64xf32>
    %350 = vector.extract_strided_slice %321 {offsets = [2, 0, 0], sizes = [1, 16, 64], strides = [1, 1, 1]} : vector<8x16x64xf32> to vector<1x16x64xf32>
    %351 = vector.shape_cast %350 : vector<1x16x64xf32> to vector<16x64xf32>
    %352 = arith.addf %349, %351 : vector<16x64xf32>
    %353 = vector.extract_strided_slice %322 {offsets = [2, 0, 0], sizes = [1, 16, 1], strides = [1, 1, 1]} : vector<8x16x1xf32> to vector<1x16x1xf32>
    %354 = vector.shape_cast %353 : vector<1x16x1xf32> to vector<16x1xf32>
    %355 = vector.broadcast %354 : vector<16x1xf32> to vector<16x64xf32>
    %356 = arith.mulf %352, %355 : vector<16x64xf32>
    %cst_147 = arith.constant dense<0.000000e+00> : vector<64xf32>
    %357 = vector.multi_reduction <add>, %356, %cst_147 [0] : vector<16x64xf32> to vector<64xf32>
    %358 = vector.shape_cast %357 : vector<64xf32> to vector<1x64xf32>
    %359 = vector.extract_strided_slice %316 {offsets = [3, 0, 0], sizes = [1, 16, 64], strides = [1, 1, 1]} : vector<8x16x64xf32> to vector<1x16x64xf32>
    %360 = vector.shape_cast %359 : vector<1x16x64xf32> to vector<16x64xf32>
    %361 = arith.mulf %360, %352 : vector<16x64xf32>
    %362 = vector.extract_strided_slice %321 {offsets = [3, 0, 0], sizes = [1, 16, 64], strides = [1, 1, 1]} : vector<8x16x64xf32> to vector<1x16x64xf32>
    %363 = vector.shape_cast %362 : vector<1x16x64xf32> to vector<16x64xf32>
    %364 = arith.addf %361, %363 : vector<16x64xf32>
    %365 = vector.extract_strided_slice %322 {offsets = [3, 0, 0], sizes = [1, 16, 1], strides = [1, 1, 1]} : vector<8x16x1xf32> to vector<1x16x1xf32>
    %366 = vector.shape_cast %365 : vector<1x16x1xf32> to vector<16x1xf32>
    %367 = vector.broadcast %366 : vector<16x1xf32> to vector<16x64xf32>
    %368 = arith.mulf %364, %367 : vector<16x64xf32>
    %cst_148 = arith.constant dense<0.000000e+00> : vector<64xf32>
    %369 = vector.multi_reduction <add>, %368, %cst_148 [0] : vector<16x64xf32> to vector<64xf32>
    %370 = vector.shape_cast %369 : vector<64xf32> to vector<1x64xf32>
    %371 = vector.extract_strided_slice %316 {offsets = [4, 0, 0], sizes = [1, 16, 64], strides = [1, 1, 1]} : vector<8x16x64xf32> to vector<1x16x64xf32>
    %372 = vector.shape_cast %371 : vector<1x16x64xf32> to vector<16x64xf32>
    %373 = arith.mulf %372, %364 : vector<16x64xf32>
    %374 = vector.extract_strided_slice %321 {offsets = [4, 0, 0], sizes = [1, 16, 64], strides = [1, 1, 1]} : vector<8x16x64xf32> to vector<1x16x64xf32>
    %375 = vector.shape_cast %374 : vector<1x16x64xf32> to vector<16x64xf32>
    %376 = arith.addf %373, %375 : vector<16x64xf32>
    %377 = vector.extract_strided_slice %322 {offsets = [4, 0, 0], sizes = [1, 16, 1], strides = [1, 1, 1]} : vector<8x16x1xf32> to vector<1x16x1xf32>
    %378 = vector.shape_cast %377 : vector<1x16x1xf32> to vector<16x1xf32>
    %379 = vector.broadcast %378 : vector<16x1xf32> to vector<16x64xf32>
    %380 = arith.mulf %376, %379 : vector<16x64xf32>
    %cst_149 = arith.constant dense<0.000000e+00> : vector<64xf32>
    %381 = vector.multi_reduction <add>, %380, %cst_149 [0] : vector<16x64xf32> to vector<64xf32>
    %382 = vector.shape_cast %381 : vector<64xf32> to vector<1x64xf32>
    %383 = vector.extract_strided_slice %316 {offsets = [5, 0, 0], sizes = [1, 16, 64], strides = [1, 1, 1]} : vector<8x16x64xf32> to vector<1x16x64xf32>
    %384 = vector.shape_cast %383 : vector<1x16x64xf32> to vector<16x64xf32>
    %385 = arith.mulf %384, %376 : vector<16x64xf32>
    %386 = vector.extract_strided_slice %321 {offsets = [5, 0, 0], sizes = [1, 16, 64], strides = [1, 1, 1]} : vector<8x16x64xf32> to vector<1x16x64xf32>
    %387 = vector.shape_cast %386 : vector<1x16x64xf32> to vector<16x64xf32>
    %388 = arith.addf %385, %387 : vector<16x64xf32>
    %389 = vector.extract_strided_slice %322 {offsets = [5, 0, 0], sizes = [1, 16, 1], strides = [1, 1, 1]} : vector<8x16x1xf32> to vector<1x16x1xf32>
    %390 = vector.shape_cast %389 : vector<1x16x1xf32> to vector<16x1xf32>
    %391 = vector.broadcast %390 : vector<16x1xf32> to vector<16x64xf32>
    %392 = arith.mulf %388, %391 : vector<16x64xf32>
    %cst_150 = arith.constant dense<0.000000e+00> : vector<64xf32>
    %393 = vector.multi_reduction <add>, %392, %cst_150 [0] : vector<16x64xf32> to vector<64xf32>
    %394 = vector.shape_cast %393 : vector<64xf32> to vector<1x64xf32>
    %395 = vector.extract_strided_slice %316 {offsets = [6, 0, 0], sizes = [1, 16, 64], strides = [1, 1, 1]} : vector<8x16x64xf32> to vector<1x16x64xf32>
    %396 = vector.shape_cast %395 : vector<1x16x64xf32> to vector<16x64xf32>
    %397 = arith.mulf %396, %388 : vector<16x64xf32>
    %398 = vector.extract_strided_slice %321 {offsets = [6, 0, 0], sizes = [1, 16, 64], strides = [1, 1, 1]} : vector<8x16x64xf32> to vector<1x16x64xf32>
    %399 = vector.shape_cast %398 : vector<1x16x64xf32> to vector<16x64xf32>
    %400 = arith.addf %397, %399 : vector<16x64xf32>
    %401 = vector.extract_strided_slice %322 {offsets = [6, 0, 0], sizes = [1, 16, 1], strides = [1, 1, 1]} : vector<8x16x1xf32> to vector<1x16x1xf32>
    %402 = vector.shape_cast %401 : vector<1x16x1xf32> to vector<16x1xf32>
    %403 = vector.broadcast %402 : vector<16x1xf32> to vector<16x64xf32>
    %404 = arith.mulf %400, %403 : vector<16x64xf32>
    %cst_151 = arith.constant dense<0.000000e+00> : vector<64xf32>
    %405 = vector.multi_reduction <add>, %404, %cst_151 [0] : vector<16x64xf32> to vector<64xf32>
    %406 = vector.shape_cast %405 : vector<64xf32> to vector<1x64xf32>
    %407 = vector.extract_strided_slice %316 {offsets = [7, 0, 0], sizes = [1, 16, 64], strides = [1, 1, 1]} : vector<8x16x64xf32> to vector<1x16x64xf32>
    %408 = vector.shape_cast %407 : vector<1x16x64xf32> to vector<16x64xf32>
    %409 = arith.mulf %408, %400 : vector<16x64xf32>
    %410 = vector.extract_strided_slice %321 {offsets = [7, 0, 0], sizes = [1, 16, 64], strides = [1, 1, 1]} : vector<8x16x64xf32> to vector<1x16x64xf32>
    %411 = vector.shape_cast %410 : vector<1x16x64xf32> to vector<16x64xf32>
    %412 = arith.addf %409, %411 : vector<16x64xf32>
    %413 = vector.extract_strided_slice %322 {offsets = [7, 0, 0], sizes = [1, 16, 1], strides = [1, 1, 1]} : vector<8x16x1xf32> to vector<1x16x1xf32>
    %414 = vector.shape_cast %413 : vector<1x16x1xf32> to vector<16x1xf32>
    %415 = vector.broadcast %414 : vector<16x1xf32> to vector<16x64xf32>
    %416 = arith.mulf %412, %415 : vector<16x64xf32>
    %cst_152 = arith.constant dense<0.000000e+00> : vector<64xf32>
    %417 = vector.multi_reduction <add>, %416, %cst_152 [0] : vector<16x64xf32> to vector<64xf32>
    %418 = vector.shape_cast %417 : vector<64xf32> to vector<1x64xf32>
    %419 = tpu.concatenate %334, %346, %358, %370, %382, %394, %406, %418 in 0 : vector<1x64xf32>, vector<1x64xf32>, vector<1x64xf32>, vector<1x64xf32>, vector<1x64xf32>, vector<1x64xf32>, vector<1x64xf32>, vector<1x64xf32> -> vector<8x64xf32>
    %420 = arith.index_cast %302 : i32 to index
    %c0_153 = arith.constant 0 : index
    %421 = vector.load %arg34[%420, %c0_153] : memref<8x64xf32, #tpu.memory_space<vmem>>, vector<8x64xf32>
    tpu.vector_store %arg34[%420, %c0_153], %419 {strides = array<i32>} : memref<8x64xf32, #tpu.memory_space<vmem>>, vector<8x64xf32>,
    %c1_i32_154 = arith.constant 1 : i32
    %c0_155 = arith.constant 0 : index
    %c0_156 = arith.constant 0 : index
    %422 = vector.load %arg34[%c0_155, %c0_156] : memref<8x64xf32, #tpu.memory_space<vmem>>, vector<8x64xf32>
    %423 = vector.broadcast %22 : vector<1x64xf32> to vector<8x64xf32>
    %424 = arith.mulf %278, %423 : vector<8x64xf32>
    %425 = arith.addf %422, %424 : vector<8x64xf32>
    %426 = arith.negf %246 : vector<8x64xf32>
    %427 = math.exp %426 : vector<8x64xf32>
    %cst_157 = arith.constant 1.000000e+00 : f32
    %428 = vector.broadcast %cst_157 : f32 to vector<8x64xf32>
    %429 = arith.addf %428, %427 : vector<8x64xf32>
    %430 = arith.divf %428, %429 : vector<8x64xf32>
    %431 = arith.mulf %246, %430 : vector<8x64xf32>
    %432 = arith.mulf %425, %431 : vector<8x64xf32>
    %cst_158 = arith.constant dense<0.000000e+00> : vector<8x32xf32>
    %433 = tpu.matmul %432, %23, %cst_158 {dimension_numbers = #tpu.dot_dimension_numbers<[1], [0], [0], [1], [0, 0, 1, 1], [], []>} : vector<8x64xf32>, vector<64x32xf32>, vector<8x32xf32> -> vector<8x32xf32>
    %434 = arith.addf %244, %433 : vector<8x32xf32>
    %435 = arith.addf %434, %25 : vector<8x32xf32>
    %cst_159 = arith.constant 5.000000e-01 : f32
    %436 = vector.broadcast %cst_159 : f32 to vector<8x32xf32>
    %437 = arith.mulf %436, %435 : vector<8x32xf32>
    %cst_160 = arith.constant 0.707106769 : f32
    %438 = vector.broadcast %cst_160 : f32 to vector<8x32xf32>
    %439 = arith.mulf %435, %438 : vector<8x32xf32>
    %440 = math.erf %439 : vector<8x32xf32>
    %cst_161 = arith.constant 1.000000e+00 : f32
    %441 = vector.broadcast %cst_161 : f32 to vector<8x32xf32>
    %442 = arith.addf %441, %440 : vector<8x32xf32>
    %443 = arith.mulf %437, %442 : vector<8x32xf32>
    %c0_162 = arith.constant 0 : index
    %c0_163 = arith.constant 0 : index
    %c0_164 = arith.constant 0 : index
    %444 = vector.load %arg28[%c0_162, %c0_163, %c0_164] : memref<1x8x32xf32, #tpu.memory_space<vmem>>, vector<1x8x32xf32>
    %445 = vector.shape_cast %444 : vector<1x8x32xf32> to vector<8x32xf32>
    %446 = vector.shape_cast %443 : vector<8x32xf32> to vector<1x8x32xf32>
    tpu.vector_store %arg28[%c0_162, %c0_163, %c0_164], %446 {strides = array<i32>} : memref<1x8x32xf32, #tpu.memory_space<vmem>>, vector<1x8x32xf32>,
    return
  }
  func.func @transform_0(%arg0: i32) -> (i32, i32, i32) {
    %c0_i32 = arith.constant 0 : i32
    %c0_i32_0 = arith.constant 0 : i32
    %c0_i32_1 = arith.constant 0 : i32
    return %arg0, %c0_i32, %c0_i32_0 : i32, i32, i32
  }
  func.func @transform_1(%arg0: i32) -> (i32, i32) {
    %c0_i32 = arith.constant 0 : i32
    %c0_i32_0 = arith.constant 0 : i32
    %c0_i32_1 = arith.constant 0 : i32
    return %c0_i32, %c0_i32_0 : i32, i32
  }
  func.func @transform_2(%arg0: i32) -> (i32, i32) {
    %c0_i32 = arith.constant 0 : i32
    %c0_i32_0 = arith.constant 0 : i32
    %c0_i32_1 = arith.constant 0 : i32
    return %c0_i32, %c0_i32_0 : i32, i32
  }
  func.func @transform_3(%arg0: i32) -> (i32, i32) {
    %c0_i32 = arith.constant 0 : i32
    %c0_i32_0 = arith.constant 0 : i32
    %c0_i32_1 = arith.constant 0 : i32
    return %c0_i32, %c0_i32_0 : i32, i32
  }
  func.func @transform_4(%arg0: i32) -> (i32, i32) {
    %c0_i32 = arith.constant 0 : i32
    %c0_i32_0 = arith.constant 0 : i32
    %c0_i32_1 = arith.constant 0 : i32
    return %c0_i32, %c0_i32_0 : i32, i32
  }
  func.func @transform_5(%arg0: i32) -> (i32, i32) {
    %c0_i32 = arith.constant 0 : i32
    %c0_i32_0 = arith.constant 0 : i32
    %c0_i32_1 = arith.constant 0 : i32
    return %c0_i32, %c0_i32_0 : i32, i32
  }
  func.func @transform_6(%arg0: i32) -> (i32, i32) {
    %c0_i32 = arith.constant 0 : i32
    %c0_i32_0 = arith.constant 0 : i32
    %c0_i32_1 = arith.constant 0 : i32
    return %c0_i32, %c0_i32_0 : i32, i32
  }
  func.func @transform_7(%arg0: i32) -> (i32, i32) {
    %c0_i32 = arith.constant 0 : i32
    %c0_i32_0 = arith.constant 0 : i32
    %c0_i32_1 = arith.constant 0 : i32
    return %c0_i32, %c0_i32_0 : i32, i32
  }
  func.func @transform_8(%arg0: i32) -> (i32, i32) {
    %c0_i32 = arith.constant 0 : i32
    %c0_i32_0 = arith.constant 0 : i32
    %c0_i32_1 = arith.constant 0 : i32
    return %c0_i32, %c0_i32_0 : i32, i32
  }
  func.func @transform_9(%arg0: i32) -> (i32, i32) {
    %c0_i32 = arith.constant 0 : i32
    %c0_i32_0 = arith.constant 0 : i32
    %c0_i32_1 = arith.constant 0 : i32
    return %c0_i32, %c0_i32_0 : i32, i32
  }
  func.func @transform_10(%arg0: i32) -> (i32, i32) {
    %c0_i32 = arith.constant 0 : i32
    %c0_i32_0 = arith.constant 0 : i32
    %c0_i32_1 = arith.constant 0 : i32
    return %c0_i32, %c0_i32_0 : i32, i32
  }
  func.func @transform_11(%arg0: i32) -> (i32, i32) {
    %c0_i32 = arith.constant 0 : i32
    %c0_i32_0 = arith.constant 0 : i32
    %c0_i32_1 = arith.constant 0 : i32
    return %c0_i32, %c0_i32_0 : i32, i32
  }
  func.func @transform_12(%arg0: i32) -> (i32, i32) {
    %c0_i32 = arith.constant 0 : i32
    %c0_i32_0 = arith.constant 0 : i32
    %c0_i32_1 = arith.constant 0 : i32
    return %c0_i32, %c0_i32_0 : i32, i32
  }
  func.func @transform_13(%arg0: i32) -> (i32, i32) {
    %c0_i32 = arith.constant 0 : i32
    %c0_i32_0 = arith.constant 0 : i32
    %c0_i32_1 = arith.constant 0 : i32
    return %c0_i32, %c0_i32_0 : i32, i32
  }
  func.func @transform_14(%arg0: i32) -> (i32, i32) {
    %c0_i32 = arith.constant 0 : i32
    %c0_i32_0 = arith.constant 0 : i32
    %c0_i32_1 = arith.constant 0 : i32
    return %c0_i32, %c0_i32_0 : i32, i32
  }
  func.func @transform_15(%arg0: i32) -> (i32, i32) {
    %c0_i32 = arith.constant 0 : i32
    %c0_i32_0 = arith.constant 0 : i32
    %c0_i32_1 = arith.constant 0 : i32
    return %c0_i32, %c0_i32_0 : i32, i32
  }
  func.func @transform_16(%arg0: i32) -> (i32, i32) {
    %c0_i32 = arith.constant 0 : i32
    %c0_i32_0 = arith.constant 0 : i32
    %c0_i32_1 = arith.constant 0 : i32
    return %c0_i32, %c0_i32_0 : i32, i32
  }
  func.func @transform_17(%arg0: i32) -> (i32, i32) {
    %c0_i32 = arith.constant 0 : i32
    %c0_i32_0 = arith.constant 0 : i32
    %c0_i32_1 = arith.constant 0 : i32
    return %c0_i32, %c0_i32_0 : i32, i32
  }
  func.func @transform_18(%arg0: i32) -> (i32, i32) {
    %c0_i32 = arith.constant 0 : i32
    %c0_i32_0 = arith.constant 0 : i32
    %c0_i32_1 = arith.constant 0 : i32
    return %c0_i32, %c0_i32_0 : i32, i32
  }
  func.func @transform_19(%arg0: i32) -> (i32, i32) {
    %c0_i32 = arith.constant 0 : i32
    %c0_i32_0 = arith.constant 0 : i32
    %c0_i32_1 = arith.constant 0 : i32
    return %c0_i32, %c0_i32_0 : i32, i32
  }
  func.func @transform_20(%arg0: i32) -> (i32, i32) {
    %c0_i32 = arith.constant 0 : i32
    %c0_i32_0 = arith.constant 0 : i32
    %c0_i32_1 = arith.constant 0 : i32
    return %c0_i32, %c0_i32_0 : i32, i32
  }
  func.func @transform_21(%arg0: i32) -> (i32, i32) {
    %c0_i32 = arith.constant 0 : i32
    %c0_i32_0 = arith.constant 0 : i32
    %c0_i32_1 = arith.constant 0 : i32
    return %c0_i32, %c0_i32_0 : i32, i32
  }
  func.func @transform_22(%arg0: i32) -> (i32, i32) {
    %c0_i32 = arith.constant 0 : i32
    %c0_i32_0 = arith.constant 0 : i32
    %c0_i32_1 = arith.constant 0 : i32
    return %c0_i32, %c0_i32_0 : i32, i32
  }
  func.func @transform_23(%arg0: i32) -> (i32, i32) {
    %c0_i32 = arith.constant 0 : i32
    %c0_i32_0 = arith.constant 0 : i32
    %c0_i32_1 = arith.constant 0 : i32
    return %c0_i32, %c0_i32_0 : i32, i32
  }
  func.func @transform_24(%arg0: i32) -> (i32, i32) {
    %c0_i32 = arith.constant 0 : i32
    %c0_i32_0 = arith.constant 0 : i32
    %c0_i32_1 = arith.constant 0 : i32
    return %c0_i32, %c0_i32_0 : i32, i32
  }
  func.func @transform_25(%arg0: i32) -> (i32, i32) {
    %c0_i32 = arith.constant 0 : i32
    %c0_i32_0 = arith.constant 0 : i32
    %c0_i32_1 = arith.constant 0 : i32
    return %c0_i32, %c0_i32_0 : i32, i32
  }
  func.func @transform_26(%arg0: i32) -> (i32, i32) {
    %c0_i32 = arith.constant 0 : i32
    %c0_i32_0 = arith.constant 0 : i32
    %c0_i32_1 = arith.constant 0 : i32
    return %c0_i32, %c0_i32_0 : i32, i32
  }
  func.func @transform_27(%arg0: i32) -> (i32, i32, i32) {
    %c0_i32 = arith.constant 0 : i32
    %c0_i32_0 = arith.constant 0 : i32
    %c0_i32_1 = arith.constant 0 : i32
    return %arg0, %c0_i32, %c0_i32_0 : i32, i32, i32
  }
}

</mosaic_0001>

<bundles_post_ra>
// kernel: tpu_custom_call.1
= control target key start
LH: loop header
LB: loop body
LE: loop exit
PB: predicated region body
PF: predicated region fallthrough
CT: control target
= control target key end

     0   :  { %s5051_s0 = inlined_call_operand.vmem [shape: f32[2,8,32], index: 0, kind: input, shape index: {}]   ;;  %s5052_s1 = inlined_call_operand.vmem [shape: f32[1,32], index: 1, kind: input, shape index: {}]   ;;  %s5053_s2 = inlined_call_operand.vmem [shape: f32[1,32], index: 2, kind: input, shape index: {}]   ;;  %s5054_s3 = inlined_call_operand.vmem [shape: f32[32,64], index: 3, kind: input, shape index: {}]   ;;  %s5055_s4 = inlined_call_operand.vmem [shape: f32[32,64], index: 4, kind: input, shape index: {}]   ;;  %s5056_s5 = inlined_call_operand.vmem [shape: f32[4,64], index: 5, kind: input, shape index: {}]   ;;  %s5057_s6 = inlined_call_operand.vmem [shape: f32[1,64], index: 6, kind: input, shape index: {}]   ;;  %s5058_s7 = inlined_call_operand.vmem [shape: f32[64,2], index: 7, kind: input, shape index: {}]   ;;  %s5059_s8 = inlined_call_operand.vmem [shape: f32[64,16], index: 8, kind: input, shape index: {}]   ;;  %s5060_s9 = inlined_call_operand.vmem [shape: f32[64,16], index: 9, kind: input, shape index: {}]   ;;  %s5061_s10 = inlined_call_operand.vmem [shape: f32[2,64], index: 10, kind: input, shape index: {}]   ;;  %s5062_s11 = inlined_call_operand.vmem [shape: f32[1,64], index: 11, kind: input, shape index: {}]   ;;  %s5063_s12 = inlined_call_operand.vmem [shape: f32[16,64], index: 12, kind: input, shape index: {}]   ;;  %s5064_s13 = inlined_call_operand.vmem [shape: f32[1,64], index: 13, kind: input, shape index: {}]   ;;  %s5065_s14 = inlined_call_operand.vmem [shape: f32[64,32], index: 14, kind: input, shape index: {}]   ;;  %s5066_s15 = inlined_call_operand.vmem [shape: f32[32,64], index: 15, kind: input, shape index: {}]   ;;  %s5067_s16 = inlined_call_operand.vmem [shape: f32[32,64], index: 16, kind: input, shape index: {}]   ;;  %s5068_s17 = inlined_call_operand.vmem [shape: f32[4,64], index: 17, kind: input, shape index: {}]   ;;  %s5069_s18 = inlined_call_operand.vmem [shape: f32[1,64], index: 18, kind: input, shape index: {}]   ;;  %s5070_s19 = inlined_call_operand.vmem [shape: f32[64,2], index: 19, kind: input, shape index: {}]   ;;  %s5071_s20 = inlined_call_operand.vmem [shape: f32[64,16], index: 20, kind: input, shape index: {}]   ;;  %s5072_s21 = inlined_call_operand.vmem [shape: f32[64,16], index: 21, kind: input, shape index: {}]   ;;  %s5073_s22 = inlined_call_operand.vmem [shape: f32[2,64], index: 22, kind: input, shape index: {}]   ;;  %s5074_s23 = inlined_call_operand.vmem [shape: f32[1,64], index: 23, kind: input, shape index: {}]   ;;  %s5075_s24 = inlined_call_operand.vmem [shape: f32[16,64], index: 24, kind: input, shape index: {}]   ;;  %s5076_s25 = inlined_call_operand.vmem [shape: f32[1,64], index: 25, kind: input, shape index: {}]   ;;  %s5077_s26 = inlined_call_operand.vmem [shape: f32[64,32], index: 26, kind: input, shape index: {}]   ;;  %s5078_s27 = inlined_call_operand.hbm [shape: f32[2,8,32], index: 27, kind: output, shape index: {}]  }
   0x1   :  { %5093 = sst [smem:[#allocation16_spill]] %s5051_s0 }
   0x2   :  { %5094 = sst [smem:[#allocation17_spill]] %s5052_s1 }
   0x3   :  { %5095 = sst [smem:[#allocation18_spill]] %s5053_s2 }
   0x4   :  { %5096 = sst [smem:[#allocation19_spill]] %s5054_s3 }
   0x5   :  { %5097 = sst [smem:[#allocation20_spill]] %s5055_s4 }
   0x6   :  { %5098 = sst [smem:[#allocation21_spill]] %s5056_s5 }
   0x7   :  { %5099 = sst [smem:[#allocation22_spill]] %s5057_s6 }
   0x8   :  { %5100 = sst [smem:[#allocation23_spill]] %s5058_s7 }
   0x9   :  { %5101 = sst [smem:[#allocation24_spill]] %s5059_s8 }
   0xa   :  { %5102 = sst [smem:[#allocation25_spill]] %s5060_s9 }
   0xb   :  { %5103 = sst [smem:[#allocation26_spill]] %s5061_s10 }
   0xc   :  { %5104 = sst [smem:[#allocation27_spill]] %s5062_s11 }
   0xd   :  { %5105 = sst [smem:[#allocation28_spill]] %s5063_s12 }
   0xe   :  { %5106 = sst [smem:[#allocation29_spill]] %s5064_s13 }
   0xf   :  { %32 = vsyncpa [#allocation9], 0 }
  0x10   :  { %34 = vsyncpa [#allocation9 + $0x1], 0  ;;  %s4113_s7 = smov 0   ;;  %s4115_s4 = smov 0  }
  0x11   :  { %s4117_s8 = smov 0   ;;  %s4119_s30 = smov 0  }
  0x12 LB: > { %5107 = sst [smem:[#allocation11_spill]] %s3955_s7  ;;  %s4134_s9 = sadd.s32 4294967295, %s3967_s30   ;;  %s3967_s30 = sphi %s4119_s30, %s5132_s30   ;;  %s3963_s8 = sphi %s4117_s8, %s5134_s8   ;;  %s3959_s4 = sphi %s4115_s4, %s5136_s4   ;;  %s3955_s7 = sphi %s4113_s7, %s5135_s7  }
  0x13   : > { %5108 = sst [smem:[#allocation12_spill]] %s3963_s8  ;;  %s3411_s5 = sadd.s32 4294967294, %s3967_s30  }
  0x14   : > { %s4138_s28 = sadd.s32 1, %s3967_s30   ;;  %s619_s0 = sadd.s32 1, %s3963_s8 }
  0x15   : > { %5109 = sst [smem:[#allocation13_spill]] %s4138_s28  ;;  %s616_s10 = ssub.s32 %s3967_s30, %s4138_s28 }
  0x16   : > { %p629_p0 = scmp.ne.s32.totalorder %s3963_s8, %s3959_s4  ;;  %p617_p1 = scmp.eq.s32.totalorder %s616_s10, 0 }
  0x17   : > { %p630_p2 = scmp.eq.s32.totalorder %s4134_s9, 1  ;;  %p635_p3 = scmp.ne.s32.totalorder %s3959_s4, %s3955_s7 }
  0x18   : > { %p636_p4 = scmp.eq.s32.totalorder %s3411_s5, 1  ;;  %p3414_p7 = scmp.ge.s32.totalorder %s3967_s30, 1 }
  0x19   : > { %s4149_s29 = scalar_select %p617_p1, %s3963_s8, %s619_s0  }
  0x1a   : > { %p4151_p5 = por %p630_p2, %p629_p0  ;;  %p4155_p6 = por %p636_p4, %p635_p3 }
  0x1b   : > { %5110 = sst [smem:[#allocation14_spill]] %s4149_s29  ;;  %p739_p8 = scmp.lt.s32.totalorder %s3967_s30, 3 }
  0x1c   : > { %s5112_s6 = scalar_select %p4155_p6, 1, 0 }
  0x1d   : > { %p740_p9 = pnand %p3414_p7, %p739_p8 }
  0x1e   : > { %5113 = sst [smem:[#allocation15_spill]] %s5112_s6  ;;  %p810_p10 = scmp.lt.s32.totalorder (!%p740_p9), %s4134_s9, 1 }
  0x1f   : > { %743 = sbr.rel (%p740_p9) target bundleno = 1794 (0x702), region = 128  ;;  %s5114_s0 = sld [smem:[#allocation16_spill]] (!%p740_p9) }
  0x20   : > { %s5115_s8 = sld [smem:[#allocation19_spill]] (!%p740_p9) }
  0x21   : > { %s5117_s3 = sld [smem:[#allocation17_spill]] (!%p740_p9) }
  0x22   : > { %s5119_s6 = sld [smem:[#allocation20_spill]] (!%p740_p9) }
  0x23   : > { %s5121_s5 = sld [smem:[#allocation24_spill]] (!%p740_p9) }
  0x24   : > { %s811_s11 = scalar_select %p810_p10, %s4134_s9, 1  ;;  %vm909_vm0 = vcmask 261120   ;;  %v3969_v8 = vmov 0.0   ;;  %vm3970_vm1 = vmmov 0   ;;  %v940_v15 = vlaneseq }
  0x25   : > { %3554 = vmatprep.subr.mxu1 %v3969_v8  ;;  %3549 = vmatprep.subr.mxu0 %v3969_v8  ;;  %vm948_vm3 = vcmask 64512   ;;  %vm1165_vm4 = vcmask 518144   ;;  %vm1167_vm5 = vcmask 523264   ;;  %s5123_s7 = sld [smem:[#allocation22_spill]]  ;;  %vm1434_vm6 = vcmask 1041408  }
  0x26   : > { %s3416_s2 = sshll.u32 %s811_s11, 3  ;;  %s5116_s28 = smov %s5115_s8  ;;  %v817_v7 = vld [vmem:[%s5115_s8 + $0x18] sm:$0xff]  ;;  %3562 = vmatprep.mubr.msk.f32.mxu1 %vm3970_vm1, %v3969_v8  ;;  %3551 = vmatprep.mubr.msk.f32.mxu0 %vm3970_vm1, %v3969_v8  ;;  %v4193_v16 = vshrl.u32 %v940_v15, 7  ;;  %v943_v17 = vand.u32 127, %v940_v15  ;;  %1166 = vst.msk [vmem:[#allocation2] sm:$0x7] %vm1165_vm4, %v3969_v8 }
  0x27   : > { %s4166_s10 = scalar_lea.vmem %s5114_s0, %s3416_s2  ;;  %v816_v9 = vld [vmem:[%s5116_s28 + $0x10] sm:$0xff]  ;;  %3555 = vmatpush3.msra.mxu1 %v817_v7  ;;  %v815_v10 = vld [vmem:[%s5116_s28 + $0x8] sm:$0xff]  ;;  %v814_v11 = vld [vmem:[%s5116_s28] sm:$0xff]  ;;  %s5118_s8 = sld [smem:[#allocation18_spill]]  ;;  %vm1525_vm7 = vcmask 130048   ;;  %vm1430_vm8 = vcmask 15360  }
  0x28   : > { %v908_v0 = vld [vmem:[%s4166_s10] sm:$0xff]  ;;  %3556 = vmatprep.subr.mxu1 %v3969_v8  ;;  %v944_v18 = vadd.s32 %v943_v17, %v4193_v16  ;;  %v821_v26 = vld [vmem:[%s5119_s6 + $0x18] sm:$0xff]  ;;  %v820_v27 = vld [vmem:[%s5119_s6 + $0x10] sm:$0xff]  ;;  %s5120_s11 = sld [smem:[#allocation23_spill]]  ;;  %v4295_v47 = vsub.s32 0, %v4193_v16  ;;  %v4301_v49 = vsub.s32 1, %v4193_v16 }
  0x29   : > { %v910_v1 = vsel %vm909_vm0, %v908_v0, 0.0  ;;  %3557 = vmatpush3.msra.mxu1 %v816_v9  ;;  %v3417_v20 = vld [vmem:[%s5117_s3] ss:$0 sm:$0xff]  ;;  %v819_v28 = vld [vmem:[%s5119_s6 + $0x8] sm:$0xff]  ;;  %v839_v31 = vld [vmem:[%s5121_s5 + $0x38] sm:$0xff]  ;;  %s5122_s2 = sld [smem:[#allocation21_spill]] }
  0x2a   : > { %911 = vadd.xlane.f32.xlu0 %v910_v1  ;;  %3558 = vmatprep.subr.mxu1 %v3969_v8  ;;  %vm945_vm2 = vcmp.eq.s32.totalorder %v944_v18, 7  ;;  %v818_v29 = vld [vmem:[%s5119_s6] sm:$0xff]  ;;  %v838_v33 = vld [vmem:[%s5121_s5 + $0x30] sm:$0xff]  ;;  %v837_v35 = vld [vmem:[%s5121_s5 + $0x28] sm:$0xff]  ;;  %v4307_v53 = vsub.s32 2, %v4193_v16  ;;  %v4312_v56 = vsub.s32 3, %v4193_v16 }
  0x2b   : > { %3559 = vmatpush3.msra.mxu1 %v815_v10  ;;  %v3419_v25 = vsel %vm945_vm2, 1.0, %v3969_v8  ;;  %v836_v37 = vld [vmem:[%s5121_s5 + $0x20] sm:$0xff]  ;;  %v835_v39 = vld [vmem:[%s5121_s5 + $0x18] sm:$0xff]  ;;  %v834_v41 = vld [vmem:[%s5121_s5 + $0x10] sm:$0xff]  ;;  %s5127_s28 = sld [smem:[#allocation27_spill]]  ;;  %vm2078_vm11 = vcmask 1040384  }
  0x2c   : > { %3560 = vmatprep.subr.mxu1 %v3969_v8  ;;  %v833_v43 = vld [vmem:[%s5121_s5 + $0x8] sm:$0xff]  ;;  %v832_v45 = vld [vmem:[%s5121_s5] sm:$0xff]  ;;  %s5128_s12 = sld [smem:[#allocation28_spill]]  ;;  %vm2081_vm12 = vcmask 1042432   ;;  %vm2083_vm13 = vcmask 1043456   ;;  %vm2085_vm14 = vcmask 1044480  }
  0x2d   : > { %3561 = vmatpush3.msra.mxu1 %v814_v11  ;;  %v3418_v22 = vld [vmem:[%s5118_s8] ss:$0 sm:$0xff]  ;;  %s5124_s8 = sld [smem:[#allocation25_spill]]  ;;  %vm2087_vm15 = vcmask 1045504   ;;  %vm2089_vm2 = vcmask 1046528   ;;  %s3448_s3 = sshll.u32 %s4134_s9, 7 }
  0x2e   : > { %3576 = vmatprep.subr.mxu1 %v3969_v8  ;;  %v831_v30 = vld [vmem:[%s5120_s11 + $0x38] sm:$0xff]  ;;  %v830_v32 = vld [vmem:[%s5120_s11 + $0x30] sm:$0xff]  ;;  %v829_v34 = vld [vmem:[%s5120_s11 + $0x28] sm:$0xff]  ;;  %s5129_s13 = sld [smem:[#allocation29_spill]]  ;;  %s3350_s6 = scalar_lea.hbm %s5078_s27, %s3448_s3 }
  0x2f   : > { %v828_v36 = vld [vmem:[%s5120_s11 + $0x20] sm:$0xff]  ;;  %v827_v38 = vld [vmem:[%s5120_s11 + $0x18] sm:$0xff]  ;;  %v826_v40 = vld [vmem:[%s5120_s11 + $0x10] sm:$0xff] }
  0x30   : > { %v825_v42 = vld [vmem:[%s5120_s11 + $0x8] sm:$0xff]  ;;  %v824_v44 = vld [vmem:[%s5120_s11] sm:$0xff]  ;;  %s5126_s11 = sld [smem:[#allocation26_spill]] }
  0x31   : > { %v822_v51 = vld [vmem:[%s5122_s2] sm:$0xf] }
  0x32   : > { %v1173_v54 = vrot.slane %v822_v51, %v4295_v47  ;;  %v1180_v55 = vrot.slane %v822_v51, %v4301_v49  ;;  %v1187_v57 = vrot.slane %v822_v51, %v4307_v53  ;;  %v3423_v7 = vld [vmem:[%s5123_s7] ss:$0 sm:$0xff] }
  0x33   : > { %s5125_s29 = smov %s5124_s8  ;;  %v847_v17 = vld [vmem:[%s5124_s8 + $0x38] sm:$0xff]  ;;  %s807_s8 = sand.u32 1, %s3959_s4  }
  0x34   : > { %s3415_s2 = sshll.u32 %s807_s8, 3 }
  0x36   : > { %v848_v18 = vld [vmem:[%s5126_s11] sm:$0x3] }
  0xb3   : > { %v912_v2 = vpop.xlane.xlu0 %911 }
  0xb4   : > { %v914_v3 = vmul.f32 0.03125, %v912_v2 }
  0xb6   : > { %v915_v4 = vsub.f32 %v908_v0, %v914_v3  ;;  %v1194_v0 = vrot.slane %v822_v51, %v4312_v56  ;;  %v4431_v51 = vsub.s32 6, %v4193_v16 }
  0xb8   : > { %v916_v5 = vmul.f32 %v915_v4, %v915_v4 }
  0xba   : > { %v917_v6 = vsel %vm909_vm0, %v916_v5, 0.0 }
  0xbb   : > { %918 = vadd.xlane.f32.xlu0 %v917_v6 }
 0x144   : > { %v919_v12 = vpop.xlane.xlu0 %918 }
 0x145   : > { %v920_v13 = vmul.f32 0.03125, %v919_v12 }
 0x147   : > { %v921_v14 = vadd.f32 1e-05, %v920_v13 }
 0x149   : > { %3806 = vrsqrt.f32 %v921_v14 }
 0x156   : > { %v3807_v19 = vpop.eup %3806 }
 0x157   : > { %v923_v21 = vmul.f32 %v3807_v19, %v915_v4  ;;  %v846_v19 = vld [vmem:[%s5125_s29 + $0x30] sm:$0xff] }
 0x159   : > { %v931_v23 = vmul.f32 %v3417_v20, %v923_v21  ;;  %v845_v20 = vld [vmem:[%s5125_s29 + $0x28] sm:$0xff]  ;;  %v844_v21 = vld [vmem:[%s5125_s29 + $0x20] sm:$0xff] }
 0x15b   : > { %v939_v24 = vadd.f32 %v3418_v22, %v931_v23  ;;  %v843_v22 = vld [vmem:[%s5125_s29 + $0x18] sm:$0xff]  ;;  %v842_v23 = vld [vmem:[%s5125_s29 + $0x10] sm:$0xff] }
 0x15d   : > { %3550 = vmatpush3.msra.mxu0 %v939_v24  ;;  %3563 = vmatmul.mubr.msk.f32.vlgmr.msra.gmra.mxu1 %vm909_vm0, %v939_v24 }
 0x15e   : > { %3565 = vmatprep.subr.mxu0 %v3969_v8  ;;  %3552 = vmatmul.mubr.msk.f32.vlgmr.msra.gmra.mxu0 %vm948_vm3, %v3419_v25  ;;  %v840_v25 = vld [vmem:[%s5125_s29] sm:$0xff] }
 0x15f   : > { %3566 = vmatpush3.msra.mxu0 %v821_v26  ;;  %3573 = vmatprep.mubr.msk.f32.mxu0 %vm3970_vm1, %v3969_v8  ;;  %v864_v26 = vld [vmem:[%s5066_s15 + $0x18] sm:$0xff] }
 0x160   : > { %3567 = vmatprep.subr.mxu0 %v3969_v8  ;;  %3592 = vmatprep.mubr.msk.f32.mxu1 %vm3970_vm1, %v3969_v8 }
 0x161   : > { %3568 = vmatpush3.msra.mxu0 %v820_v27  ;;  %3577 = vmatpush3.msra.mxu1 %v831_v30 }
 0x162   : > { %3569 = vmatprep.subr.mxu0 %v3969_v8  ;;  %3578 = vmatprep.subr.mxu1 %v3969_v8 }
 0x163   : > { %3570 = vmatpush3.msra.mxu0 %v819_v28  ;;  %3579 = vmatpush3.msra.mxu1 %v830_v32  ;;  %v862_v32 = vld [vmem:[%s5066_s15 + $0x8] sm:$0xff] }
 0x164   : > { %3571 = vmatprep.subr.mxu0 %v3969_v8  ;;  %3580 = vmatprep.subr.mxu1 %v3969_v8 }
 0x165   : > { %3572 = vmatpush3.msra.mxu0 %v818_v29  ;;  %3581 = vmatpush3.msra.mxu1 %v829_v34  ;;  %v863_v29 = vld [vmem:[%s5066_s15 + $0x10] sm:$0xff]  ;;  %v868_v34 = vld [vmem:[%s5067_s16 + $0x18] sm:$0xff] }
 0x166   : > { %3574 = vmatmul.mubr.msk.f32.vlgmr.msra.gmra.mxu0 %vm909_vm0, %v939_v24  ;;  %3595 = vmatprep.subr.mxu0 %v3969_v8  ;;  %v841_v24 = vld [vmem:[%s5125_s29 + $0x8] sm:$0xff] }
 0x167   : > { %3611 = vmatprep.mubr.msk.f32.mxu0 %vm3970_vm1, %v3969_v8  ;;  %3596 = vmatpush3.msra.mxu0 %v839_v31 }
 0x168   : > { %3597 = vmatprep.subr.mxu0 %v3969_v8  ;;  %3582 = vmatprep.subr.mxu1 %v3969_v8 }
 0x169   : > { %3598 = vmatpush3.msra.mxu0 %v838_v33  ;;  %3583 = vmatpush3.msra.mxu1 %v828_v36  ;;  %v861_v33 = vld [vmem:[%s5066_s15] sm:$0xff]  ;;  %v867_v36 = vld [vmem:[%s5067_s16 + $0x10] sm:$0xff] }
 0x16a   : > { %3599 = vmatprep.subr.mxu0 %v3969_v8  ;;  %3584 = vmatprep.subr.mxu1 %v3969_v8 }
 0x16b   : > { %3600 = vmatpush3.msra.mxu0 %v837_v35  ;;  %3585 = vmatpush3.msra.mxu1 %v827_v38 }
 0x16c   : > { %3601 = vmatprep.subr.mxu0 %v3969_v8  ;;  %3586 = vmatprep.subr.mxu1 %v3969_v8 }
 0x16d   : > { %3602 = vmatpush3.msra.mxu0 %v836_v37  ;;  %3587 = vmatpush3.msra.mxu1 %v826_v40  ;;  %v865_v40 = vld [vmem:[%s5067_s16] sm:$0xff] }
 0x16e   : > { %3603 = vmatprep.subr.mxu0 %v3969_v8  ;;  %3588 = vmatprep.subr.mxu1 %v3969_v8 }
 0x16f   : > { %3604 = vmatpush3.msra.mxu0 %v835_v39  ;;  %3589 = vmatpush3.msra.mxu1 %v825_v42  ;;  %v866_v39 = vld [vmem:[%s5067_s16 + $0x8] sm:$0xff]  ;;  %v4416_v42 = vsub.s32 4, %v4193_v16 }
 0x170   : > { %3605 = vmatprep.subr.mxu0 %v3969_v8  ;;  %3590 = vmatprep.subr.mxu1 %v3969_v8 }
 0x171   : > { %3606 = vmatpush3.msra.mxu0 %v834_v41  ;;  %3591 = vmatpush3.msra.mxu1 %v824_v44 }
 0x172   : > { %3607 = vmatprep.subr.mxu0 %v3969_v8  ;;  %3614 = vmatprep.subr.mxu1 %v3969_v8 }
 0x173   : > { %3608 = vmatpush3.msra.mxu0 %v833_v43 }
 0x174   : > { %3609 = vmatprep.subr.mxu0 %v3969_v8 }
 0x175   : > { %3610 = vmatpush3.msra.mxu0 %v832_v45  ;;  %v4424_v45 = vsub.s32 5, %v4193_v16 }
 0x176   : > { %3633 = vmatprep.subr.mxu0 %v3969_v8 }
 0x21d   : > { %v1091_v46 = vpop.f32.mrf.mxu1 }
 0x21e   : > { %1168 = vst.msk [vmem:[#allocation2 + $0x3] sm:$0xff] %vm1167_vm5, %v1091_v46  ;;  %v4298_v48 = vpop.f32.mrf.mxu0 }
 0x21f   : > { %v3564_v50 = vpop.f32.mrf.mxu1 }
 0x220   : > { %v3553_v52 = vpop.f32.mrf.mxu0 }
 0x225   : > { %v1169_v58 = vld [vmem:[#allocation2] sm:$0xff] }
 0x226   : > { %v1176_v59 = vld [vmem:[#allocation2 + $0x1] sm:$0xff]  ;;  %v4315_v61 = vpop.f32.mrf.mxu0  ;;  %v1174_v62 = vmul.f32 %v1173_v54, %v1169_v58  ;;  %v4436_v54 = vsub.s32 7, %v4193_v16 }
 0x227   : > { %v1183_v60 = vld [vmem:[#allocation2 + $0x2] sm:$0xff]  ;;  %v1181_v63 = vmul.f32 %v1180_v55, %v1176_v59 }
 0x228   : > { %2252 = vst.msk [vmem:[#allocation2] sm:$0x7] %vm1165_vm4, %v3969_v8  ;;  %v1190_v1 = vld [vmem:[#allocation2 + $0x3] sm:$0xff]  ;;  %v3575_v2 = vpop.f32.mrf.mxu0  ;;  %v1188_v4 = vmul.f32 %v1187_v57, %v1183_v60 }
 0x229   : > { %v1182_v3 = vadd.f32 %v1181_v63, %v1174_v62  ;;  %v1195_v6 = vmul.f32 %v1194_v0, %v1190_v1 }
 0x22b   : > { %v1189_v5 = vadd.f32 %v1188_v4, %v1182_v3  ;;  %v878_v3 = vld [vmem:[%s5070_s19 + $0x38] sm:$0xff] }
 0x22c   : > { %v886_v4 = vld [vmem:[%s5071_s20 + $0x38] sm:$0xff] }
 0x22d   : > { %v1196_v9 = vadd.f32 %v1195_v6, %v1189_v5  ;;  %v877_v5 = vld [vmem:[%s5070_s19 + $0x30] sm:$0xff] }
 0x22e   : > { %v885_v6 = vld [vmem:[%s5071_s20 + $0x30] sm:$0xff] }
 0x22f   : > { %v1203_v10 = vadd.f32 %v3423_v7, %v1196_v9  ;;  %v876_v7 = vld [vmem:[%s5070_s19 + $0x28] sm:$0xff] }
 0x230   : > { %v884_v9 = vld [vmem:[%s5071_s20 + $0x28] sm:$0xff] }
 0x231   : > { %v3424_v11 = vmul.f32 -1.442695, %v1203_v10 }
 0x233   : > { %3808 = vpow2.f32 %v3424_v11  ;;  %v883_v11 = vld [vmem:[%s5071_s20 + $0x20] sm:$0xff] }
 0x240   : > { %v3809_v12 = vpop.eup %3808 }
 0x241   : > { %v1207_v13 = vadd.f32 1.0, %v3809_v12  ;;  %v874_v12 = vld [vmem:[%s5070_s19 + $0x18] sm:$0xff] }
 0x243   : > { %3810 = vrcp.f32 %v1207_v13  ;;  %v882_v13 = vld [vmem:[%s5071_s20 + $0x18] sm:$0xff] }
 0x250   : > { %v3811_v14 = vpop.eup %3810 }
 0x251   : > { %v4323_v15 = vmul.f32 %v3811_v14, %v1203_v10  ;;  %v875_v10 = vld [vmem:[%s5070_s19 + $0x20] sm:$0xff]  ;;  %v873_v14 = vld [vmem:[%s5070_s19 + $0x10] sm:$0xff] }
 0x253   : > { %3593 = vmatmul.mubr.msk.f32.vlgmr.msra.gmra.mxu1 %vm1167_vm5, %v4323_v15  ;;  %3612 = vmatmul.mubr.msk.f32.vlgmr.msra.gmra.mxu0 %vm1167_vm5, %v4323_v15 }
 0x254   : > { %3615 = vmatpush3.msra.mxu1 %v847_v17  ;;  %3630 = vmatprep.mubr.msk.f32.mxu1 %vm3970_vm1, %v3969_v8  ;;  %v881_v17 = vld [vmem:[%s5071_s20 + $0x10] sm:$0xff] }
 0x255   : > { %3616 = vmatprep.subr.mxu1 %v3969_v8  ;;  %3634 = vmatpush3.msk.msra.mxu0 %vm1434_vm6, %v848_v18  ;;  %v872_v18 = vld [vmem:[%s5070_s19 + $0x8] sm:$0xff] }
 0x256   : > { %3617 = vmatpush3.msra.mxu1 %v846_v19  ;;  %3635 = vmatprep.mubr.msk.f32.mxu0 %vm3970_vm1, %v3969_v8  ;;  %v880_v19 = vld [vmem:[%s5071_s20 + $0x8] sm:$0xff] }
 0x257   : > { %3618 = vmatprep.subr.mxu1 %v3969_v8  ;;  %3638 = vmatprep.subr.mxu0 %v3969_v8 }
 0x258   : > { %3619 = vmatpush3.msra.mxu1 %v845_v20  ;;  %v871_v20 = vld [vmem:[%s5070_s19] sm:$0xff] }
 0x259   : > { %3620 = vmatprep.subr.mxu1 %v3969_v8 }
 0x25a   : > { %3621 = vmatpush3.msra.mxu1 %v844_v21  ;;  %v879_v21 = vld [vmem:[%s5071_s20] sm:$0xff] }
 0x25b   : > { %3622 = vmatprep.subr.mxu1 %v3969_v8 }
 0x25c   : > { %3623 = vmatpush3.msra.mxu1 %v843_v22  ;;  %v3428_v22 = vld [vmem:[%s5127_s28] ss:$0 sm:$0xff]  ;;  %s809_s28 = scalar_lea.vmem [#allocation8], %s3415_s2 }
 0x25d   : > { %3624 = vmatprep.subr.mxu1 %v3969_v8  ;;  %s3352_s7 = sshll.u32 %s809_s28, 4  ;;  %s3353_s7 = int_to_ptr.vmem [resolvable:$true] %s3352_s7 }
 0x25e   : > { %3625 = vmatpush3.msra.mxu1 %v842_v23  ;;  %s3907_s0 = scalar_lea.vmem %s3353_s7, 128 }
 0x25f   : > { %3626 = vmatprep.subr.mxu1 %v3969_v8  ;;  %p3908_p11 = scmp.ne.s32.totalorder %s3353_s7, %s3907_s0 }
 0x260   : > { %3627 = vmatpush3.msra.mxu1 %v841_v24 }
 0x261   : > { %3628 = vmatprep.subr.mxu1 %v3969_v8  ;;  %p3909_p12 = pnand %p3908_p11, %p4151_p5 }
 0x262   : > { %3629 = vmatpush3.msra.mxu1 %v840_v25 }
 0x263   : > { %3631 = vmatmul.mubr.msk.f32.vlgmr.msra.gmra.mxu1 %vm1167_vm5, %v4323_v15  ;;  %3660 = vmatprep.subr.mxu1 %v3969_v8  ;;  %p3910_p13 = pneg %p3909_p12 }
 0x264   : > { %3676 = vmatprep.mubr.msk.f32.mxu1 %vm3970_vm1, %v3969_v8  ;;  %3661 = vmatpush3.msra.mxu1 %v878_v3  ;;  %v850_v3 = vld [vmem:[%s5128_s12] sm:$0xff] }
 0x265   : > { %3662 = vmatprep.subr.mxu1 %v3969_v8 }
 0x266   : > { %3663 = vmatpush3.msra.mxu1 %v877_v5 }
 0x267   : > { %3664 = vmatprep.subr.mxu1 %v3969_v8 }
 0x268   : > { %3665 = vmatpush3.msra.mxu1 %v876_v7 }
 0x269   : > { %3666 = vmatprep.subr.mxu1 %v3969_v8 }
 0x26a   : > { %3667 = vmatpush3.msra.mxu1 %v875_v10 }
 0x26b   : > { %3668 = vmatprep.subr.mxu1 %v3969_v8 }
 0x26c   : > { %3669 = vmatpush3.msra.mxu1 %v874_v12 }
 0x26d   : > { %3670 = vmatprep.subr.mxu1 %v3969_v8 }
 0x26e   : > { %3671 = vmatpush3.msra.mxu1 %v873_v14 }
 0x26f   : > { %3672 = vmatprep.subr.mxu1 %v3969_v8 }
 0x270   : > { %3673 = vmatpush3.msra.mxu1 %v872_v18 }
 0x271   : > { %3674 = vmatprep.subr.mxu1 %v3969_v8 }
 0x272   : > { %3675 = vmatpush3.msra.mxu1 %v871_v20 }
 0x273   : > { %3698 = vmatprep.subr.mxu1 %v3969_v8 }
 0x313   : > { %v1280_v27 = vpop.f32.mrf.mxu1  ;;  %v1350_v28 = vpop.f32.mrf.mxu0 }
 0x314   : > { %1526 = vst.msk [vmem:[#allocation5] sm:$0xff] %vm1525_vm7, %v1350_v28  ;;  %3636 = vmatmul.mubr.msk.f32.vlgmr.msra.gmra.mxu0 %vm1430_vm8, %v1280_v27 }
 0x315   : > { %3639 = vmatpush3.msra.mxu0 %v864_v26  ;;  %v3594_v30 = vpop.f32.mrf.mxu1  ;;  %v3613_v31 = vpop.f32.mrf.mxu0  ;;  %3646 = vmatprep.mubr.msk.f32.mxu0 %vm3970_vm1, %v3969_v8 }
 0x316   : > { %3640 = vmatprep.subr.mxu0 %v3969_v8  ;;  %v869_v31 = vld [vmem:[%s5068_s17] sm:$0xf] }
 0x317   : > { %3641 = vmatpush3.msra.mxu0 %v863_v29 }
 0x318   : > { %3642 = vmatprep.subr.mxu0 %v3969_v8 }
 0x319   : > { %3643 = vmatpush3.msra.mxu0 %v862_v32 }
 0x31a   : > { %3644 = vmatprep.subr.mxu0 %v3969_v8 }
 0x31b   : > { %3645 = vmatpush3.msra.mxu0 %v861_v33  ;;  %v1536_v35 = vld [vmem:[#allocation5] sm:$0xff]  ;;  %v2258_v33 = vrot.slane %v869_v31, %v4295_v47 }
 0x31c   : > { %3647 = vmatmul.mubr.msk.f32.vlgmr.msra.gmra.mxu0 %vm909_vm0, %v4298_v48  ;;  %3649 = vmatprep.subr.mxu0 %v3969_v8  ;;  %v1740_v37 = vrot.slane %v1536_v35, %v4301_v49  ;;  %v1729_v38 = vrot.slane %v1536_v35, %v4295_v47  ;;  %v1762_v41 = vrot.slane %v1536_v35, %v4312_v56 }
 0x31d   : > { %3650 = vmatpush3.msra.mxu0 %v868_v34  ;;  %3657 = vmatprep.mubr.msk.f32.mxu0 %vm3970_vm1, %v3969_v8  ;;  %v1773_v44 = vrot.slane %v1536_v35, %v4416_v42  ;;  %v1784_v50 = vrot.slane %v1536_v35, %v4424_v45  ;;  %v1795_v52 = vrot.slane %v1536_v35, %v4431_v51 }
 0x31e   : > { %3651 = vmatprep.subr.mxu0 %v3969_v8  ;;  %1742 = vbcast.lane.b32.xlu0 %v1740_v37, 256  ;;  %v1806_v55 = vrot.slane %v1536_v35, %v4436_v54  ;;  %v2265_v34 = vrot.slane %v869_v31, %v4301_v49 }
 0x31f   : > { %3652 = vmatpush3.msra.mxu0 %v867_v36  ;;  %1731 = vbcast.lane.b32.xlu1 %v1729_v38, 256 }
 0x320   : > { %3653 = vmatprep.subr.mxu0 %v3969_v8 }
 0x321   : > { %3654 = vmatpush3.msra.mxu0 %v866_v39 }
 0x322   : > { %3655 = vmatprep.subr.mxu0 %v3969_v8  ;;  %1768 = vbcast.lane.b32.xlu0 %v1762_v41, 264 }
 0x323   : > { %v1420_v43 = vpop.f32.mrf.mxu1  ;;  %3656 = vmatpush3.msra.mxu0 %v865_v40  ;;  %1735 = vbcast.lane.b32.xlu1 %v1729_v38, 264 }
 0x324   : > { %1527 = vst.msk [vmem:[#allocation6] sm:$0xff] %vm1525_vm7, %v1420_v43  ;;  %3658 = vmatmul.mubr.msk.f32.vlgmr.msra.gmra.mxu0 %vm909_vm0, %v4298_v48  ;;  %3679 = vmatprep.subr.mxu0 %v3969_v8  ;;  %v1751_v48 = vrot.slane %v1536_v35, %v4307_v53  ;;  %v2272_v35 = vrot.slane %v869_v31, %v4307_v53 }
 0x325   : > { %v3632_v46 = vpop.f32.mrf.mxu1  ;;  %3695 = vmatprep.mubr.msk.f32.mxu0 %vm3970_vm1, %v3969_v8  ;;  %3680 = vmatpush3.msra.mxu0 %v886_v4  ;;  %v2279_v43 = vrot.slane %v869_v31, %v4312_v56 }
 0x326   : > { %1779 = vbcast.lane.b32.xlu0 %v1773_v44, 264  ;;  %3681 = vmatprep.subr.mxu0 %v3969_v8 }
 0x327   : > { %1746 = vbcast.lane.b32.xlu1 %v1740_v37, 264  ;;  %3682 = vmatpush3.msra.mxu0 %v885_v6  ;;  %v851_v6 = vld [vmem:[%s5128_s12 + $0x8] sm:$0xff]  ;;  %s3972_s12 = smov [#allocation8]  }
 0x328   : > { %3683 = vmatprep.subr.mxu0 %v3969_v8  ;;  %s3911_s9 = sshll.u32 %s3972_s12, 4  ;;  %s3912_s9 = int_to_ptr.vmem [resolvable:$false] %s3911_s9 }
 0x329   : > { %3684 = vmatpush3.msra.mxu0 %v884_v9  ;;  %v1528_v9 = vmul.f32 1.442695, %v850_v3  ;;  %s3913_s2 = scalar_lea.vmem %s3912_s9, 256  ;;  %p3914_p0 = scmp.lt.s32.totalorder %s3353_s7, %s3912_s9 }
 0x32a   : > { %1790 = vbcast.lane.b32.xlu0 %v1784_v50, 264  ;;  %3685 = vmatprep.subr.mxu0 %v3969_v8  ;;  %p3915_p1 = scmp.lt.s32.totalorder %s3913_s2, %s3907_s0 }
 0x32b   : > { %1753 = vbcast.lane.b32.xlu1 %v1751_v48, 256  ;;  %v1537_v57 = vld [vmem:[#allocation6] sm:$0xff]  ;;  %3686 = vmatpush3.msra.mxu0 %v883_v11  ;;  %v1530_v11 = vmul.f32 1.442695, %v851_v6 }
 0x32c   : > { %v1873_v58 = vrot.slane %v1537_v57, %v4295_v47  ;;  %v1884_v59 = vrot.slane %v1537_v57, %v4301_v49  ;;  %v1895_v60 = vrot.slane %v1537_v57, %v4307_v53  ;;  %v1906_v62 = vrot.slane %v1537_v57, %v4312_v56  ;;  %3687 = vmatprep.subr.mxu0 %v3969_v8  ;;  %p3916_p2 = por %p3915_p1, %p3914_p0 }
 0x32d   : > { %v1917_v63 = vrot.slane %v1537_v57, %v4416_v42  ;;  %v1928_v0 = vrot.slane %v1537_v57, %v4424_v45  ;;  %v1939_v1 = vrot.slane %v1537_v57, %v4431_v51  ;;  %v1950_v2 = vrot.slane %v1537_v57, %v4436_v54  ;;  %3688 = vmatpush3.msra.mxu0 %v882_v13 }
 0x32e   : > { %1801 = vbcast.lane.b32.xlu0 %v1795_v52, 264  ;;  %3689 = vmatprep.subr.mxu0 %v3969_v8  ;;  %v3971_v13 = vmov 1966171168   ;;  %p3917_p3 = pnand %p3916_p2, %p3910_p13 }
 0x32f   : > { %1757 = vbcast.lane.b32.xlu1 %v1751_v48, 264  ;;  %3690 = vmatpush3.msra.mxu0 %v881_v17  ;;  %v1541_v14 = vunpack.c.l.s4 %v3971_v13 }
 0x330   : > { %3691 = vmatprep.subr.mxu0 %v3969_v8 }
 0x331   : > { %3692 = vmatpush3.msra.mxu0 %v880_v19 }
 0x332   : > { %1812 = vbcast.lane.b32.xlu0 %v1806_v55, 264  ;;  %3693 = vmatprep.subr.mxu0 %v3969_v8 }
 0x333   : > { %1764 = vbcast.lane.b32.xlu1 %v1762_v41, 256  ;;  %3694 = vmatpush3.msra.mxu0 %v879_v21 }
 0x334   : > { %3717 = vmatprep.subr.mxu0 %v3969_v8 }
 0x336   : > { %1879 = vbcast.lane.b32.xlu0 %v1873_v58, 264 }
 0x337   : > { %1775 = vbcast.lane.b32.xlu1 %v1773_v44, 256 }
 0x33a   : > { %1890 = vbcast.lane.b32.xlu0 %v1884_v59, 264 }
 0x33b   : > { %1786 = vbcast.lane.b32.xlu1 %v1784_v50, 256 }
 0x33e   : > { %1901 = vbcast.lane.b32.xlu0 %v1895_v60, 264 }
 0x33f   : > { %1797 = vbcast.lane.b32.xlu1 %v1795_v52, 256 }
 0x342   : > { %1912 = vbcast.lane.b32.xlu0 %v1906_v62, 264 }
 0x343   : > { %1808 = vbcast.lane.b32.xlu1 %v1806_v55, 256 }
 0x346   : > { %1923 = vbcast.lane.b32.xlu0 %v1917_v63, 264 }
 0x347   : > { %1875 = vbcast.lane.b32.xlu1 %v1873_v58, 256 }
 0x34a   : > { %1934 = vbcast.lane.b32.xlu0 %v1928_v0, 264 }
 0x34b   : > { %1886 = vbcast.lane.b32.xlu1 %v1884_v59, 256 }
 0x34e   : > { %1945 = vbcast.lane.b32.xlu0 %v1939_v1, 264 }
 0x34f   : > { %1897 = vbcast.lane.b32.xlu1 %v1895_v60, 256  ;;  %v3435_v60 = vld [vmem:[%s5069_s18] ss:$0 sm:$0xff] }
 0x352   : > { %1956 = vbcast.lane.b32.xlu0 %v1950_v2, 264 }
 0x353   : > { %1908 = vbcast.lane.b32.xlu1 %v1906_v62, 256 }
 0x357   : > { %1919 = vbcast.lane.b32.xlu1 %v1917_v63, 256 }
 0x35b   : > { %1930 = vbcast.lane.b32.xlu1 %v1928_v0, 256 }
 0x35f   : > { %1941 = vbcast.lane.b32.xlu1 %v1939_v1, 256 }
 0x363   : > { %1952 = vbcast.lane.b32.xlu1 %v1950_v2, 256 }
 0x390   : > { %v4541_v4 = vpop.permute.xlu0 %1742 }
 0x391   : > { %v4514_v28 = vpop.permute.xlu1 %1731 }
 0x394   : > { %v4548_v17 = vpop.permute.xlu0 %1768 }
 0x395   : > { %v4520_v32 = vpop.permute.xlu1 %1735 }
 0x399   : > { %v4528_v50 = vpop.permute.xlu1 %1746 }
 0x39d   : > { %v4533_v63 = vpop.permute.xlu1 %1753 }
 0x3a1   : > { %v4543_v5 = vpop.permute.xlu1 %1757 }
 0x3a5   : > { %v4550_v18 = vpop.permute.xlu1 %1764 }
 0x3d4   : > { %v1504_v23 = vpop.f32.mrf.mxu0 }
 0x3d5   : > { %v1505_v24 = vadd.f32 %v3428_v22, %v1504_v23  ;;  %v1542_v23 = vunpack.c.0.s8 %v1541_v14 }
 0x3d6   : > { %v3637_v25 = vpop.f32.mrf.mxu0 }
 0x3d7   : > { %v1509_v26 = vmin.f32 %v1505_v24, 20.0  ;;  %vm1508_vm10 = vcmp.gt.f32.partialorder %v1505_v24, 20.0 }
 0x3d9   : > { %v1510_v27 = vmul.f32 1.442695, %v1509_v26  ;;  %v4554_v26 = vpop.permute.xlu0 %1779 }
 0x3db   : > { %3812 = vpow2.f32 %v1510_v27  ;;  %v4556_v27 = vpop.permute.xlu1 %1775 }
 0x3dc   : > { %v2178_v29 = vpop.f32.mrf.mxu0 }
 0x3dd   : > { %2253 = vst.msk [vmem:[#allocation2 + $0x3] sm:$0xff] %vm1167_vm5, %v2178_v29 }
 0x3de   : > { %v3648_v30 = vpop.f32.mrf.mxu0 }
 0x3df   : > { %v4560_v30 = vsub.s32 %v1542_v23, %v4193_v16 }
 0x3e4   : > { %v4525_v36 = vpop.f32.mrf.mxu0  ;;  %v2254_v37 = vld [vmem:[#allocation2] sm:$0xff] }
 0x3e5   : > { %v2261_v38 = vld [vmem:[#allocation2 + $0x1] sm:$0xff]  ;;  %v2259_v40 = vmul.f32 %v2258_v33, %v2254_v37 }
 0x3e6   : > { %v2268_v39 = vld [vmem:[#allocation2 + $0x2] sm:$0xff]  ;;  %v2266_v41 = vmul.f32 %v2265_v34, %v2261_v38  ;;  %v3659_v44 = vpop.f32.mrf.mxu0  ;;  %v4562_v34 = vpop.permute.xlu0 %1790 }
 0x3e7   : > { %v2275_v46 = vld [vmem:[#allocation2 + $0x3] sm:$0xff]  ;;  %v2273_v52 = vmul.f32 %v2272_v35, %v2268_v39 }
 0x3e8   : > { %v2267_v48 = vadd.f32 %v2266_v41, %v2259_v40  ;;  %v3813_v55 = vpop.eup %3812  ;;  %v2280_v59 = vmul.f32 %v2279_v43, %v2275_v46 }
 0x3e9   : > { %v1512_v57 = vadd.f32 1.0, %v3813_v55  ;;  %v1515_v2 = vmul.f32 -0.5, %v3813_v55  ;;  %v1518_v10 = vand.u32 2147483647, %v3813_v55 }
 0x3ea   : > { %v2274_v58 = vadd.f32 %v2273_v52, %v2267_v48  ;;  %v4574_v48 = vpop.permute.xlu0 %1801 }
 0x3eb   : > { %3814 = vlog2.f32 %v1512_v57  ;;  %v1516_v7 = vadd.f32 1.0, %v1515_v2  ;;  %vm1519_vm9 = vcmp.lt.f32.partialorder %v1518_v10, 0.0004427343 }
 0x3ec   : > { %v2281_v62 = vadd.f32 %v2280_v59, %v2274_v58 }
 0x3ed   : > { %v1517_v20 = vmul.f32 %v3813_v55, %v1516_v7 }
 0x3ee   : > { %v4535_v0 = vadd.f32 %v3435_v60, %v2281_v62  ;;  %v4585_v6 = vpop.permute.xlu0 %1812 }
 0x3f0   : > { %v3436_v1 = vmul.f32 -1.442695, %v4535_v0 }
 0x3f2   : > { %3816 = vpow2.f32 %v3436_v1 }
 0x3f3   : > { %3818 = vpow2.f32 %v1528_v9 }
 0x3f4   : > { %3820 = vpow2.f32 %v1530_v11 }
 0x3f8   : > { %v3815_v12 = vpop.eup %3814 }
 0x3f9   : > { %v1514_v19 = vmul.f32 0.6931472, %v3815_v12 }
 0x3fb   : > { %v1520_v21 = vsel %vm1519_vm9, %v1517_v20, %v1514_v19 }
 0x3fc   : > { %v1521_v22 = vsel %vm1508_vm10, %v1505_v24, %v1520_v21  ;;  %v4564_v24 = vpop.permute.xlu1 %1786 }
 0x3fd   : > { %1522 = vst.msk [vmem:[#allocation3] sm:$0xff] %vm1167_vm5, %v1521_v22  ;;  %v1523_v25 = vmul.f32 %v1521_v22, %v4323_v15 }
 0x3ff   : > { %1524 = vst.msk [vmem:[#allocation4] sm:$0xff] %vm1167_vm5, %v1523_v25  ;;  %v3817_v29 = vpop.eup %3816 }
 0x400   : > { %v2292_v33 = vadd.f32 1.0, %v3817_v29  ;;  %v3819_v37 = vpop.eup %3818  ;;  %v4576_v52 = vpop.permute.xlu1 %1797 }
 0x401   : > { %v3821_v38 = vpop.eup %3820  ;;  %v4568_v41 = vsub.f32 0.0, %v3819_v37 }
 0x402   : > { %3822 = vrcp.f32 %v2292_v33  ;;  %v4571_v16 = vsub.f32 0.0, %v3821_v38 }
 0x404   : > { %v1534_v31 = vld [vmem:[#allocation3] sm:$0xff]  ;;  %v4587_v7 = vpop.permute.xlu1 %1808 }
 0x405   : > { %v1546_v35 = vrot.slane %v1534_v31, %v4560_v30  ;;  %v1539_v44 = vcombine.high %v1534_v31, %v1534_v31 }
 0x406   : > { %v1535_v10 = vld [vmem:[#allocation4] sm:$0xff] }
 0x407   : > { %v1554_v39 = vcombine.high %v1546_v35, %v1546_v35  ;;  %v1562_v40 = vrot.slane %v1546_v35, %v4560_v30  ;;  %v1553_v59 = vrot.slane %v1539_v44, %v4560_v30  ;;  %v1684_v25 = vrot.slane %v1535_v10, %v4560_v30  ;;  %v4595_v35 = vpop.permute.xlu0 %1879 }
 0x408   : > { %v1677_v33 = vcombine.high %v1535_v10, %v1535_v10  ;;  %v4597_v37 = vpop.permute.xlu1 %1875 }
 0x409   : > { %v1576_v43 = vrot.slane %v1554_v39, %v4560_v30  ;;  %v1591_v46 = vrot.slane %v1562_v40, %v4295_v47  ;;  %v1584_v55 = vcombine.high %v1562_v40, %v1562_v40  ;;  %v1555_v11 = vcombine.high %v1553_v59, %v1553_v59 }
 0x40a   : > { %v1569_v12 = vrot.slane %v1553_v59, %v4560_v30  ;;  %v895_v59 = vld [vmem:[%s5073_s22] sm:$0x3] }
 0x40b   : > { %v1595_v57 = vrot.slane %v1576_v43, %v4295_v47  ;;  %v1628_v58 = vmul.f32 %v1591_v46, %v4568_v41  ;;  %v1629_v60 = vmul.f32 %v1591_v46, %v4571_v16  ;;  %v1586_v62 = vcombine.high %v1576_v43, %v1576_v43 }
 0x40c   : > { %v1599_v1 = vrot.slane %v1584_v55, %v4295_v47  ;;  %v1583_v29 = vrot.slane %v1555_v11, %v4560_v30  ;;  %v1585_v31 = vcombine.high %v1569_v12, %v1569_v12  ;;  %v1607_v38 = vrot.slane %v1569_v12, %v4295_v47  ;;  %v894_v55 = vld [vmem:[%s5072_s21 + $0x38] sm:$0xff] }
 0x40d   : > { %v1630_v2 = vmul.f32 %v1595_v57, %v4568_v41  ;;  %v1631_v3 = vmul.f32 %v1595_v57, %v4571_v16  ;;  %v1644_v9 = vmul.f32 1.442695, %v1628_v58  ;;  %v1646_v13 = vmul.f32 1.442695, %v1629_v60 }
 0x40e   : > { %v1603_v14 = vrot.slane %v1586_v62, %v4295_v47  ;;  %v1632_v19 = vmul.f32 %v1599_v1, %v4568_v41  ;;  %v1633_v21 = vmul.f32 %v1599_v1, %v4571_v16  ;;  %v1692_v57 = vcombine.high %v1684_v25, %v1684_v25 }
 0x40f   : > { %3824 = vpow2.f32 %v1644_v9  ;;  %v1648_v20 = vmul.f32 1.442695, %v1630_v2  ;;  %v1650_v22 = vmul.f32 1.442695, %v1631_v3  ;;  %v3823_v23 = vpop.eup %3822  ;;  %v4609_v58 = vrot.slane %v1684_v25, %v4560_v30 }
 0x410   : > { %3826 = vpow2.f32 %v1646_v13  ;;  %v1634_v39 = vmul.f32 %v1603_v14, %v4568_v41  ;;  %v1652_v40 = vmul.f32 1.442695, %v1632_v19  ;;  %v1635_v43 = vmul.f32 %v1603_v14, %v4571_v16  ;;  %v892_v13 = vld [vmem:[%s5072_s21 + $0x28] sm:$0xff]  ;;  %v4636_v14 = vpop.permute.xlu0 %1890  ;;  %v4638_v19 = vpop.permute.xlu1 %1886 }
 0x411   : > { %3828 = vpow2.f32 %v1648_v20  ;;  %v1654_v44 = vmul.f32 1.442695, %v1633_v21  ;;  %v4603_v46 = vmul.f32 %v3823_v23, %v4535_v0  ;;  %v3432_v60 = vmul.f32 -1.442695, %v4315_v61  ;;  %v893_v0 = vld [vmem:[%s5072_s21 + $0x30] sm:$0xff]  ;;  %v891_v23 = vld [vmem:[%s5072_s21 + $0x20] sm:$0xff] }
 0x412   : > { %3830 = vpow2.f32 %v1650_v22  ;;  %v1587_v62 = vcombine.high %v1583_v29, %v1583_v29  ;;  %v4616_v1 = vrot.slane %v1677_v33, %v4560_v30  ;;  %v1611_v2 = vrot.slane %v1583_v29, %v4295_v47 }
 0x413   : > { %3677 = vmatmul.mubr.msk.f32.vlgmr.msra.gmra.mxu1 %vm1167_vm5, %v4603_v46  ;;  %3696 = vmatmul.mubr.msk.f32.vlgmr.msra.gmra.mxu0 %vm1167_vm5, %v4603_v46  ;;  %v1636_v3 = vmul.f32 %v1607_v38, %v4568_v41  ;;  %3832 = vpow2.f32 %v1652_v40  ;;  %v1656_v9 = vmul.f32 1.442695, %v1634_v39  ;;  %v1615_v10 = vrot.slane %v1585_v31, %v4295_v47 }
 0x414   : > { %3699 = vmatpush3.msra.mxu1 %v894_v55  ;;  %3714 = vmatprep.mubr.msk.f32.mxu1 %vm3970_vm1, %v3969_v8  ;;  %v1637_v11 = vmul.f32 %v1607_v38, %v4571_v16  ;;  %3834 = vpow2.f32 %v1654_v44  ;;  %v1658_v12 = vmul.f32 1.442695, %v1635_v43  ;;  %v1714_v20 = vrot.slane %v1692_v57, %v4560_v30  ;;  %v890_v43 = vld [vmem:[%s5072_s21 + $0x18] sm:$0xff] }
 0x415   : > { %3700 = vmatprep.subr.mxu1 %v3969_v8  ;;  %3718 = vmatpush3.msk.msra.mxu0 %vm1434_vm6, %v895_v59  ;;  %v1817_v21 = vrot.slane %v4609_v58, %v4295_v47  ;;  %3836 = vpow2.f32 %v3432_v60  ;;  %v1619_v22 = vrot.slane %v1587_v62, %v4295_v47  ;;  %v1638_v25 = vmul.f32 %v1611_v2, %v4568_v41 }
 0x416   : > { %3701 = vmatpush3.msra.mxu1 %v893_v0  ;;  %3719 = vmatprep.mubr.msk.f32.mxu0 %vm3970_vm1, %v3969_v8  ;;  %v1639_v29 = vmul.f32 %v1611_v2, %v4571_v16  ;;  %3838 = vpow2.f32 %v1656_v9  ;;  %v1660_v31 = vmul.f32 1.442695, %v1636_v3  ;;  %v1640_v38 = vmul.f32 %v1615_v10, %v4568_v41  ;;  %v889_v9 = vld [vmem:[%s5072_s21 + $0x10] sm:$0xff] }
 0x417   : > { %3702 = vmatprep.subr.mxu1 %v3969_v8  ;;  %3722 = vmatprep.subr.mxu0 %v3969_v8  ;;  %3840 = vpow2.f32 %v1658_v12  ;;  %v1662_v39 = vmul.f32 1.442695, %v1637_v11  ;;  %v1693_v40 = vcombine.high %v4616_v1, %v4616_v1  ;;  %v1722_v55 = vcombine.high %v4609_v58, %v4609_v58  ;;  %v4671_v58 = vpop.permute.xlu0 %1901  ;;  %v4673_v11 = vpop.permute.xlu1 %1897 }
 0x418   : > { %3703 = vmatpush3.msra.mxu1 %v892_v13  ;;  %v1821_v57 = vrot.slane %v1714_v20, %v4295_v47  ;;  %v1854_v59 = vmul.f32 %v1817_v21, %v4514_v28  ;;  %v1641_v62 = vmul.f32 %v1615_v10, %v4571_v16  ;;  %v1642_v0 = vmul.f32 %v1619_v22, %v4568_v41 }
 0x419   : > { %3704 = vmatprep.subr.mxu1 %v3969_v8  ;;  %v1855_v2 = vmul.f32 %v1817_v21, %v4520_v32  ;;  %3842 = vpow2.f32 %v1660_v31  ;;  %v1664_v28 = vmul.f32 1.442695, %v1638_v25  ;;  %v1724_v12 = vcombine.high %v1714_v20, %v1714_v20 }
 0x41a   : > { %3705 = vmatpush3.msra.mxu1 %v891_v23  ;;  %3844 = vpow2.f32 %v1662_v39  ;;  %v1666_v41 = vmul.f32 1.442695, %v1639_v29  ;;  %v4677_v32 = vrot.slane %v4616_v1, %v4560_v30  ;;  %v888_v23 = vld [vmem:[%s5072_s21 + $0x8] sm:$0xff]  ;;  %v4684_v25 = vrot.slane %v1693_v40, %v4560_v30 }
 0x41b   : > { %3706 = vmatprep.subr.mxu1 %v3969_v8  ;;  %v1825_v20 = vrot.slane %v1722_v55, %v4295_v47  ;;  %v1856_v31 = vmul.f32 %v1821_v57, %v4541_v4  ;;  %v1643_v1 = vmul.f32 %v1619_v22, %v4571_v16  ;;  %v1668_v39 = vmul.f32 1.442695, %v1640_v38  ;;  %v860_v22 = vld [vmem:[%s5065_s14 + $0x38] sm:$0xff] }
 0x41c   : > { %v3825_v33 = vpop.eup %3824  ;;  %3707 = vmatpush3.msra.mxu1 %v890_v43  ;;  %v1857_v43 = vmul.f32 %v1821_v57, %v4528_v50  ;;  %3846 = vpow2.f32 %v1664_v28  ;;  %v1670_v40 = vmul.f32 1.442695, %v1641_v62  ;;  %v1829_v55 = vrot.slane %v1724_v12, %v4295_v47  ;;  %v1913_v57 = vpop.permute.xlu0 %1912 }
 0x41d   : > { %v3827_v44 = vpop.eup %3826  ;;  %v1958_v60 = vmul.f32 0.0, %v3825_v33  ;;  %3708 = vmatprep.subr.mxu1 %v3969_v8  ;;  %3848 = vpow2.f32 %v1666_v41  ;;  %v1723_v16 = vcombine.high %v4677_v32, %v4677_v32  ;;  %v1909_v62 = vpop.permute.xlu1 %1908  ;;  %v1674_v12 = vmul.f32 1.442695, %v1643_v1 }
 0x41e   : > { %v1959_v3 = vmul.f32 0.0, %v3827_v44  ;;  %v3829_v10 = vpop.eup %3828  ;;  %3709 = vmatpush3.msra.mxu1 %v889_v9  ;;  %v1858_v9 = vmul.f32 %v1825_v20, %v4533_v63  ;;  %3850 = vpow2.f32 %v1668_v39  ;;  %v858_v39 = vld [vmem:[%s5065_s14 + $0x28] sm:$0xff] }
 0x41f   : > { %v1960_v13 = vadd.f32 %v1958_v60, %v1854_v59  ;;  %v3831_v33 = vpop.eup %3830  ;;  %3710 = vmatprep.subr.mxu1 %v3969_v8  ;;  %v887_v59 = vld [vmem:[%s5072_s21] sm:$0xff]  ;;  %3852 = vpow2.f32 %v1670_v40 }
 0x420   : > { %v1961_v21 = vadd.f32 %v1959_v3, %v1855_v2  ;;  %3711 = vmatpush3.msra.mxu1 %v888_v23  ;;  %v3833_v4 = vpop.eup %3832  ;;  %v1672_v2 = vmul.f32 1.442695, %v1642_v0  ;;  %v1725_v3 = vcombine.high %v4684_v25, %v4684_v25  ;;  %v1859_v0 = vmul.f32 %v1825_v20, %v4543_v5 }
 0x421   : > { %v1973_v29 = vmul.f32 %v3829_v10, %v1960_v13  ;;  %3712 = vmatprep.subr.mxu1 %v3969_v8  ;;  %v3835_v38 = vpop.eup %3834  ;;  %v1833_v5 = vrot.slane %v4677_v32, %v4295_v47  ;;  %v854_v32 = vld [vmem:[%s5065_s14 + $0x8] sm:$0xff] }
 0x422   : > { %v1974_v44 = vmul.f32 %v3831_v33, %v1961_v21  ;;  %3713 = vmatpush3.msra.mxu1 %v887_v59  ;;  %v859_v33 = vld [vmem:[%s5065_s14 + $0x30] sm:$0xff]  ;;  %v4713_v63 = vpop.eup %3836  ;;  %3854 = vpow2.f32 %v1672_v2 }
 0x423   : > { %v1975_v60 = vadd.f32 %v1973_v29, %v1856_v31  ;;  %3715 = vmatmul.mubr.msk.f32.vlgmr.msra.gmra.mxu1 %vm1167_vm5, %v4603_v46  ;;  %3741 = vmatprep.subr.mxu1 %v3969_v8  ;;  %v1962_v31 = vmul.f32 %v1960_v13, %v4597_v37  ;;  %v1963_v29 = vmul.f32 %v1961_v21, %v4595_v35  ;;  %v857_v21 = vld [vmem:[%s5065_s14 + $0x20] sm:$0xff]  ;;  %3856 = vpow2.f32 %v1674_v12 }
 0x424   : > { %v1976_v50 = vadd.f32 %v1974_v44, %v1857_v43  ;;  %3742 = vmatpush3.msra.mxu1 %v860_v22  ;;  %3757 = vmatprep.mubr.msk.f32.mxu1 %vm3970_vm1, %v3969_v8 }
 0x425   : > { %v1988_v28 = vmul.f32 %v3833_v4, %v1975_v60  ;;  %v1977_v10 = vmul.f32 %v1975_v60, %v4638_v19  ;;  %v1860_v19 = vmul.f32 %v1829_v55, %v4550_v18  ;;  %3743 = vmatprep.subr.mxu1 %v3969_v8  ;;  %v1861_v18 = vmul.f32 %v1829_v55, %v4548_v17  ;;  %v1924_v60 = vpop.permute.xlu0 %1923  ;;  %v1920_v4 = vpop.permute.xlu1 %1919 }
 0x426   : > { %v1978_v41 = vmul.f32 %v1976_v50, %v4636_v14  ;;  %v1989_v23 = vmul.f32 %v3835_v38, %v1976_v50  ;;  %v3839_v14 = vpop.eup %3838  ;;  %3744 = vmatpush3.msra.mxu1 %v859_v33  ;;  %v1837_v17 = vrot.slane %v4684_v25, %v4295_v47  ;;  %v1965_v50 = vsel %vm1167_vm5, %v1963_v29, 0.0 }
 0x427   : > { %v1990_v20 = vadd.f32 %v1988_v28, %v1858_v9  ;;  %v3841_v43 = vpop.eup %3840  ;;  %v1979_v40 = vsel %vm1167_vm5, %v1977_v10, 0.0  ;;  %3745 = vmatprep.subr.mxu1 %v3969_v8  ;;  %v856_v9 = vld [vmem:[%s5065_s14 + $0x18] sm:$0xff]  ;;  %v1862_v28 = vmul.f32 %v1833_v5, %v4556_v27  ;;  %v1841_v27 = vrot.slane %v1723_v16, %v4295_v47 }
 0x428   : > { %v1991_v1 = vadd.f32 %v1989_v23, %v1859_v0  ;;  %v1980_v37 = vsel %vm1167_vm5, %v1978_v41, 0.0  ;;  %3746 = vmatpush3.msra.mxu1 %v858_v39  ;;  %v3843_v2 = vpop.eup %3842  ;;  %v1863_v23 = vmul.f32 %v1833_v5, %v4554_v26 }
 0x429   : > { %v1992_v44 = vmul.f32 %v1990_v20, %v4673_v11  ;;  %v2003_v59 = vmul.f32 %v3839_v14, %v1990_v20  ;;  %3747 = vmatprep.subr.mxu1 %v3969_v8  ;;  %v3845_v0 = vpop.eup %3844  ;;  %v1981_v12 = vadd.f32 %v1980_v37, %v1979_v40  ;;  %v855_v14 = vld [vmem:[%s5065_s14 + $0x10] sm:$0xff]  ;;  %v1935_v25 = vpop.permute.xlu0 %1934 }
 0x42a   : > { %v1993_v35 = vmul.f32 %v1991_v1, %v4671_v58  ;;  %v2004_v13 = vmul.f32 %v3841_v43, %v1991_v1  ;;  %v1964_v58 = vsel %vm1167_vm5, %v1962_v31, 0.0  ;;  %3748 = vmatpush3.msra.mxu1 %v857_v21  ;;  %v3847_v5 = vpop.eup %3846  ;;  %v1864_v31 = vmul.f32 %v1837_v17, %v4564_v24 }
 0x42b   : > { %v1994_v11 = vsel %vm1167_vm5, %v1992_v44, 0.0  ;;  %v2005_v55 = vadd.f32 %v2003_v59, %v1860_v19  ;;  %3749 = vmatprep.subr.mxu1 %v3969_v8  ;;  %v1966_v26 = vadd.f32 %v1965_v50, %v1964_v58  ;;  %v3849_v16 = vpop.eup %3848  ;;  %v1865_v43 = vmul.f32 %v1837_v17, %v4562_v34 }
 0x42c   : > { %v1995_v22 = vsel %vm1167_vm5, %v1993_v35, 0.0  ;;  %v2006_v38 = vadd.f32 %v2004_v13, %v1861_v18  ;;  %3750 = vmatpush3.msra.mxu1 %v856_v9  ;;  %v1982_v18 = vrot.slane %v1981_v12, 4  ;;  %v853_v13 = vld [vmem:[%s5065_s14] sm:$0xff]  ;;  %v1866_v21 = vmul.f32 %v1841_v27, %v4576_v52  ;;  %v3851_v17 = vpop.eup %3850 }
 0x42d   : > { %v1996_v10 = vadd.f32 %v1995_v22, %v1994_v11  ;;  %v2007_v41 = vmul.f32 %v2005_v55, %v1909_v62  ;;  %v2018_v19 = vmul.f32 %v3843_v2, %v2005_v55  ;;  %v1845_v62 = vrot.slane %v1725_v3, %v4295_v47  ;;  %3751 = vmatprep.subr.mxu1 %v3969_v8  ;;  %v1931_v3 = vpop.permute.xlu1 %1930  ;;  %v3853_v50 = vpop.eup %3852 }
 0x42e   : > { %v2008_v33 = vmul.f32 %v2006_v38, %v1913_v57  ;;  %v2019_v20 = vmul.f32 %v3845_v0, %v2006_v38  ;;  %3752 = vmatpush3.msra.mxu1 %v855_v14  ;;  %v1867_v11 = vmul.f32 %v1841_v27, %v4574_v48  ;;  %v1967_v55 = vrot.slane %v1966_v26, 4 }
 0x42f   : > { %v2009_v57 = vsel %vm1167_vm5, %v2007_v41, 0.0  ;;  %v2020_v1 = vadd.f32 %v2018_v19, %v1862_v28  ;;  %v1997_v44 = vrot.slane %v1996_v10, 4  ;;  %3753 = vmatprep.subr.mxu1 %v3969_v8  ;;  %v1868_v22 = vmul.f32 %v1845_v62, %v4587_v7  ;;  %v3855_v48 = vpop.eup %3854 }
 0x430   : > { %v2010_v29 = vsel %vm1167_vm5, %v2008_v33, 0.0  ;;  %v2021_v39 = vadd.f32 %v2019_v20, %v1863_v23  ;;  %3754 = vmatpush3.msra.mxu1 %v854_v32  ;;  %v1983_v38 = vadd.f32 %v1982_v18, %v1981_v12  ;;  %v1946_v33 = vpop.permute.xlu0 %1945  ;;  %v1869_v20 = vmul.f32 %v1845_v62, %v4585_v6 }
 0x431   : > { %v2011_v59 = vadd.f32 %v2010_v29, %v2009_v57  ;;  %v2022_v24 = vmul.f32 %v2020_v1, %v1920_v4  ;;  %v2033_v37 = vmul.f32 %v3847_v5, %v2020_v1  ;;  %3755 = vmatprep.subr.mxu1 %v3969_v8  ;;  %v1998_v9 = vadd.f32 %v1997_v44, %v1996_v10  ;;  %v1942_v19 = vpop.permute.xlu1 %1941  ;;  %v3857_v5 = vpop.eup %3856 }
 0x432   : > { %v2023_v40 = vmul.f32 %v2021_v39, %v1924_v60  ;;  %v2034_v35 = vmul.f32 %v3849_v16, %v2021_v39  ;;  %3756 = vmatpush3.msra.mxu1 %v853_v13  ;;  %v1968_v14 = vadd.f32 %v1967_v55, %v1966_v26  ;;  %v1984_v29 = vrot.slane %v1983_v38, 2 }
 0x433   : > { %v2012_v34 = vrot.slane %v2011_v59, 4  ;;  %v2024_v2 = vsel %vm1167_vm5, %v2022_v24, 0.0  ;;  %v2035_v4 = vadd.f32 %v2033_v37, %v1864_v31  ;;  %v1999_v1 = vrot.slane %v1998_v9, 2 }
 0x434   : > { %v2025_v60 = vsel %vm1167_vm5, %v2023_v40, 0.0  ;;  %v2036_v58 = vadd.f32 %v2034_v35, %v1865_v43  ;;  %v1969_v18 = vrot.slane %v1968_v14, 2  ;;  %v1957_v37 = vpop.permute.xlu0 %1956  ;;  %v1985_v13 = vadd.f32 %v1984_v29, %v1983_v38 }
 0x435   : > { %v2026_v52 = vadd.f32 %v2025_v60, %v2024_v2  ;;  %v2037_v0 = vmul.f32 %v2035_v4, %v1931_v3  ;;  %v2048_v41 = vmul.f32 %v3851_v17, %v2035_v4  ;;  %v2013_v27 = vadd.f32 %v2012_v34, %v2011_v59  ;;  %v1953_v35 = vpop.permute.xlu1 %1952 }
 0x436   : > { %v2038_v28 = vmul.f32 %v2036_v58, %v1935_v25  ;;  %v2049_v23 = vmul.f32 %v3853_v50, %v2036_v58  ;;  %v2000_v55 = vadd.f32 %v1999_v1, %v1998_v9  ;;  %v1970_v2 = vadd.f32 %v1969_v18, %v1968_v14 }
 0x437   : > { %v2027_v57 = vrot.slane %v2026_v52, 4  ;;  %v2039_v31 = vsel %vm1167_vm5, %v2037_v0, 0.0  ;;  %v2050_v12 = vadd.f32 %v2048_v41, %v1866_v21  ;;  %v2014_v6 = vrot.slane %v2013_v27, 2 }
 0x438   : > { %v2040_v7 = vsel %vm1167_vm5, %v2038_v28, 0.0  ;;  %v2051_v10 = vadd.f32 %v2049_v23, %v1867_v11  ;;  %v1986_v0 = vrot.slane %v1985_v13, 1  ;;  %v2001_v23 = vrot.slane %v2000_v55, 1 }
 0x439   : > { %v2028_v39 = vadd.f32 %v2027_v57, %v2026_v52  ;;  %v2041_v32 = vadd.f32 %v2040_v7, %v2039_v31  ;;  %v2052_v16 = vmul.f32 %v2050_v12, %v1942_v19  ;;  %v2063_v3 = vmul.f32 %v3855_v48, %v2050_v12 }
 0x43a   : > { %v2053_v25 = vmul.f32 %v2051_v10, %v1946_v33  ;;  %v2064_v43 = vmul.f32 %v3857_v5, %v2051_v10  ;;  %v2015_v60 = vadd.f32 %v2014_v6, %v2013_v27  ;;  %v1971_v38 = vrot.slane %v1970_v2, 1 }
 0x43b   : > { %v2029_v62 = vrot.slane %v2028_v39, 2  ;;  %v2042_v26 = vrot.slane %v2041_v32, 4  ;;  %v2054_v44 = vsel %vm1167_vm5, %v2052_v16, 0.0  ;;  %v2065_v24 = vadd.f32 %v2063_v3, %v1868_v22 }
 0x43c   : > { %v2055_v59 = vsel %vm1167_vm5, %v2053_v25, 0.0  ;;  %v2066_v40 = vadd.f32 %v2064_v43, %v1869_v20  ;;  %v2016_v33 = vrot.slane %v2015_v60, 1  ;;  %v2104_v20 = vadd.f32 1.0, %v4713_v63 }
 0x43d   : > { %v2056_v21 = vadd.f32 %v2055_v59, %v2054_v44  ;;  %v2043_v11 = vadd.f32 %v2042_v26, %v2041_v32  ;;  %v2067_v34 = vmul.f32 %v2065_v24, %v1953_v35  ;;  %v2030_v50 = vadd.f32 %v2029_v62, %v2028_v39  ;;  %v3431_v24 = vld [vmem:[%s5129_s13] ss:$0 sm:$0xff] }
 0x43e   : > { %v2068_v17 = vmul.f32 %v2066_v40, %v1957_v37  ;;  %v1987_v27 = vadd.f32 %v1986_v0, %v1985_v13  ;;  %v2002_v7 = vadd.f32 %v2001_v23, %v2000_v55  ;;  %v1972_v12 = vadd.f32 %v1971_v38, %v1970_v2 }
 0x43f   : > { %v2044_v4 = vrot.slane %v2043_v11, 2  ;;  %v2057_v58 = vrot.slane %v2056_v21, 4  ;;  %v2069_v52 = vsel %vm1167_vm5, %v2067_v34, 0.0  ;;  %v2031_v14 = vrot.slane %v2030_v50, 1 }
 0x440   : > { %v2070_v48 = vsel %vm1167_vm5, %v2068_v17, 0.0  ;;  %v2017_v10 = vadd.f32 %v2016_v33, %v2015_v60  ;;  %3858 = vrcp.f32 %v2104_v20  ;;  %v2079_v25 = vsel %vm2078_vm11, %v1972_v12, %v1987_v27  ;;  %v903_v27 = vld [vmem:[%s5077_s26 + $0x18] sm:$0xff] }
 0x441   : > { %v2045_v22 = vadd.f32 %v2044_v4, %v2043_v11  ;;  %v2058_v28 = vadd.f32 %v2057_v58, %v2056_v21  ;;  %v2071_v41 = vadd.f32 %v2070_v48, %v2069_v52  ;;  %v2032_v39 = vadd.f32 %v2031_v14, %v2030_v50 }
 0x442   : > { %v2080_v3 = vsel %vm1434_vm6, %v2079_v25, %v2002_v7  ;;  %v2099_v37 = vmul.f32 %v3431_v24, %v4323_v15  ;;  %v3440_v7 = vld [vmem:[%s5074_s23] ss:$0 sm:$0xff] }
 0x443   : > { %v2059_v19 = vrot.slane %v2058_v28, 2  ;;  %v2072_v9 = vrot.slane %v2071_v41, 4  ;;  %v2046_v57 = vrot.slane %v2045_v22, 1  ;;  %v2082_v18 = vsel %vm2081_vm12, %v2080_v3, %v2017_v10 }
 0x444   : > { %v2084_v6 = vsel %vm2083_vm13, %v2082_v18, %v2032_v39  ;;  %v897_v18 = vld [vmem:[%s5075_s24] sm:$0xff] }
 0x445   : > { %v2060_v5 = vadd.f32 %v2059_v19, %v2058_v28  ;;  %v2073_v31 = vadd.f32 %v2072_v9, %v2071_v41  ;;  %v2047_v32 = vadd.f32 %v2046_v57, %v2045_v22  ;;  %v902_v57 = vld [vmem:[%s5077_s26 + $0x10] sm:$0xff] }
 0x447   : > { %v2061_v29 = vrot.slane %v2060_v5, 1  ;;  %v2074_v1 = vrot.slane %v2073_v31, 2  ;;  %v2086_v26 = vsel %vm2085_vm14, %v2084_v6, %v2047_v32 }
 0x449   : > { %v2075_v16 = vadd.f32 %v2074_v1, %v2073_v31  ;;  %v2062_v63 = vadd.f32 %v2061_v29, %v2060_v5  ;;  %v901_v5 = vld [vmem:[%s5077_s26 + $0x8] sm:$0xff]  ;;  %v900_v31 = vld [vmem:[%s5077_s26] sm:$0xff] }
 0x44b   : > { %v2076_v43 = vrot.slane %v2075_v16, 1  ;;  %v2088_v44 = vsel %vm2087_vm15, %v2086_v26, %v2062_v63  ;;  %v898_v26 = vld [vmem:[%s5075_s24 + $0x8] sm:$0xff] }
 0x44d   : > { %v2077_v62 = vadd.f32 %v2076_v43, %v2075_v16  ;;  %v3859_v40 = vpop.eup %3858 }
 0x44e   : > { %v2107_v13 = vmul.f32 %v3859_v40, %v4315_v61  ;;  %v2612_v40 = vmul.f32 1.442695, %v898_v26 }
 0x44f   : > { %v2090_v59 = vsel %vm2089_vm2, %v2088_v44, %v2077_v62 }
 0x450   : > { %2091 = vst.msk [vmem:[#allocation7] sm:$0xff] %vm1167_vm5, %v2090_v59  ;;  %v2610_v59 = vmul.f32 1.442695, %v897_v18 }
 0x457   : > { %v2092_v35 = vld [vmem:[#allocation7] sm:$0xff] }
 0x458   : > { %v2100_v21 = vadd.f32 %v2099_v37, %v2092_v35 }
 0x45a   : > { %v2108_v11 = vmul.f32 %v2107_v13, %v2100_v21 }
 0x45c   : > { %3758 = vmatmul.mubr.msk.f32.vlgmr.msra.gmra.mxu1 %vm1167_vm5, %v2108_v11 }
 0x4d3   : > { %v2365_v55 = vpop.f32.mrf.mxu1  ;;  %v2435_v34 = vpop.f32.mrf.mxu0 }
 0x4d4   : > { %2608 = vst.msk [vmem:[#allocation5] sm:$0xff] %vm1525_vm7, %v2435_v34  ;;  %3720 = vmatmul.mubr.msk.f32.vlgmr.msra.gmra.mxu0 %vm1430_vm8, %v2365_v55 }
 0x4d5   : > { %v3678_v17 = vpop.f32.mrf.mxu1  ;;  %v3697_v2 = vpop.f32.mrf.mxu0  ;;  %3738 = vmatprep.mubr.msk.f32.mxu0 %vm3970_vm1, %v3969_v8 }
 0x4db   : > { %v2618_v60 = vld [vmem:[#allocation5] sm:$0xff] }
 0x4dc   : > { %v2822_v15 = vrot.slane %v2618_v60, %v4301_v49  ;;  %v2811_v61 = vrot.slane %v2618_v60, %v4295_v47  ;;  %v2833_v4 = vrot.slane %v2618_v60, %v4307_v53  ;;  %v2844_v50 = vrot.slane %v2618_v60, %v4312_v56 }
 0x4dd   : > { %v2855_v48 = vrot.slane %v2618_v60, %v4416_v42  ;;  %v2866_v0 = vrot.slane %v2618_v60, %v4424_v45  ;;  %v2877_v22 = vrot.slane %v2618_v60, %v4431_v51  ;;  %v2888_v28 = vrot.slane %v2618_v60, %v4436_v54 }
 0x4de   : > { %2828 = vbcast.lane.b32.xlu0 %v2822_v15, 264  ;;  %2813 = vbcast.lane.b32.xlu1 %v2811_v61, 256 }
 0x4e2   : > { %2839 = vbcast.lane.b32.xlu0 %v2833_v4, 264  ;;  %2817 = vbcast.lane.b32.xlu1 %v2811_v61, 264 }
 0x4e3   : > { %v2505_v58 = vpop.f32.mrf.mxu1 }
 0x4e4   : > { %2609 = vst.msk [vmem:[#allocation6] sm:$0xff] %vm1525_vm7, %v2505_v58 }
 0x4e5   : > { %v3716_v52 = vpop.f32.mrf.mxu1 }
 0x4e6   : > { %2850 = vbcast.lane.b32.xlu0 %v2844_v50, 264  ;;  %2824 = vbcast.lane.b32.xlu1 %v2822_v15, 256 }
 0x4ea   : > { %2861 = vbcast.lane.b32.xlu0 %v2855_v48, 264  ;;  %2835 = vbcast.lane.b32.xlu1 %v2833_v4, 256 }
 0x4eb   : > { %v2619_v41 = vld [vmem:[#allocation6] sm:$0xff] }
 0x4ec   : > { %v2955_v23 = vrot.slane %v2619_v41, %v4295_v47  ;;  %v2966_v38 = vrot.slane %v2619_v41, %v4301_v49  ;;  %v2977_v33 = vrot.slane %v2619_v41, %v4307_v53  ;;  %v2988_v19 = vrot.slane %v2619_v41, %v4312_v56 }
 0x4ed   : > { %v2999_v9 = vrot.slane %v2619_v41, %v4416_v42  ;;  %v3010_v20 = vrot.slane %v2619_v41, %v4424_v45  ;;  %v3021_v49 = vrot.slane %v2619_v41, %v4431_v51  ;;  %v3032_v53 = vrot.slane %v2619_v41, %v4436_v54  ;;  %v907_v42 = vld [vmem:[%s5077_s26 + $0x38] sm:$0xff]  ;;  %v906_v45 = vld [vmem:[%s5077_s26 + $0x30] sm:$0xff]  ;;  %v905_v51 = vld [vmem:[%s5077_s26 + $0x28] sm:$0xff] }
 0x4ee   : > { %2872 = vbcast.lane.b32.xlu0 %v2866_v0, 264  ;;  %2846 = vbcast.lane.b32.xlu1 %v2844_v50, 256  ;;  %v904_v54 = vld [vmem:[%s5077_s26 + $0x20] sm:$0xff] }
 0x4ef   : > { %3723 = vmatpush3.msra.mxu0 %v907_v42 }
 0x4f0   : > { %3724 = vmatprep.subr.mxu0 %v3969_v8 }
 0x4f1   : > { %3725 = vmatpush3.msra.mxu0 %v906_v45 }
 0x4f2   : > { %2883 = vbcast.lane.b32.xlu0 %v2877_v22, 264  ;;  %2857 = vbcast.lane.b32.xlu1 %v2855_v48, 256 }
 0x4f3   : > { %3726 = vmatprep.subr.mxu0 %v3969_v8 }
 0x4f4   : > { %3727 = vmatpush3.msra.mxu0 %v905_v51 }
 0x4f5   : > { %3728 = vmatprep.subr.mxu0 %v3969_v8 }
 0x4f6   : > { %2894 = vbcast.lane.b32.xlu0 %v2888_v28, 264  ;;  %2868 = vbcast.lane.b32.xlu1 %v2866_v0, 256 }
 0x4f7   : > { %3729 = vmatpush3.msra.mxu0 %v904_v54 }
 0x4f8   : > { %3730 = vmatprep.subr.mxu0 %v3969_v8 }
 0x4f9   : > { %3731 = vmatpush3.msra.mxu0 %v903_v27 }
 0x4fa   : > { %2961 = vbcast.lane.b32.xlu0 %v2955_v23, 264  ;;  %2879 = vbcast.lane.b32.xlu1 %v2877_v22, 256 }
 0x4fb   : > { %3732 = vmatprep.subr.mxu0 %v3969_v8 }
 0x4fc   : > { %3733 = vmatpush3.msra.mxu0 %v902_v57 }
 0x4fd   : > { %3734 = vmatprep.subr.mxu0 %v3969_v8 }
 0x4fe   : > { %2972 = vbcast.lane.b32.xlu0 %v2966_v38, 264  ;;  %2890 = vbcast.lane.b32.xlu1 %v2888_v28, 256 }
 0x4ff   : > { %3735 = vmatpush3.msra.mxu0 %v901_v5 }
 0x500   : > { %3736 = vmatprep.subr.mxu0 %v3969_v8 }
 0x501   : > { %3737 = vmatpush3.msra.mxu0 %v900_v31 }
 0x502   : > { %2983 = vbcast.lane.b32.xlu0 %v2977_v33, 264  ;;  %2957 = vbcast.lane.b32.xlu1 %v2955_v23, 256 }
 0x506   : > { %2994 = vbcast.lane.b32.xlu0 %v2988_v19, 264  ;;  %2968 = vbcast.lane.b32.xlu1 %v2966_v38, 256 }
 0x50a   : > { %3005 = vbcast.lane.b32.xlu0 %v2999_v9, 264  ;;  %2979 = vbcast.lane.b32.xlu1 %v2977_v33, 256 }
 0x50e   : > { %3016 = vbcast.lane.b32.xlu0 %v3010_v20, 264  ;;  %2990 = vbcast.lane.b32.xlu1 %v2988_v19, 256 }
 0x512   : > { %3027 = vbcast.lane.b32.xlu0 %v3021_v49, 264  ;;  %3001 = vbcast.lane.b32.xlu1 %v2999_v9, 256 }
 0x516   : > { %3038 = vbcast.lane.b32.xlu0 %v3032_v53, 264  ;;  %3012 = vbcast.lane.b32.xlu1 %v3010_v20, 256 }
 0x51a   : > { %3023 = vbcast.lane.b32.xlu1 %v3021_v49, 256 }
 0x51c   : > { %v4820_v14 = vpop.f32.mrf.mxu1 }
 0x51e   : > { %v3759_v56 = vpop.f32.mrf.mxu1  ;;  %3034 = vbcast.lane.b32.xlu1 %v3032_v53, 256 }
 0x550   : > { %v4856_v32 = vpop.permute.xlu1 %2813  ;;  %v4860_v3 = vpop.permute.xlu0 %2828 }
 0x554   : > { %v4858_v16 = vpop.permute.xlu1 %2817  ;;  %v4867_v6 = vpop.permute.xlu0 %2839 }
 0x558   : > { %v4862_v8 = vpop.permute.xlu1 %2824  ;;  %v4874_v35 = vpop.permute.xlu0 %2850 }
 0x55c   : > { %v4869_v62 = vpop.permute.xlu1 %2835  ;;  %v4880_v2 = vpop.permute.xlu0 %2861 }
 0x560   : > { %v4876_v13 = vpop.permute.xlu1 %2846  ;;  %v4885_v61 = vpop.permute.xlu0 %2872 }
 0x564   : > { %v4882_v60 = vpop.permute.xlu1 %2857  ;;  %v4897_v33 = vpop.permute.xlu0 %2883 }
 0x568   : > { %v4887_v4 = vpop.permute.xlu1 %2868  ;;  %v4908_v27 = vpop.permute.xlu0 %2894 }
 0x56c   : > { %v4899_v19 = vpop.permute.xlu1 %2879 }
 0x570   : > { %v4910_v57 = vpop.permute.xlu1 %2890 }
 0x594   : > { %v2587_v12 = vpop.f32.mrf.mxu0 }
 0x595   : > { %v2588_v10 = vadd.f32 %v3440_v7, %v2587_v12 }
 0x596   : > { %v3721_v29 = vpop.f32.mrf.mxu0 }
 0x597   : > { %v2592_v1 = vmin.f32 %v2588_v10, 20.0  ;;  %vm2591_vm3 = vcmp.gt.f32.partialorder %v2588_v10, 20.0 }
 0x599   : > { %v2593_v39 = vmul.f32 1.442695, %v2592_v1 }
 0x59b   : > { %3860 = vpow2.f32 %v2593_v39 }
 0x5a8   : > { %v3861_v25 = vpop.eup %3860 }
 0x5a9   : > { %v2595_v63 = vadd.f32 1.0, %v3861_v25  ;;  %v2598_v43 = vmul.f32 -0.5, %v3861_v25  ;;  %v2601_v24 = vand.u32 2147483647, %v3861_v25 }
 0x5ab   : > { %3862 = vlog2.f32 %v2595_v63  ;;  %v2599_v44 = vadd.f32 1.0, %v2598_v43  ;;  %vm2602_vm1 = vcmp.lt.f32.partialorder %v2601_v24, 0.0004427343 }
 0x5ac   : > { %3864 = vpow2.f32 %v2610_v59  ;;  %v4920_v59 = vpop.permute.xlu1 %2957 }
 0x5ad   : > { %v2600_v11 = vmul.f32 %v3861_v25, %v2599_v44  ;;  %3866 = vpow2.f32 %v2612_v40  ;;  %v4918_v44 = vpop.permute.xlu0 %2961 }
 0x5b8   : > { %v3863_v37 = vpop.eup %3862 }
 0x5b9   : > { %v2597_v21 = vmul.f32 0.6931472, %v3863_v37  ;;  %v3865_v50 = vpop.eup %3864 }
 0x5ba   : > { %v3867_v52 = vpop.eup %3866  ;;  %v4891_v22 = vsub.f32 0.0, %v3865_v50 }
 0x5bb   : > { %v2603_v55 = vsel %vm2602_vm1, %v2600_v11, %v2597_v21  ;;  %v4894_v41 = vsub.f32 0.0, %v3867_v52 }
 0x5bc   : > { %v2604_v34 = vsel %vm2591_vm3, %v2588_v10, %v2603_v55 }
 0x5bd   : > { %2605 = vst.msk [vmem:[#allocation3] sm:$0xff] %vm1167_vm5, %v2604_v34  ;;  %v2606_v17 = vmul.f32 %v2604_v34, %v4603_v46 }
 0x5bf   : > { %2607 = vst.msk [vmem:[#allocation4] sm:$0xff] %vm1167_vm5, %v2606_v17 }
 0x5c4   : > { %v2616_v15 = vld [vmem:[#allocation3] sm:$0xff] }
 0x5c5   : > { %v2628_v58 = vrot.slane %v2616_v15, %v4560_v30  ;;  %v2621_v23 = vcombine.high %v2616_v15, %v2616_v15 }
 0x5c6   : > { %v2617_v31 = vld [vmem:[#allocation4] sm:$0xff] }
 0x5c7   : > { %v2636_v48 = vcombine.high %v2628_v58, %v2628_v58  ;;  %v2644_v0 = vrot.slane %v2628_v58, %v4560_v30  ;;  %v2635_v53 = vrot.slane %v2621_v23, %v4560_v30  ;;  %v2766_v43 = vrot.slane %v2617_v31, %v4560_v30 }
 0x5c8   : > { %v2759_v55 = vcombine.high %v2617_v31, %v2617_v31 }
 0x5c9   : > { %v2658_v28 = vrot.slane %v2636_v48, %v4560_v30  ;;  %v2673_v38 = vrot.slane %v2644_v0, %v4295_v47  ;;  %v2666_v9 = vcombine.high %v2644_v0, %v2644_v0  ;;  %v2637_v7 = vcombine.high %v2635_v53, %v2635_v53 }
 0x5ca   : > { %v2651_v12 = vrot.slane %v2635_v53, %v4560_v30  ;;  %v2774_v34 = vcombine.high %v2766_v43, %v2766_v43  ;;  %v2782_v17 = vrot.slane %v2766_v43, %v4560_v30  ;;  %v2773_v23 = vrot.slane %v2759_v55, %v4560_v30 }
 0x5cb   : > { %v2677_v20 = vrot.slane %v2658_v28, %v4295_v47  ;;  %v2710_v49 = vmul.f32 %v2673_v38, %v4891_v22  ;;  %v2711_v56 = vmul.f32 %v2673_v38, %v4894_v41  ;;  %v2668_v42 = vcombine.high %v2658_v28, %v2658_v28  ;;  %v4931_v38 = vpop.permute.xlu0 %2972 }
 0x5cc   : > { %v2681_v45 = vrot.slane %v2666_v9, %v4295_v47  ;;  %v2665_v18 = vrot.slane %v2637_v7, %v4560_v30  ;;  %v2667_v26 = vcombine.high %v2651_v12, %v2651_v12  ;;  %v2689_v24 = vrot.slane %v2651_v12, %v4295_v47  ;;  %v2969_v9 = vpop.permute.xlu1 %2968 }
 0x5cd   : > { %v2712_v51 = vmul.f32 %v2677_v20, %v4891_v22  ;;  %v2713_v54 = vmul.f32 %v2677_v20, %v4894_v41  ;;  %v2726_v5 = vmul.f32 1.442695, %v2710_v49  ;;  %v2728_v10 = vmul.f32 1.442695, %v2711_v56 }
 0x5ce   : > { %v2685_v29 = vrot.slane %v2668_v42, %v4295_v47  ;;  %v2714_v1 = vmul.f32 %v2681_v45, %v4891_v22  ;;  %v2715_v25 = vmul.f32 %v2681_v45, %v4894_v41  ;;  %v2669_v15 = vcombine.high %v2665_v18, %v2665_v18 }
 0x5cf   : > { %3868 = vpow2.f32 %v2726_v5  ;;  %v2730_v39 = vmul.f32 1.442695, %v2712_v51  ;;  %v2732_v63 = vmul.f32 1.442695, %v2713_v54  ;;  %v2693_v58 = vrot.slane %v2665_v18, %v4295_v47 }
 0x5d0   : > { %3870 = vpow2.f32 %v2728_v10  ;;  %v2716_v40 = vmul.f32 %v2685_v29, %v4891_v22  ;;  %v2734_v37 = vmul.f32 1.442695, %v2714_v1  ;;  %v2717_v21 = vmul.f32 %v2685_v29, %v4894_v41 }
 0x5d1   : > { %3872 = vpow2.f32 %v2730_v39  ;;  %v2736_v11 = vmul.f32 1.442695, %v2715_v25  ;;  %v2697_v50 = vrot.slane %v2667_v26, %v4295_v47  ;;  %v2718_v52 = vmul.f32 %v2689_v24, %v4891_v22 }
 0x5d2   : > { %3874 = vpow2.f32 %v2732_v63  ;;  %v2738_v48 = vmul.f32 1.442695, %v2716_v40  ;;  %v2719_v0 = vmul.f32 %v2689_v24, %v4894_v41  ;;  %v2740_v28 = vmul.f32 1.442695, %v2717_v21  ;;  %v2984_v24 = vpop.permute.xlu0 %2983  ;;  %v2980_v40 = vpop.permute.xlu1 %2979 }
 0x5d3   : > { %3876 = vpow2.f32 %v2734_v37  ;;  %v2796_v20 = vrot.slane %v2774_v34, %v4560_v30  ;;  %v2899_v49 = vrot.slane %v2782_v17, %v4295_v47  ;;  %v3444_v53 = vmul.f32 -1.442695, %v4525_v36 }
 0x5d4   : > { %3878 = vpow2.f32 %v2736_v11  ;;  %v2701_v56 = vrot.slane %v2669_v15, %v4295_v47  ;;  %v2720_v42 = vmul.f32 %v2693_v58, %v4891_v22  ;;  %v2721_v45 = vmul.f32 %v2693_v58, %v4894_v41 }
 0x5d5   : > { %v2722_v51 = vmul.f32 %v2697_v50, %v4891_v22  ;;  %3880 = vpow2.f32 %v2738_v48  ;;  %v2742_v54 = vmul.f32 1.442695, %v2718_v52  ;;  %v2723_v31 = vmul.f32 %v2697_v50, %v4894_v41 }
 0x5d6   : > { %3882 = vpow2.f32 %v2740_v28  ;;  %v2744_v7 = vmul.f32 1.442695, %v2719_v0  ;;  %v2775_v12 = vcombine.high %v2773_v23, %v2773_v23  ;;  %v2804_v29 = vcombine.high %v2782_v17, %v2782_v17 }
 0x5d7   : > { %v2903_v1 = vrot.slane %v2796_v20, %v4295_v47  ;;  %v2936_v39 = vmul.f32 %v2899_v49, %v4856_v32  ;;  %v2724_v63 = vmul.f32 %v2701_v56, %v4891_v22  ;;  %v2725_v43 = vmul.f32 %v2701_v56, %v4894_v41 }
 0x5d8   : > { %v2937_v18 = vmul.f32 %v2899_v49, %v4858_v16  ;;  %3884 = vpow2.f32 %v2742_v54  ;;  %v2746_v37 = vmul.f32 1.442695, %v2720_v42  ;;  %v2806_v21 = vcombine.high %v2796_v20, %v2796_v20  ;;  %v2991_v54 = vpop.permute.xlu1 %2990 }
 0x5d9   : > { %3886 = vpow2.f32 %v2744_v7  ;;  %v2748_v34 = vmul.f32 1.442695, %v2721_v45  ;;  %v4947_v17 = vrot.slane %v2773_v23, %v4560_v30  ;;  %v4950_v22 = vrot.slane %v2775_v12, %v4560_v30  ;;  %v2995_v45 = vpop.permute.xlu0 %2994 }
 0x5da   : > { %v2907_v16 = vrot.slane %v2804_v29, %v4295_v47  ;;  %v2938_v41 = vmul.f32 %v2903_v1, %v4862_v8  ;;  %3888 = vpow2.f32 %v3444_v53  ;;  %v2750_v50 = vmul.f32 1.442695, %v2722_v51 }
 0x5db   : > { %v2939_v52 = vmul.f32 %v2903_v1, %v4860_v3  ;;  %3890 = vpow2.f32 %v2746_v37  ;;  %v2752_v0 = vmul.f32 1.442695, %v2723_v31  ;;  %v2911_v28 = vrot.slane %v2806_v21, %v4295_v47 }
 0x5dc   : > { %v3869_v5 = vpop.eup %3868  ;;  %3892 = vpow2.f32 %v2748_v34  ;;  %v2754_v49 = vmul.f32 1.442695, %v2724_v63  ;;  %v2756_v30 = vmul.f32 1.442695, %v2725_v43  ;;  %v2805_v8 = vcombine.high %v4947_v17, %v4947_v17 }
 0x5dd   : > { %v3871_v10 = vpop.eup %3870  ;;  %v3040_v25 = vmul.f32 0.0, %v3869_v5  ;;  %v2807_v3 = vcombine.high %v4950_v22, %v4950_v22  ;;  %v2940_v53 = vmul.f32 %v2907_v16, %v4869_v62  ;;  %v2941_v5 = vmul.f32 %v2907_v16, %v4867_v6  ;;  %v3006_v21 = vpop.permute.xlu0 %3005 }
 0x5de   : > { %v3041_v26 = vmul.f32 0.0, %v3871_v10  ;;  %v3873_v55 = vpop.eup %3872  ;;  %3894 = vpow2.f32 %v2750_v50  ;;  %v2915_v10 = vrot.slane %v4947_v17, %v4295_v47  ;;  %v2942_v29 = vmul.f32 %v2911_v28, %v4876_v13 }
 0x5df   : > { %v3042_v11 = vadd.f32 %v3040_v25, %v2936_v39  ;;  %v3875_v15 = vpop.eup %3874  ;;  %3896 = vpow2.f32 %v2752_v0  ;;  %v2943_v6 = vmul.f32 %v2911_v28, %v4874_v35  ;;  %v2923_v28 = vrot.slane %v2805_v8, %v4295_v47 }
 0x5e0   : > { %v3043_v32 = vadd.f32 %v3041_v26, %v2937_v18  ;;  %v3877_v20 = vpop.eup %3876  ;;  %3898 = vpow2.f32 %v2754_v49  ;;  %v2945_v50 = vmul.f32 %v2915_v10, %v4880_v2 }
 0x5e1   : > { %v3055_v58 = vmul.f32 %v3873_v55, %v3042_v11  ;;  %v3879_v42 = vpop.eup %3878  ;;  %v3044_v25 = vmul.f32 %v3042_v11, %v4920_v59  ;;  %v3002_v55 = vpop.permute.xlu1 %3001  ;;  %3900 = vpow2.f32 %v2756_v30  ;;  %v2919_v59 = vrot.slane %v4950_v22, %v4295_v47 }
 0x5e2   : > { %v3056_v48 = vmul.f32 %v3875_v15, %v3043_v32  ;;  %v3881_v39 = vpop.eup %3880  ;;  %v3045_v62 = vmul.f32 %v3043_v32, %v4918_v44 }
 0x5e3   : > { %v3057_v23 = vadd.f32 %v3055_v58, %v2938_v41  ;;  %v3883_v43 = vpop.eup %3882  ;;  %v3046_v35 = vsel %vm1167_vm5, %v3044_v25, 0.0 }
 0x5e4   : > { %v3058_v56 = vadd.f32 %v3056_v48, %v2939_v52 }
 0x5e5   : > { %v3070_v51 = vmul.f32 %v3877_v20, %v3057_v23  ;;  %v3059_v31 = vmul.f32 %v3057_v23, %v2969_v9  ;;  %v3885_v34 = vpop.eup %3884  ;;  %v2927_v23 = vrot.slane %v2807_v3, %v4295_v47 }
 0x5e6   : > { %v3060_v7 = vmul.f32 %v3058_v56, %v4931_v38  ;;  %v3071_v12 = vmul.f32 %v3879_v42, %v3058_v56  ;;  %v3887_v15 = vpop.eup %3886 }
 0x5e7   : > { %v3072_v1 = vadd.f32 %v3070_v51, %v2940_v53  ;;  %v3061_v18 = vsel %vm1167_vm5, %v3059_v31, 0.0  ;;  %v4979_v0 = vpop.eup %3888  ;;  %v3013_v53 = vpop.permute.xlu1 %3012  ;;  %v2947_v51 = vmul.f32 %v2919_v59, %v4885_v61 }
 0x5e8   : > { %v3073_v63 = vadd.f32 %v3071_v12, %v2941_v5  ;;  %v3062_v26 = vsel %vm1167_vm5, %v3060_v7, 0.0  ;;  %v3891_v30 = vpop.eup %3890 }
 0x5e9   : > { %v3074_v38 = vmul.f32 %v3072_v1, %v2980_v40  ;;  %v3085_v9 = vmul.f32 %v3881_v39, %v3072_v1  ;;  %v3047_v40 = vsel %vm1167_vm5, %v3045_v62, 0.0  ;;  %v3063_v16 = vadd.f32 %v3062_v26, %v3061_v18  ;;  %v3893_v2 = vpop.eup %3892 }
 0x5ea   : > { %v3075_v37 = vmul.f32 %v3073_v63, %v2984_v24  ;;  %v3086_v13 = vmul.f32 %v3883_v43, %v3073_v63  ;;  %v2944_v24 = vmul.f32 %v2915_v10, %v4882_v60  ;;  %v3048_v20 = vadd.f32 %v3047_v40, %v3046_v35 }
 0x5eb   : > { %v3076_v44 = vsel %vm1167_vm5, %v3074_v38, 0.0  ;;  %v3087_v11 = vadd.f32 %v3085_v9, %v2942_v29  ;;  %v2946_v60 = vmul.f32 %v2919_v59, %v4887_v4  ;;  %v3064_v5 = vrot.slane %v3063_v16, 4  ;;  %v3895_v39 = vpop.eup %3894 }
 0x5ec   : > { %v3077_v17 = vsel %vm1167_vm5, %v3075_v37, 0.0  ;;  %v3088_v32 = vadd.f32 %v3086_v13, %v2943_v6  ;;  %v2948_v10 = vmul.f32 %v2923_v28, %v4899_v19  ;;  %v2949_v4 = vmul.f32 %v2923_v28, %v4897_v33  ;;  %v3897_v43 = vpop.eup %3896 }
 0x5ed   : > { %v3078_v41 = vadd.f32 %v3077_v17, %v3076_v44  ;;  %v3089_v58 = vmul.f32 %v3087_v11, %v2991_v54  ;;  %v3100_v52 = vmul.f32 %v3885_v34, %v3087_v11  ;;  %v3049_v29 = vrot.slane %v3048_v20, 4  ;;  %v3899_v26 = vpop.eup %3898 }
 0x5ee   : > { %v3090_v22 = vmul.f32 %v3088_v32, %v2995_v45  ;;  %v3101_v48 = vmul.f32 %v3887_v15, %v3088_v32  ;;  %v3017_v45 = vpop.permute.xlu0 %3016  ;;  %v2950_v6 = vmul.f32 %v2927_v23, %v4910_v57  ;;  %v3065_v38 = vadd.f32 %v3064_v5, %v3063_v16  ;;  %v3901_v35 = vpop.eup %3900 }
 0x5ef   : > { %v3091_v49 = vsel %vm1167_vm5, %v3089_v58, 0.0  ;;  %v3102_v42 = vadd.f32 %v3100_v52, %v2944_v24  ;;  %v3079_v31 = vrot.slane %v3078_v41, 4  ;;  %v2951_v59 = vmul.f32 %v2927_v23, %v4908_v27 }
 0x5f0   : > { %v3092_v56 = vsel %vm1167_vm5, %v3090_v22, 0.0  ;;  %v3103_v54 = vadd.f32 %v3101_v48, %v2945_v50  ;;  %v3050_v44 = vadd.f32 %v3049_v29, %v3048_v20  ;;  %v3066_v15 = vrot.slane %v3065_v38, 2 }
 0x5f1   : > { %v3093_v8 = vadd.f32 %v3092_v56, %v3091_v49  ;;  %v3104_v7 = vmul.f32 %v3102_v42, %v3002_v55  ;;  %v3115_v3 = vmul.f32 %v3891_v30, %v3102_v42  ;;  %v3080_v9 = vadd.f32 %v3079_v31, %v3078_v41  ;;  %v3024_v55 = vpop.permute.xlu1 %3023 }
 0x5f2   : > { %v3105_v47 = vmul.f32 %v3103_v54, %v3006_v21  ;;  %v3116_v12 = vmul.f32 %v3893_v2, %v3103_v54  ;;  %v3028_v21 = vpop.permute.xlu0 %3027  ;;  %v3051_v48 = vrot.slane %v3050_v44, 2  ;;  %v3067_v54 = vadd.f32 %v3066_v15, %v3065_v38 }
 0x5f3   : > { %v3094_v1 = vrot.slane %v3093_v8, 4  ;;  %v3106_v25 = vsel %vm1167_vm5, %v3104_v7, 0.0  ;;  %v3117_v63 = vadd.f32 %v3115_v3, %v2946_v60  ;;  %v3081_v24 = vrot.slane %v3080_v9, 2 }
 0x5f4   : > { %v3107_v62 = vsel %vm1167_vm5, %v3105_v47, 0.0  ;;  %v3118_v61 = vadd.f32 %v3116_v12, %v2947_v51  ;;  %v3052_v31 = vadd.f32 %v3051_v48, %v3050_v44 }
 0x5f5   : > { %v3108_v18 = vadd.f32 %v3107_v62, %v3106_v25  ;;  %v3119_v37 = vmul.f32 %v3117_v63, %v3013_v53  ;;  %v3130_v13 = vmul.f32 %v3895_v39, %v3117_v63  ;;  %v3095_v11 = vadd.f32 %v3094_v1, %v3093_v8  ;;  %v3035_v42 = vpop.permute.xlu1 %3034 }
 0x5f6   : > { %v3120_v19 = vmul.f32 %v3118_v61, %v3017_v45  ;;  %v3131_v33 = vmul.f32 %v3897_v43, %v3118_v61  ;;  %v3039_v56 = vpop.permute.xlu0 %3038  ;;  %v3082_v53 = vadd.f32 %v3081_v24, %v3080_v9  ;;  %v3053_v62 = vrot.slane %v3052_v31, 1 }
 0x5f7   : > { %v3109_v34 = vrot.slane %v3108_v18, 4  ;;  %v3121_v40 = vsel %vm1167_vm5, %v3119_v37, 0.0  ;;  %v3132_v17 = vadd.f32 %v3130_v13, %v2948_v10  ;;  %v3096_v27 = vrot.slane %v3095_v11, 2 }
 0x5f8   : > { %v3122_v57 = vsel %vm1167_vm5, %v3120_v19, 0.0  ;;  %v3133_v32 = vadd.f32 %v3131_v33, %v2949_v4  ;;  %v3068_v4 = vrot.slane %v3067_v54, 1  ;;  %v3083_v25 = vrot.slane %v3082_v53, 1 }
 0x5f9   : > { %v3110_v16 = vadd.f32 %v3109_v34, %v3108_v18  ;;  %v3123_v41 = vadd.f32 %v3122_v57, %v3121_v40  ;;  %v3134_v58 = vmul.f32 %v3132_v17, %v3024_v55  ;;  %v3145_v22 = vmul.f32 %v3899_v26, %v3132_v17 }
 0x5fa   : > { %v3135_v50 = vmul.f32 %v3133_v32, %v3028_v21  ;;  %v3146_v52 = vmul.f32 %v3901_v35, %v3133_v32  ;;  %v3097_v8 = vadd.f32 %v3096_v27, %v3095_v11  ;;  %v3069_v9 = vadd.f32 %v3068_v4, %v3067_v54 }
 0x5fb   : > { %v3111_v28 = vrot.slane %v3110_v16, 2  ;;  %v3124_v23 = vrot.slane %v3123_v41, 4  ;;  %v3136_v20 = vsel %vm1167_vm5, %v3134_v58, 0.0  ;;  %v3147_v30 = vadd.f32 %v3145_v22, %v2950_v6 }
 0x5fc   : > { %v3137_v49 = vsel %vm1167_vm5, %v3135_v50, 0.0  ;;  %v3148_v60 = vadd.f32 %v3146_v52, %v2951_v59  ;;  %v3098_v63 = vrot.slane %v3097_v8, 1  ;;  %v3180_v6 = vadd.f32 1.0, %v4979_v0 }
 0x5fd   : > { %v3125_v2 = vadd.f32 %v3124_v23, %v3123_v41  ;;  %v3138_v45 = vadd.f32 %v3137_v49, %v3136_v20  ;;  %v3149_v51 = vmul.f32 %v3147_v30, %v3035_v42  ;;  %v3112_v3 = vadd.f32 %v3111_v28, %v3110_v16  ;;  %v3443_v41 = vld [vmem:[%s5076_s25] ss:$0 sm:$0xff] }
 0x5fe   : > { %v3150_v5 = vmul.f32 %v3148_v60, %v3039_v56  ;;  %v3084_v19 = vadd.f32 %v3083_v25, %v3082_v53  ;;  %v3054_v13 = vadd.f32 %v3053_v62, %v3052_v31  ;;  %v3099_v33 = vadd.f32 %v3098_v63, %v3097_v8  ;;  %v3906_v49 = vld [vmem:[%s4166_s10] sm:$0xff]  ;;  %s3339_s10 = scalar_lea.sflag [#allocation9], %s807_s8 }
 0x5ff   : > { %v3126_v7 = vrot.slane %v3125_v2, 2  ;;  %v3139_v47 = vrot.slane %v3138_v45, 4  ;;  %v3151_v12 = vsel %vm1167_vm5, %v3149_v51, 0.0  ;;  %v3113_v38 = vrot.slane %v3112_v3, 1 }
 0x600   : > { %v3152_v10 = vsel %vm1167_vm5, %v3150_v5, 0.0  ;;  %3902 = vrcp.f32 %v3180_v6  ;;  %v3160_v34 = vsel %vm2078_vm11, %v3054_v13, %v3069_v9  ;;  %v3175_v50 = vmul.f32 %v3443_v41, %v4603_v46 }
 0x601   : > { %v3127_v29 = vadd.f32 %v3126_v7, %v3125_v2  ;;  %v3140_v1 = vadd.f32 %v3139_v47, %v3138_v45  ;;  %v3153_v39 = vadd.f32 %v3152_v10, %v3151_v12  ;;  %v3114_v59 = vadd.f32 %v3113_v38, %v3112_v3 }
 0x602   : > { %v3161_v40 = vsel %vm1434_vm6, %v3160_v34, %v3084_v19 }
 0x603   : > { %v3141_v61 = vrot.slane %v3140_v1, 2  ;;  %v3154_v43 = vrot.slane %v3153_v39, 4  ;;  %v3128_v18 = vrot.slane %v3127_v29, 1  ;;  %v3162_v57 = vsel %vm2081_vm12, %v3161_v40, %v3099_v33 }
 0x604   : > { %v3163_v17 = vsel %vm2083_vm13, %v3162_v57, %v3114_v59 }
 0x605   : > { %v3142_v26 = vadd.f32 %v3141_v61, %v3140_v1  ;;  %v3155_v37 = vadd.f32 %v3154_v43, %v3153_v39  ;;  %v3129_v44 = vadd.f32 %v3128_v18, %v3127_v29 }
 0x607   : > { %v3143_v21 = vrot.slane %v3142_v26, 1  ;;  %v3156_v55 = vrot.slane %v3155_v37, 2  ;;  %v3164_v15 = vsel %vm2085_vm14, %v3163_v17, %v3129_v44 }
 0x609   : > { %v3157_v11 = vadd.f32 %v3156_v55, %v3155_v37  ;;  %v3144_v35 = vadd.f32 %v3143_v21, %v3142_v26 }
 0x60b   : > { %v3158_v0 = vrot.slane %v3157_v11, 1  ;;  %v3165_v24 = vsel %vm2087_vm15, %v3164_v15, %v3144_v35 }
 0x60d   : > { %v3159_v32 = vadd.f32 %v3158_v0, %v3157_v11  ;;  %v3903_v58 = vpop.eup %3902 }
 0x60e   : > { %v3183_v52 = vmul.f32 %v3903_v58, %v4525_v36 }
 0x60f   : > { %v3166_v16 = vsel %vm2089_vm2, %v3165_v24, %v3159_v32 }
 0x610   : > { %3167 = vst.msk [vmem:[#allocation7] sm:$0xff] %vm1167_vm5, %v3166_v16 }
 0x617   : > { %v3168_v22 = vld [vmem:[#allocation7] sm:$0xff] }
 0x618   : > { %v3176_v48 = vadd.f32 %v3175_v50, %v3168_v22 }
 0x61a   : > { %v3184_v27 = vmul.f32 %v3183_v52, %v3176_v48 }
 0x61c   : > { %3739 = vmatmul.mubr.msk.f32.vlgmr.msra.gmra.mxu0 %vm1167_vm5, %v3184_v27 }
 0x6dc   : > { %v3254_v28 = vpop.f32.mrf.mxu0 }
 0x6dd   : > { %v3328_v23 = vadd.f32 %v4820_v14, %v3254_v28 }
 0x6de   : > { %v3740_v20 = vpop.f32.mrf.mxu0 }
 0x6df   : > { %v3331_v30 = vadd.f32 %v3906_v49, %v3328_v23 }
 0x6e1   : > { %v3333_v60 = vmul.f32 0.70710677, %v3331_v30  ;;  %v3332_v36 = vmul.f32 0.5, %v3331_v30 }
 0x6e3   : > { %3904 = verf.f32 %v3333_v60 }
 0x6f0   : > { %v3905_v46 = vpop.eup %3904 }
 0x6f1   : > { %v3335_v56 = vadd.f32 1.0, %v3905_v46 }
 0x6f3   : > { %v3336_v42 = vmul.f32 %v3335_v56, %v3332_v36 }
 0x6f5   : > { %3337 = vst.msk [vmem:[%s809_s28] sm:$0xff] %vm909_vm0, %v3336_v42 }
 0x6f6   : > { %3920 = shalt.err (!%p3917_p3)
}
 0x6f7   : > { %s3921_s5 = scalar_lea.hbm %s3350_s6, 128  ;;  %s3925_s28 = scalar_lea.hbm %s5078_s27, 256 }
 0x6f8   : > { %p3922_p4 = scmp.ne.s32.totalorder %s3350_s6, %s3921_s5  ;;  %p3926_p9 = scmp.lt.s32.totalorder %s3350_s6, %s5078_s27 }
 0x6f9   : > { %p3927_p10 = scmp.lt.s32.totalorder %s3925_s28, %s3921_s5 }
 0x6fa   : > { %p3923_p7 = pnand %p3922_p4, %p4151_p5 }
 0x6fb   : > { %p3928_p11 = por %p3927_p10, %p3926_p9 }
 0x6fc   : > { %p3924_p8 = pneg %p3923_p7 }
 0x6fe   : > { %p3929_p12 = pnand %p3928_p11, %p3924_p8 }
 0x700   : > { %3932 = shalt.err (!%p3929_p12)
}
 0x701   : > { %3760 = dma.vmem_to_hbm [thread:$0]  (%p4151_p5), %s3353_s7, 128, %s3350_s6, %s3339_s10  }
 0x702 PF: > { %s5130_s12 = sld [smem:[#allocation11_spill]]  ;;  %p3766_p13 = scmp.ge.s32.totalorder %s3967_s30, 2 }
 0x704   : > { %p3763_p0 = pnand %p3766_p13, %p4155_p6 }
 0x706   : > { %p3764_p1 = pneg %p3763_p0 }
 0x708   : > { %s3364_s9 = sand.u32 1, %s5130_s12  }
 0x709   : > { %s3365_s2 = scalar_lea.sflag [#allocation9], %s3364_s9 }
 0x70a   : > { %3950 = dma.done.wait (%p3764_p1), %s3365_s2, 128  }
 0x70b   : > { %3952 = vsyncadd (%p3764_p1), %s3365_s2, 4294967168  ;;  %s5132_s30 = sld [smem:[#allocation13_spill]]  ;;  %s5135_s7 = smov %s3959_s4 }
 0x70c   : > { %s5133_s13 = sld [smem:[#allocation12_spill]] }
 0x70d   : > { %s5134_s8 = sld [smem:[#allocation14_spill]] }
 0x711   : > { %p37_p2 = scmp.ge.s32.totalorder %s5132_s30, 4  }
 0x712   : > { %s5136_s4 = smov %s5133_s13 }
 0x713   :  { %39 = sbr.rel (!%p37_p2) target bundleno = 18 (0x12), region = 163 }
 0x718   :  { %3370 = vsyncpa [#allocation9], 1 }
 0x719   :  { %3372 = vsyncpa [#allocation9 + $0x1], 1 }

</bundles_post_ra>
